<compile_context>
chip_gen: v6e
topology: v6e:2x2x1
jax: 0.10.0
libtpu: 0.0.40
codegen_flags: <defaults>
</compile_context>

<pallas_src>
import functools

import jax
import jax.numpy as jnp
from jax import lax
from jax.experimental import pallas as pl
from jax.experimental.pallas import tpu as pltpu


# Shared (row, col) in {0,1}^2 ordering used for phases, shifts and taps.
_SHIFTS = ((0, 0), (0, 1), (1, 0), (1, 1))


# --------------------------------------------------------- stride-2 3x3 conv (+ReLU) kernel
def _conv_s2_kernel(x_ref, w_ref, b_ref, o_ref, *, Hp, Wp, Ho, Wo, Cout):
    """Fused 3x3 / stride-2 / pad-1 conv + bias + ReLU for one image.

    x_ref: (1, Hp*Wp, 4*Cin)  -- the 4 even/odd phase planes of the padded input,
           concatenated along channels and flattened over space (Hp=Ho+1, Wp=Wo+1).
    w_ref: (4*Cin, 4*Cout)    -- (phase, shift) block tap matrix (zeros in the 7
           invalid of the 16 phase/shift blocks).
    b_ref: (1, Cout).   o_ref: (1, Ho, Wo, Cout).
    """
    x = x_ref[0, :, :]                                                  # (Hp*Wp, 4Cin)
    y = jnp.dot(x, w_ref[...], preferred_element_type=jnp.float32)     # (Hp*Wp, 4Cout)
    y = y.reshape(Hp, Wp, 4 * Cout)          # minormost dim unchanged -> cheap reshape

    # Shift-and-add the four (a, b) output shifts (slot s = 2a + b of the N blocks).
    acc = y[0:Ho, 0:Wo, 0:Cout]
    for s, (a, b) in enumerate(_SHIFTS[1:], start=1):
        acc = acc + y[a:a + Ho, b:b + Wo, s * Cout:(s + 1) * Cout]

    out = jnp.maximum(acc + b_ref[...], 0.0)
    o_ref[0, :, :, :] = out.astype(o_ref.dtype)


def conv3x3_s2_relu(x, w_big, b_row):
    """y = relu(conv2d(x, w, stride=2, padding=1) + b), NHWC, one fused matmul/image."""
    B, H, W, Cin = x.shape
    Cout = w_big.shape[-1] // 4
    assert w_big.shape[0] == 4 * Cin, (w_big.shape, Cin)
    assert H % 2 == 0 and W % 2 == 0, (H, W)
    Ho, Wo = H // 2, W // 2
    Hp, Wp = Ho + 1, Wo + 1

    # XLA glue: pad + 4 phase gathers + channel concat (one extra pass over the activation).
    xp = jnp.pad(x, ((0, 0), (1, 1), (1, 1), (0, 0)))
    phases = jnp.concatenate(
        [xp[:, r::2, c::2, :] for (r, c) in _SHIFTS], axis=-1)          # (B, Hp, Wp, 4Cin)
    phases = phases.reshape(B, Hp * Wp, 4 * Cin)

    kernel = functools.partial(_conv_s2_kernel, Hp=Hp, Wp=Wp, Ho=Ho, Wo=Wo, Cout=Cout)
    return pl.pallas_call(
        kernel,
        out_shape=jax.ShapeDtypeStruct((B, Ho, Wo, Cout), x.dtype),
        grid_spec=pltpu.PrefetchScalarGridSpec(
            num_scalar_prefetch=0,
            grid=(B,),
            in_specs=[pl.BlockSpec((1, Hp * Wp, 4 * Cin), lambda b: (b, 0, 0)),
                      pl.BlockSpec((4 * Cin, 4 * Cout), lambda b: (0, 0)),
                      pl.BlockSpec((1, Cout), lambda b: (0, 0))],
            out_specs=pl.BlockSpec((1, Ho, Wo, Cout), lambda b: (b, 0, 0, 0)),
        ),
        compiler_params=pltpu.CompilerParams(dimension_semantics=("parallel",)),
    )(phases, w_big, b_row)


# ------------------------------------------------ stride-2 3x3 transposed conv (+ReLU) kernel
def _im2col_2x2(x, H, W):
    """(H, W, C) -> (H*W, 4*C): the four (r, c) zero-extended taps, K-stacked in VMEM."""
    C = x.shape[-1]
    xp = jnp.concatenate([x, jnp.zeros((H, 1, C), x.dtype)], axis=1)
    xp = jnp.concatenate([xp, jnp.zeros((1, W + 1, C), xp.dtype)], axis=0)   # (H+1, W+1, C)
    taps = [xp[r:r + H, c:c + W, :].reshape(H * W, C) for (r, c) in _SHIFTS]
    return jnp.concatenate(taps, axis=-1)                                    # (H*W, 4C)


def _deconv_s2_kernel(*refs, H, W, has_skip, apply_relu):
    """Fused ConvTranspose2d(k=3, s=2, p=1, output_padding=1) (+skip concat, +ReLU).

    Inputs per image: main (1, H, W, Cm) [and skip (1, H, W, Cs)], weights pre-split
    along the concat channel axis as (4*Cm, 4*Cout) [and (4*Cs, 4*Cout)], bias (1, 4*Cout).
    Output: (1, H*W, 4*Cout) -- the 4 sub-pixel phases (rb, cb) stacked along lanes.
    """
    if has_skip:
        xm_ref, xs_ref, wm_ref, ws_ref, b_ref, o_ref = refs
    else:
        xm_ref, wm_ref, b_ref, o_ref = refs

    acc = jnp.dot(_im2col_2x2(xm_ref[0, :, :, :], H, W), wm_ref[...],
                  preferred_element_type=jnp.float32)                        # (H*W, 4Cout)
    if has_skip:
        acc = acc + jnp.dot(_im2col_2x2(xs_ref[0, :, :, :], H, W), ws_ref[...],
                            preferred_element_type=jnp.float32)

    out = acc + b_ref[...]
    if apply_relu:
        out = jnp.maximum(out, 0.0)
    o_ref[0, :, :] = out.astype(o_ref.dtype)


def convtranspose3x3_s2(x_main, w_main, b_row, *, x_skip=None, w_skip=None, apply_relu):
    """ConvTranspose2d(64->32 style, k=3, s=2, p=1, op=1) with the skip concat fused in."""
    B, H, W, Cm = x_main.shape
    N = w_main.shape[-1]
    Cout = N // 4
    assert w_main.shape[0] == 4 * Cm, (w_main.shape, Cm)
    has_skip = x_skip is not None

    in_arrays = [x_main]
    in_specs = [pl.BlockSpec((1, H, W, Cm), lambda b: (b, 0, 0, 0))]
    if has_skip:
        assert x_skip.shape[:3] == (B, H, W), (x_skip.shape, x_main.shape)
        Cs = x_skip.shape[-1]
        assert w_skip is not None and w_skip.shape == (4 * Cs, N)
        in_arrays.append(x_skip)
        in_specs.append(pl.BlockSpec((1, H, W, Cs), lambda b: (b, 0, 0, 0)))
    in_arrays.append(w_main)
    in_specs.append(pl.BlockSpec((4 * Cm, N), lambda b: (0, 0)))
    if has_skip:
        in_arrays.append(w_skip)
        in_specs.append(pl.BlockSpec((4 * x_skip.shape[-1], N), lambda b: (0, 0)))
    in_arrays.append(b_row)
    in_specs.append(pl.BlockSpec((1, N), lambda b: (0, 0)))

    kernel = functools.partial(_deconv_s2_kernel, H=H, W=W,
                               has_skip=has_skip, apply_relu=apply_relu)
    yp = pl.pallas_call(
        kernel,
        out_shape=jax.ShapeDtypeStruct((B, H * W, N), x_main.dtype),
        grid_spec=pltpu.PrefetchScalarGridSpec(
            num_scalar_prefetch=0,
            grid=(B,),
            in_specs=in_specs,
            out_specs=pl.BlockSpec((1, H * W, N), lambda b: (b, 0, 0)),
        ),
        compiler_params=pltpu.CompilerParams(dimension_semantics=("parallel",)),
    )(*in_arrays)

    # Depth-to-space: (B, H*W, (rb, cb, Cout)) -> (B, 2H, 2W, Cout).  Kept in XLA.
    # TODO(synk): fuse this interleave + a lane-dense (2W*Cout) store into the kernel.
    y = yp.reshape(B, H, W, 2, 2, Cout)
    return jnp.transpose(y, (0, 1, 3, 2, 4, 5)).reshape(B, 2 * H, 2 * W, Cout)


# ---------------------------------------------------------------------------------- forward
def unet_forward(x_nchw, kp):
    x = jnp.transpose(x_nchw, (0, 2, 3, 1))                       # NCHW -> NHWC
    H, W = x.shape[1], x.shape[2]
    # With H, W divisible by 8 every decoder output exactly matches its skip, so the
    # PyTorch crop branches are no-ops; assert so other sizes fail loudly.
    assert H % 8 == 0 and W % 8 == 0, (H, W)

    e1 = conv3x3_s2_relu(x, kp["e1_w"], kp["e1_b"])               # (B, H/2, W/2, 16)
    e2 = conv3x3_s2_relu(e1, kp["e2_w"], kp["e2_b"])              # (B, H/4, W/4, 32)
    e3 = conv3x3_s2_relu(e2, kp["e3_w"], kp["e3_b"])              # (B, H/8, W/8, 64)

    d3 = convtranspose3x3_s2(e3, kp["d3_wm"], kp["d3_b"], apply_relu=True)
    assert d3.shape == e2.shape, (d3.shape, e2.shape)             # crop would be a no-op
    d2 = convtranspose3x3_s2(d3, kp["d2_wm"], kp["d2_b"],
                             x_skip=e2, w_skip=kp["d2_ws"], apply_relu=True)
    assert d2.shape == e1.shape, (d2.shape, e1.shape)
    d1 = convtranspose3x3_s2(d2, kp["d1_wm"], kp["d1_b"],
                             x_skip=e1, w_skip=kp["d1_ws"], apply_relu=False)
    return jnp.transpose(d1, (0, 3, 1, 2))                        # NHWC -> NCHW


# ------------------------------------------------------------------------------------ params
def init_params(key):
    ks = jax.random.split(key, 12)

    def conv_w(k, cin, cout):      # PyTorch Conv2d layout: (Cout, Cin, 3, 3)
        s = 1.0 / (9 * cin) ** 0.5
        return jax.random.uniform(k, (cout, cin, 3, 3), jnp.float32, -s, s)

    def deconv_w(k, cin, cout):    # PyTorch ConvTranspose2d layout: (Cin, Cout, 3, 3)
        s = 1.0 / (9 * cin) ** 0.5
        return jax.random.uniform(k, (cin, cout, 3, 3), jnp.float32, -s, s)

    def bias(k, c):
        return jax.random.normal(k, (c,), jnp.float32) * 0.05

    return {
        "enc1_w": conv_w(ks[0], 1, 16),    "enc1_b": bias(ks[1], 16),
        "enc2_w": conv_w(ks[2], 16, 32),   "enc2_b": bias(ks[3], 32),
        "enc3_w": conv_w(ks[4], 32, 64),   "enc3_b": bias(ks[5], 64),
        "dec3_w": deconv_w(ks[6], 64, 32), "dec3_b": bias(ks[7], 32),
        "dec2_w": deconv_w(ks[8], 64, 16), "dec2_b": bias(ks[9], 16),
        "dec1_w": deconv_w(ks[10], 32, 1), "dec1_b": bias(ks[11], 1),
    }


def _prep_conv(w, b):
    """(Cout, Cin, 3, 3) Conv2d weight -> (4*Cin, 4*Cout) phase/shift block matrix."""
    cout, cin = w.shape[0], w.shape[1]
    row_blocks = []
    for (r, c) in _SHIFTS:                       # input phase block (row)
        cols = []
        for (a, sb) in _SHIFTS:                  # output shift block (col)
            dy, dx = 2 * a + r, 2 * sb + c
            if dy <= 2 and dx <= 2:
                cols.append(jnp.transpose(w[:, :, dy, dx]))     # (Cin, Cout)
            else:
                cols.append(jnp.zeros((cin, cout), w.dtype))
        row_blocks.append(jnp.concatenate(cols, axis=1))        # (Cin, 4*Cout)
    return jnp.concatenate(row_blocks, axis=0), b.reshape(1, cout)


def _prep_deconv_block(w, ci_lo, ci_hi):
    """(Cin, Cout, 3, 3) ConvTranspose2d weight, rows [ci_lo, ci_hi) -> (4*nci, 4*Cout)."""
    cout = w.shape[1]
    nci = ci_hi - ci_lo
    row_blocks = []
    for (r, c) in _SHIFTS:                       # input tap block (row)
        cols = []
        for (rb, cb) in _SHIFTS:                 # output sub-pixel phase block (col)
            ky, kx = rb + 1 - 2 * r, cb + 1 - 2 * c
            if 0 <= ky <= 2 and 0 <= kx <= 2:
                cols.append(w[ci_lo:ci_hi, :, ky, kx])          # (nci, Cout)
            else:
                cols.append(jnp.zeros((nci, cout), w.dtype))
        row_blocks.append(jnp.concatenate(cols, axis=1))        # (nci, 4*Cout)
    return jnp.concatenate(row_blocks, axis=0)


def _prep_deconv_bias(b):
    return jnp.tile(b, 4).reshape(1, 4 * b.shape[0])


def prepare_params(p):
    """Pack PyTorch-layout params into kernel-ready layouts (done once, outside jit)."""
    kp = {}
    for i in (1, 2, 3):
        kp[f"e{i}_w"], kp[f"e{i}_b"] = _prep_conv(p[f"enc{i}_w"], p[f"enc{i}_b"])
    # dec3: input is e3 only (64 ch).
    kp["d3_wm"] = _prep_deconv_block(p["dec3_w"], 0, 64)
    kp["d3_b"] = _prep_deconv_bias(p["dec3_b"])
    # dec2: input channels = [d3 (32) | e2 (32)]  (torch.cat order: dec out first).
    kp["d2_wm"] = _prep_deconv_block(p["dec2_w"], 0, 32)
    kp["d2_ws"] = _prep_deconv_block(p["dec2_w"], 32, 64)
    kp["d2_b"] = _prep_deconv_bias(p["dec2_b"])
    # dec1: input channels = [d2 (16) | e1 (16)].
    kp["d1_wm"] = _prep_deconv_block(p["dec1_w"], 0, 16)
    kp["d1_ws"] = _prep_deconv_block(p["dec1_w"], 16, 32)
    kp["d1_b"] = _prep_deconv_bias(p["dec1_b"])
    return kp


# --------------------------------------------------------------------------------- reference
def reference_forward(x, p):
    """Pure-XLA reference with PyTorch semantics (NCHW)."""
    def conv_s2(x, w, b):
        y = lax.conv_general_dilated(
            x, w, window_strides=(2, 2), padding=((1, 1), (1, 1)),
            dimension_numbers=("NCHW", "OIHW", "NCHW"),
            precision=lax.Precision.HIGHEST)
        return jax.nn.relu(y + b[None, :, None, None])

    def deconv_s2(x, w, b, relu):
        # ConvTranspose2d(k=3, s=2, p=1, output_padding=1) == lhs-dilated conv with
        # the spatially-flipped, channel-transposed kernel and padding (1, 2).
        w_hwio = jnp.transpose(w[:, :, ::-1, ::-1], (2, 3, 0, 1))
        y = lax.conv_general_dilated(
            x, w_hwio, window_strides=(1, 1), padding=((1, 2), (1, 2)),
            lhs_dilation=(2, 2), dimension_numbers=("NCHW", "HWIO", "NCHW"),
            precision=lax.Precision.HIGHEST)
        y = y + b[None, :, None, None]
        return jax.nn.relu(y) if relu else y

    e1 = conv_s2(x, p["enc1_w"], p["enc1_b"])
    e2 = conv_s2(e1, p["enc2_w"], p["enc2_b"])
    e3 = conv_s2(e2, p["enc3_w"], p["enc3_b"])
    d3 = deconv_s2(e3, p["dec3_w"], p["dec3_b"], relu=True)
    d3 = jnp.concatenate([d3[:, :, :e2.shape[2], :e2.shape[3]], e2], axis=1)
    d2 = deconv_s2(d3, p["dec2_w"], p["dec2_b"], relu=True)
    d2 = jnp.concatenate([d2[:, :, :e1.shape[2], :e1.shape[3]], e1], axis=1)
    d1 = deconv_s2(d2, p["dec1_w"], p["dec1_b"], relu=False)
    return d1[:, :, :x.shape[2], :x.shape[3]]


# -------------------------------------------------------------------------------------- main
if __name__ == "__main__":
    key = jax.random.PRNGKey(0)
    k_x, k_p = jax.random.split(key)
    # Small NCHW input; H, W divisible by 8 so all skip sizes match exactly.
    x = jax.random.normal(k_x, (2, 1, 16, 16), jnp.float32)
    params = init_params(k_p)
    kparams = prepare_params(params)        # kernel-ready weight layouts, outside jit

    fwd = jax.jit(unet_forward)
    out = jax.block_until_ready(fwd(x, kparams))
    assert out.shape == (2, 1, 16, 16), out.shape
    assert bool(jnp.all(jnp.isfinite(out)))

    ref = jax.block_until_ready(reference_forward(x, params))
    assert bool(jnp.allclose(out, ref, rtol=2e-3, atol=2e-3)), float(
        jnp.max(jnp.abs(out - ref)))

    print("KERNEL_OK")
</pallas_src>

<mosaic_0001>
module attributes {stable_mosaic.version = 11 : i64} {
  func.func @_conv_s2_kernel(%arg0: i32, %arg1: memref<1x81x4xf32, #tpu.memory_space<vmem>>, %arg2: memref<4x64xf32, #tpu.memory_space<vmem>>, %arg3: memref<1x16xf32, #tpu.memory_space<vmem>>, %arg4: memref<1x8x8x16xf32, #tpu.memory_space<vmem>>) attributes {dimension_semantics = [#tpu.dimension_semantics<parallel>], iteration_bounds = array<i64: 2>, scalar_prefetch = 0 : i64, scratch_operands = 0 : i64, tpu.core_type = #tpu.core_type<tc>, window_params = [{transform_indices = @transform_0, window_bounds = array<i64: 1, 81, 4>}, {pipeline_mode = #tpu.pipeline_mode<synchronous>, transform_indices = @transform_1, window_bounds = array<i64: 4, 64>}, {pipeline_mode = #tpu.pipeline_mode<synchronous>, transform_indices = @transform_2, window_bounds = array<i64: 1, 16>}, {transform_indices = @transform_3, window_bounds = array<i64: 1, 8, 8, 16>}]} {
    %c0 = arith.constant 0 : index
    %c0_0 = arith.constant 0 : index
    %c0_1 = arith.constant 0 : index
    %0 = vector.load %arg1[%c0, %c0_0, %c0_1] : memref<1x81x4xf32, #tpu.memory_space<vmem>>, vector<1x81x4xf32>
    %1 = vector.shape_cast %0 : vector<1x81x4xf32> to vector<81x4xf32>
    %c0_2 = arith.constant 0 : index
    %c0_3 = arith.constant 0 : index
    %2 = vector.load %arg2[%c0_2, %c0_3] : memref<4x64xf32, #tpu.memory_space<vmem>>, vector<4x64xf32>
    %cst = arith.constant dense<0.000000e+00> : vector<81x64xf32>
    %3 = tpu.matmul %1, %2, %cst {dimension_numbers = #tpu.dot_dimension_numbers<[1], [0], [0], [1], [0, 0, 1, 1], [], []>} : vector<81x4xf32>, vector<4x64xf32>, vector<81x64xf32> -> vector<81x64xf32>
    %4 = vector.shape_cast %3 : vector<81x64xf32> to vector<9x9x64xf32>
    %5 = vector.extract_strided_slice %4 {offsets = [0, 0, 0], sizes = [8, 8, 16], strides = [1, 1, 1]} : vector<9x9x64xf32> to vector<8x8x16xf32>
    %6 = vector.extract_strided_slice %4 {offsets = [0, 1, 16], sizes = [8, 8, 16], strides = [1, 1, 1]} : vector<9x9x64xf32> to vector<8x8x16xf32>
    %7 = arith.addf %5, %6 : vector<8x8x16xf32>
    %8 = vector.extract_strided_slice %4 {offsets = [1, 0, 32], sizes = [8, 8, 16], strides = [1, 1, 1]} : vector<9x9x64xf32> to vector<8x8x16xf32>
    %9 = arith.addf %7, %8 : vector<8x8x16xf32>
    %10 = vector.extract_strided_slice %4 {offsets = [1, 1, 48], sizes = [8, 8, 16], strides = [1, 1, 1]} : vector<9x9x64xf32> to vector<8x8x16xf32>
    %11 = arith.addf %9, %10 : vector<8x8x16xf32>
    %c0_4 = arith.constant 0 : index
    %c0_5 = arith.constant 0 : index
    %12 = vector.load %arg3[%c0_4, %c0_5] : memref<1x16xf32, #tpu.memory_space<vmem>>, vector<1x16xf32>
    %13 = vector.shape_cast %12 : vector<1x16xf32> to vector<1x1x16xf32>
    %14 = vector.broadcast %13 : vector<1x1x16xf32> to vector<8x8x16xf32>
    %15 = arith.addf %11, %14 : vector<8x8x16xf32>
    %cst_6 = arith.constant 0.000000e+00 : f32
    %16 = vector.broadcast %cst_6 : f32 to vector<8x8x16xf32>
    %17 = arith.maximumf %15, %16 : vector<8x8x16xf32>
    %c0_7 = arith.constant 0 : index
    %c0_8 = arith.constant 0 : index
    %c0_9 = arith.constant 0 : index
    %c0_10 = arith.constant 0 : index
    %18 = vector.load %arg4[%c0_7, %c0_8, %c0_9, %c0_10] : memref<1x8x8x16xf32, #tpu.memory_space<vmem>>, vector<1x8x8x16xf32>
    %19 = vector.shape_cast %18 : vector<1x8x8x16xf32> to vector<8x8x16xf32>
    %20 = vector.shape_cast %17 : vector<8x8x16xf32> to vector<1x8x8x16xf32>
    tpu.vector_store %arg4[%c0_7, %c0_8, %c0_9, %c0_10], %20 {strides = array<i32>} : memref<1x8x8x16xf32, #tpu.memory_space<vmem>>, vector<1x8x8x16xf32>,
    return
  }
  func.func @transform_0(%arg0: i32) -> (i32, i32, i32) {
    %c0_i32 = arith.constant 0 : i32
    %c0_i32_0 = arith.constant 0 : i32
    %c0_i32_1 = arith.constant 0 : i32
    return %arg0, %c0_i32, %c0_i32_0 : i32, i32, i32
  }
  func.func @transform_1(%arg0: i32) -> (i32, i32) {
    %c0_i32 = arith.constant 0 : i32
    %c0_i32_0 = arith.constant 0 : i32
    %c0_i32_1 = arith.constant 0 : i32
    return %c0_i32, %c0_i32_0 : i32, i32
  }
  func.func @transform_2(%arg0: i32) -> (i32, i32) {
    %c0_i32 = arith.constant 0 : i32
    %c0_i32_0 = arith.constant 0 : i32
    %c0_i32_1 = arith.constant 0 : i32
    return %c0_i32, %c0_i32_0 : i32, i32
  }
  func.func @transform_3(%arg0: i32) -> (i32, i32, i32, i32) {
    %c0_i32 = arith.constant 0 : i32
    %c0_i32_0 = arith.constant 0 : i32
    %c0_i32_1 = arith.constant 0 : i32
    %c0_i32_2 = arith.constant 0 : i32
    return %arg0, %c0_i32, %c0_i32_0, %c0_i32_1 : i32, i32, i32, i32
  }
}

module attributes {stable_mosaic.version = 11 : i64} {
  func.func @_conv_s2_kernel(%arg0: i32, %arg1: memref<1x25x64xf32, #tpu.memory_space<vmem>>, %arg2: memref<64x128xf32, #tpu.memory_space<vmem>>, %arg3: memref<1x32xf32, #tpu.memory_space<vmem>>, %arg4: memref<1x4x4x32xf32, #tpu.memory_space<vmem>>) attributes {dimension_semantics = [#tpu.dimension_semantics<parallel>], iteration_bounds = array<i64: 2>, scalar_prefetch = 0 : i64, scratch_operands = 0 : i64, tpu.core_type = #tpu.core_type<tc>, window_params = [{transform_indices = @transform_0, window_bounds = array<i64: 1, 25, 64>}, {pipeline_mode = #tpu.pipeline_mode<synchronous>, transform_indices = @transform_1, window_bounds = array<i64: 64, 128>}, {pipeline_mode = #tpu.pipeline_mode<synchronous>, transform_indices = @transform_2, window_bounds = array<i64: 1, 32>}, {transform_indices = @transform_3, window_bounds = array<i64: 1, 4, 4, 32>}]} {
    %c0 = arith.constant 0 : index
    %c0_0 = arith.constant 0 : index
    %c0_1 = arith.constant 0 : index
    %0 = vector.load %arg1[%c0, %c0_0, %c0_1] : memref<1x25x64xf32, #tpu.memory_space<vmem>>, vector<1x25x64xf32>
    %1 = vector.shape_cast %0 : vector<1x25x64xf32> to vector<25x64xf32>
    %c0_2 = arith.constant 0 : index
    %c0_3 = arith.constant 0 : index
    %2 = vector.load %arg2[%c0_2, %c0_3] : memref<64x128xf32, #tpu.memory_space<vmem>>, vector<64x128xf32>
    %cst = arith.constant dense<0.000000e+00> : vector<25x128xf32>
    %3 = tpu.matmul %1, %2, %cst {dimension_numbers = #tpu.dot_dimension_numbers<[1], [0], [0], [1], [0, 0, 1, 1], [], []>} : vector<25x64xf32>, vector<64x128xf32>, vector<25x128xf32> -> vector<25x128xf32>
    %4 = vector.shape_cast %3 : vector<25x128xf32> to vector<5x5x128xf32>
    %5 = vector.extract_strided_slice %4 {offsets = [0, 0, 0], sizes = [4, 4, 32], strides = [1, 1, 1]} : vector<5x5x128xf32> to vector<4x4x32xf32>
    %6 = vector.extract_strided_slice %4 {offsets = [0, 1, 32], sizes = [4, 4, 32], strides = [1, 1, 1]} : vector<5x5x128xf32> to vector<4x4x32xf32>
    %7 = arith.addf %5, %6 : vector<4x4x32xf32>
    %8 = vector.extract_strided_slice %4 {offsets = [1, 0, 64], sizes = [4, 4, 32], strides = [1, 1, 1]} : vector<5x5x128xf32> to vector<4x4x32xf32>
    %9 = arith.addf %7, %8 : vector<4x4x32xf32>
    %10 = vector.extract_strided_slice %4 {offsets = [1, 1, 96], sizes = [4, 4, 32], strides = [1, 1, 1]} : vector<5x5x128xf32> to vector<4x4x32xf32>
    %11 = arith.addf %9, %10 : vector<4x4x32xf32>
    %c0_4 = arith.constant 0 : index
    %c0_5 = arith.constant 0 : index
    %12 = vector.load %arg3[%c0_4, %c0_5] : memref<1x32xf32, #tpu.memory_space<vmem>>, vector<1x32xf32>
    %13 = vector.shape_cast %12 : vector<1x32xf32> to vector<1x1x32xf32>
    %14 = vector.broadcast %13 : vector<1x1x32xf32> to vector<4x4x32xf32>
    %15 = arith.addf %11, %14 : vector<4x4x32xf32>
    %cst_6 = arith.constant 0.000000e+00 : f32
    %16 = vector.broadcast %cst_6 : f32 to vector<4x4x32xf32>
    %17 = arith.maximumf %15, %16 : vector<4x4x32xf32>
    %c0_7 = arith.constant 0 : index
    %c0_8 = arith.constant 0 : index
    %c0_9 = arith.constant 0 : index
    %c0_10 = arith.constant 0 : index
    %18 = vector.load %arg4[%c0_7, %c0_8, %c0_9, %c0_10] : memref<1x4x4x32xf32, #tpu.memory_space<vmem>>, vector<1x4x4x32xf32>
    %19 = vector.shape_cast %18 : vector<1x4x4x32xf32> to vector<4x4x32xf32>
    %20 = vector.shape_cast %17 : vector<4x4x32xf32> to vector<1x4x4x32xf32>
    tpu.vector_store %arg4[%c0_7, %c0_8, %c0_9, %c0_10], %20 {strides = array<i32>} : memref<1x4x4x32xf32, #tpu.memory_space<vmem>>, vector<1x4x4x32xf32>,
    return
  }
  func.func @transform_0(%arg0: i32) -> (i32, i32, i32) {
    %c0_i32 = arith.constant 0 : i32
    %c0_i32_0 = arith.constant 0 : i32
    %c0_i32_1 = arith.constant 0 : i32
    return %arg0, %c0_i32, %c0_i32_0 : i32, i32, i32
  }
  func.func @transform_1(%arg0: i32) -> (i32, i32) {
    %c0_i32 = arith.constant 0 : i32
    %c0_i32_0 = arith.constant 0 : i32
    %c0_i32_1 = arith.constant 0 : i32
    return %c0_i32, %c0_i32_0 : i32, i32
  }
  func.func @transform_2(%arg0: i32) -> (i32, i32) {
    %c0_i32 = arith.constant 0 : i32
    %c0_i32_0 = arith.constant 0 : i32
    %c0_i32_1 = arith.constant 0 : i32
    return %c0_i32, %c0_i32_0 : i32, i32
  }
  func.func @transform_3(%arg0: i32) -> (i32, i32, i32, i32) {
    %c0_i32 = arith.constant 0 : i32
    %c0_i32_0 = arith.constant 0 : i32
    %c0_i32_1 = arith.constant 0 : i32
    %c0_i32_2 = arith.constant 0 : i32
    return %arg0, %c0_i32, %c0_i32_0, %c0_i32_1 : i32, i32, i32, i32
  }
}

module attributes {stable_mosaic.version = 11 : i64} {
  func.func @_conv_s2_kernel(%arg0: i32, %arg1: memref<1x9x128xf32, #tpu.memory_space<vmem>>, %arg2: memref<128x256xf32, #tpu.memory_space<vmem>>, %arg3: memref<1x64xf32, #tpu.memory_space<vmem>>, %arg4: memref<1x2x2x64xf32, #tpu.memory_space<vmem>>) attributes {dimension_semantics = [#tpu.dimension_semantics<parallel>], iteration_bounds = array<i64: 2>, scalar_prefetch = 0 : i64, scratch_operands = 0 : i64, tpu.core_type = #tpu.core_type<tc>, window_params = [{transform_indices = @transform_0, window_bounds = array<i64: 1, 9, 128>}, {pipeline_mode = #tpu.pipeline_mode<synchronous>, transform_indices = @transform_1, window_bounds = array<i64: 128, 256>}, {pipeline_mode = #tpu.pipeline_mode<synchronous>, transform_indices = @transform_2, window_bounds = array<i64: 1, 64>}, {transform_indices = @transform_3, window_bounds = array<i64: 1, 2, 2, 64>}]} {
    %c0 = arith.constant 0 : index
    %c0_0 = arith.constant 0 : index
    %c0_1 = arith.constant 0 : index
    %0 = vector.load %arg1[%c0, %c0_0, %c0_1] : memref<1x9x128xf32, #tpu.memory_space<vmem>>, vector<1x9x128xf32>
    %1 = vector.shape_cast %0 : vector<1x9x128xf32> to vector<9x128xf32>
    %c0_2 = arith.constant 0 : index
    %c0_3 = arith.constant 0 : index
    %2 = vector.load %arg2[%c0_2, %c0_3] : memref<128x256xf32, #tpu.memory_space<vmem>>, vector<128x256xf32>
    %cst = arith.constant dense<0.000000e+00> : vector<9x256xf32>
    %3 = tpu.matmul %1, %2, %cst {dimension_numbers = #tpu.dot_dimension_numbers<[1], [0], [0], [1], [0, 0, 1, 1], [], []>} : vector<9x128xf32>, vector<128x256xf32>, vector<9x256xf32> -> vector<9x256xf32>
    %4 = vector.shape_cast %3 : vector<9x256xf32> to vector<3x3x256xf32>
    %5 = vector.extract_strided_slice %4 {offsets = [0, 0, 0], sizes = [2, 2, 64], strides = [1, 1, 1]} : vector<3x3x256xf32> to vector<2x2x64xf32>
    %6 = vector.extract_strided_slice %4 {offsets = [0, 1, 64], sizes = [2, 2, 64], strides = [1, 1, 1]} : vector<3x3x256xf32> to vector<2x2x64xf32>
    %7 = arith.addf %5, %6 : vector<2x2x64xf32>
    %8 = vector.extract_strided_slice %4 {offsets = [1, 0, 128], sizes = [2, 2, 64], strides = [1, 1, 1]} : vector<3x3x256xf32> to vector<2x2x64xf32>
    %9 = arith.addf %7, %8 : vector<2x2x64xf32>
    %10 = vector.extract_strided_slice %4 {offsets = [1, 1, 192], sizes = [2, 2, 64], strides = [1, 1, 1]} : vector<3x3x256xf32> to vector<2x2x64xf32>
    %11 = arith.addf %9, %10 : vector<2x2x64xf32>
    %c0_4 = arith.constant 0 : index
    %c0_5 = arith.constant 0 : index
    %12 = vector.load %arg3[%c0_4, %c0_5] : memref<1x64xf32, #tpu.memory_space<vmem>>, vector<1x64xf32>
    %13 = vector.shape_cast %12 : vector<1x64xf32> to vector<1x1x64xf32>
    %14 = vector.broadcast %13 : vector<1x1x64xf32> to vector<2x2x64xf32>
    %15 = arith.addf %11, %14 : vector<2x2x64xf32>
    %cst_6 = arith.constant 0.000000e+00 : f32
    %16 = vector.broadcast %cst_6 : f32 to vector<2x2x64xf32>
    %17 = arith.maximumf %15, %16 : vector<2x2x64xf32>
    %c0_7 = arith.constant 0 : index
    %c0_8 = arith.constant 0 : index
    %c0_9 = arith.constant 0 : index
    %c0_10 = arith.constant 0 : index
    %18 = vector.load %arg4[%c0_7, %c0_8, %c0_9, %c0_10] : memref<1x2x2x64xf32, #tpu.memory_space<vmem>>, vector<1x2x2x64xf32>
    %19 = vector.shape_cast %18 : vector<1x2x2x64xf32> to vector<2x2x64xf32>
    %20 = vector.shape_cast %17 : vector<2x2x64xf32> to vector<1x2x2x64xf32>
    tpu.vector_store %arg4[%c0_7, %c0_8, %c0_9, %c0_10], %20 {strides = array<i32>} : memref<1x2x2x64xf32, #tpu.memory_space<vmem>>, vector<1x2x2x64xf32>,
    return
  }
  func.func @transform_0(%arg0: i32) -> (i32, i32, i32) {
    %c0_i32 = arith.constant 0 : i32
    %c0_i32_0 = arith.constant 0 : i32
    %c0_i32_1 = arith.constant 0 : i32
    return %arg0, %c0_i32, %c0_i32_0 : i32, i32, i32
  }
  func.func @transform_1(%arg0: i32) -> (i32, i32) {
    %c0_i32 = arith.constant 0 : i32
    %c0_i32_0 = arith.constant 0 : i32
    %c0_i32_1 = arith.constant 0 : i32
    return %c0_i32, %c0_i32_0 : i32, i32
  }
  func.func @transform_2(%arg0: i32) -> (i32, i32) {
    %c0_i32 = arith.constant 0 : i32
    %c0_i32_0 = arith.constant 0 : i32
    %c0_i32_1 = arith.constant 0 : i32
    return %c0_i32, %c0_i32_0 : i32, i32
  }
  func.func @transform_3(%arg0: i32) -> (i32, i32, i32, i32) {
    %c0_i32 = arith.constant 0 : i32
    %c0_i32_0 = arith.constant 0 : i32
    %c0_i32_1 = arith.constant 0 : i32
    %c0_i32_2 = arith.constant 0 : i32
    return %arg0, %c0_i32, %c0_i32_0, %c0_i32_1 : i32, i32, i32, i32
  }
}

module attributes {stable_mosaic.version = 11 : i64} {
  func.func @_deconv_s2_kernel(%arg0: i32, %arg1: memref<1x2x2x64xf32, #tpu.memory_space<vmem>>, %arg2: memref<256x128xf32, #tpu.memory_space<vmem>>, %arg3: memref<1x128xf32, #tpu.memory_space<vmem>>, %arg4: memref<1x4x128xf32, #tpu.memory_space<vmem>>) attributes {dimension_semantics = [#tpu.dimension_semantics<parallel>], iteration_bounds = array<i64: 2>, scalar_prefetch = 0 : i64, scratch_operands = 0 : i64, tpu.core_type = #tpu.core_type<tc>, window_params = [{transform_indices = @transform_0, window_bounds = array<i64: 1, 2, 2, 64>}, {pipeline_mode = #tpu.pipeline_mode<synchronous>, transform_indices = @transform_1, window_bounds = array<i64: 256, 128>}, {pipeline_mode = #tpu.pipeline_mode<synchronous>, transform_indices = @transform_2, window_bounds = array<i64: 1, 128>}, {transform_indices = @transform_3, window_bounds = array<i64: 1, 4, 128>}]} {
    %c0 = arith.constant 0 : index
    %c0_0 = arith.constant 0 : index
    %c0_1 = arith.constant 0 : index
    %c0_2 = arith.constant 0 : index
    %0 = vector.load %arg1[%c0, %c0_0, %c0_1, %c0_2] : memref<1x2x2x64xf32, #tpu.memory_space<vmem>>, vector<1x2x2x64xf32>
    %1 = vector.shape_cast %0 : vector<1x2x2x64xf32> to vector<2x2x64xf32>
    %cst = arith.constant 0.000000e+00 : f32
    %2 = vector.broadcast %cst : f32 to vector<2x1x64xf32>
    %3 = tpu.concatenate %1, %2 in 1 : vector<2x2x64xf32>, vector<2x1x64xf32> -> vector<2x3x64xf32>
    %cst_3 = arith.constant 0.000000e+00 : f32
    %4 = vector.broadcast %cst_3 : f32 to vector<1x3x64xf32>
    %5 = tpu.concatenate %3, %4 in 0 : vector<2x3x64xf32>, vector<1x3x64xf32> -> vector<3x3x64xf32>
    %6 = vector.extract_strided_slice %5 {offsets = [0, 0, 0], sizes = [2, 2, 64], strides = [1, 1, 1]} : vector<3x3x64xf32> to vector<2x2x64xf32>
    %7 = vector.shape_cast %6 : vector<2x2x64xf32> to vector<4x64xf32>
    %8 = vector.extract_strided_slice %5 {offsets = [0, 1, 0], sizes = [2, 2, 64], strides = [1, 1, 1]} : vector<3x3x64xf32> to vector<2x2x64xf32>
    %9 = vector.shape_cast %8 : vector<2x2x64xf32> to vector<4x64xf32>
    %10 = vector.extract_strided_slice %5 {offsets = [1, 0, 0], sizes = [2, 2, 64], strides = [1, 1, 1]} : vector<3x3x64xf32> to vector<2x2x64xf32>
    %11 = vector.shape_cast %10 : vector<2x2x64xf32> to vector<4x64xf32>
    %12 = vector.extract_strided_slice %5 {offsets = [1, 1, 0], sizes = [2, 2, 64], strides = [1, 1, 1]} : vector<3x3x64xf32> to vector<2x2x64xf32>
    %13 = vector.shape_cast %12 : vector<2x2x64xf32> to vector<4x64xf32>
    %14 = tpu.concatenate %7, %9, %11, %13 in 1 : vector<4x64xf32>, vector<4x64xf32>, vector<4x64xf32>, vector<4x64xf32> -> vector<4x256xf32>
    %c0_4 = arith.constant 0 : index
    %c0_5 = arith.constant 0 : index
    %15 = vector.load %arg2[%c0_4, %c0_5] : memref<256x128xf32, #tpu.memory_space<vmem>>, vector<256x128xf32>
    %cst_6 = arith.constant dense<0.000000e+00> : vector<4x128xf32>
    %16 = tpu.matmul %14, %15, %cst_6 {dimension_numbers = #tpu.dot_dimension_numbers<[1], [0], [0], [1], [0, 0, 1, 1], [], []>} : vector<4x256xf32>, vector<256x128xf32>, vector<4x128xf32> -> vector<4x128xf32>
    %c0_7 = arith.constant 0 : index
    %c0_8 = arith.constant 0 : index
    %17 = vector.load %arg3[%c0_7, %c0_8] : memref<1x128xf32, #tpu.memory_space<vmem>>, vector<1x128xf32>
    %18 = vector.broadcast %17 : vector<1x128xf32> to vector<4x128xf32>
    %19 = arith.addf %16, %18 : vector<4x128xf32>
    %cst_9 = arith.constant 0.000000e+00 : f32
    %20 = vector.broadcast %cst_9 : f32 to vector<4x128xf32>
    %21 = arith.maximumf %19, %20 : vector<4x128xf32>
    %c0_10 = arith.constant 0 : index
    %c0_11 = arith.constant 0 : index
    %c0_12 = arith.constant 0 : index
    %22 = vector.load %arg4[%c0_10, %c0_11, %c0_12] : memref<1x4x128xf32, #tpu.memory_space<vmem>>, vector<1x4x128xf32>
    %23 = vector.shape_cast %22 : vector<1x4x128xf32> to vector<4x128xf32>
    %24 = vector.shape_cast %21 : vector<4x128xf32> to vector<1x4x128xf32>
    tpu.vector_store %arg4[%c0_10, %c0_11, %c0_12], %24 {strides = array<i32>} : memref<1x4x128xf32, #tpu.memory_space<vmem>>, vector<1x4x128xf32>,
    return
  }
  func.func @transform_0(%arg0: i32) -> (i32, i32, i32, i32) {
    %c0_i32 = arith.constant 0 : i32
    %c0_i32_0 = arith.constant 0 : i32
    %c0_i32_1 = arith.constant 0 : i32
    %c0_i32_2 = arith.constant 0 : i32
    return %arg0, %c0_i32, %c0_i32_0, %c0_i32_1 : i32, i32, i32, i32
  }
  func.func @transform_1(%arg0: i32) -> (i32, i32) {
    %c0_i32 = arith.constant 0 : i32
    %c0_i32_0 = arith.constant 0 : i32
    %c0_i32_1 = arith.constant 0 : i32
    return %c0_i32, %c0_i32_0 : i32, i32
  }
  func.func @transform_2(%arg0: i32) -> (i32, i32) {
    %c0_i32 = arith.constant 0 : i32
    %c0_i32_0 = arith.constant 0 : i32
    %c0_i32_1 = arith.constant 0 : i32
    return %c0_i32, %c0_i32_0 : i32, i32
  }
  func.func @transform_3(%arg0: i32) -> (i32, i32, i32) {
    %c0_i32 = arith.constant 0 : i32
    %c0_i32_0 = arith.constant 0 : i32
    %c0_i32_1 = arith.constant 0 : i32
    return %arg0, %c0_i32, %c0_i32_0 : i32, i32, i32
  }
}

module attributes {stable_mosaic.version = 11 : i64} {
  func.func @_deconv_s2_kernel(%arg0: i32, %arg1: memref<1x4x4x32xf32, #tpu.memory_space<vmem>>, %arg2: memref<1x4x4x32xf32, #tpu.memory_space<vmem>>, %arg3: memref<128x64xf32, #tpu.memory_space<vmem>>, %arg4: memref<128x64xf32, #tpu.memory_space<vmem>>, %arg5: memref<1x64xf32, #tpu.memory_space<vmem>>, %arg6: memref<1x16x64xf32, #tpu.memory_space<vmem>>) attributes {dimension_semantics = [#tpu.dimension_semantics<parallel>], iteration_bounds = array<i64: 2>, scalar_prefetch = 0 : i64, scratch_operands = 0 : i64, tpu.core_type = #tpu.core_type<tc>, window_params = [{transform_indices = @transform_0, window_bounds = array<i64: 1, 4, 4, 32>}, {transform_indices = @transform_1, window_bounds = array<i64: 1, 4, 4, 32>}, {pipeline_mode = #tpu.pipeline_mode<synchronous>, transform_indices = @transform_2, window_bounds = array<i64: 128, 64>}, {pipeline_mode = #tpu.pipeline_mode<synchronous>, transform_indices = @transform_3, window_bounds = array<i64: 128, 64>}, {pipeline_mode = #tpu.pipeline_mode<synchronous>, transform_indices = @transform_4, window_bounds = array<i64: 1, 64>}, {transform_indices = @transform_5, window_bounds = array<i64: 1, 16, 64>}]} {
    %c0 = arith.constant 0 : index
    %c0_0 = arith.constant 0 : index
    %c0_1 = arith.constant 0 : index
    %c0_2 = arith.constant 0 : index
    %0 = vector.load %arg1[%c0, %c0_0, %c0_1, %c0_2] : memref<1x4x4x32xf32, #tpu.memory_space<vmem>>, vector<1x4x4x32xf32>
    %1 = vector.shape_cast %0 : vector<1x4x4x32xf32> to vector<4x4x32xf32>
    %cst = arith.constant 0.000000e+00 : f32
    %2 = vector.broadcast %cst : f32 to vector<4x1x32xf32>
    %3 = tpu.concatenate %1, %2 in 1 : vector<4x4x32xf32>, vector<4x1x32xf32> -> vector<4x5x32xf32>
    %cst_3 = arith.constant 0.000000e+00 : f32
    %4 = vector.broadcast %cst_3 : f32 to vector<1x5x32xf32>
    %5 = tpu.concatenate %3, %4 in 0 : vector<4x5x32xf32>, vector<1x5x32xf32> -> vector<5x5x32xf32>
    %6 = vector.extract_strided_slice %5 {offsets = [0, 0, 0], sizes = [4, 4, 32], strides = [1, 1, 1]} : vector<5x5x32xf32> to vector<4x4x32xf32>
    %7 = vector.shape_cast %6 : vector<4x4x32xf32> to vector<16x32xf32>
    %8 = vector.extract_strided_slice %5 {offsets = [0, 1, 0], sizes = [4, 4, 32], strides = [1, 1, 1]} : vector<5x5x32xf32> to vector<4x4x32xf32>
    %9 = vector.shape_cast %8 : vector<4x4x32xf32> to vector<16x32xf32>
    %10 = vector.extract_strided_slice %5 {offsets = [1, 0, 0], sizes = [4, 4, 32], strides = [1, 1, 1]} : vector<5x5x32xf32> to vector<4x4x32xf32>
    %11 = vector.shape_cast %10 : vector<4x4x32xf32> to vector<16x32xf32>
    %12 = vector.extract_strided_slice %5 {offsets = [1, 1, 0], sizes = [4, 4, 32], strides = [1, 1, 1]} : vector<5x5x32xf32> to vector<4x4x32xf32>
    %13 = vector.shape_cast %12 : vector<4x4x32xf32> to vector<16x32xf32>
    %14 = tpu.concatenate %7, %9, %11, %13 in 1 : vector<16x32xf32>, vector<16x32xf32>, vector<16x32xf32>, vector<16x32xf32> -> vector<16x128xf32>
    %c0_4 = arith.constant 0 : index
    %c0_5 = arith.constant 0 : index
    %15 = vector.load %arg3[%c0_4, %c0_5] : memref<128x64xf32, #tpu.memory_space<vmem>>, vector<128x64xf32>
    %cst_6 = arith.constant dense<0.000000e+00> : vector<16x64xf32>
    %16 = tpu.matmul %14, %15, %cst_6 {dimension_numbers = #tpu.dot_dimension_numbers<[1], [0], [0], [1], [0, 0, 1, 1], [], []>} : vector<16x128xf32>, vector<128x64xf32>, vector<16x64xf32> -> vector<16x64xf32>
    %c0_7 = arith.constant 0 : index
    %c0_8 = arith.constant 0 : index
    %c0_9 = arith.constant 0 : index
    %c0_10 = arith.constant 0 : index
    %17 = vector.load %arg2[%c0_7, %c0_8, %c0_9, %c0_10] : memref<1x4x4x32xf32, #tpu.memory_space<vmem>>, vector<1x4x4x32xf32>
    %18 = vector.shape_cast %17 : vector<1x4x4x32xf32> to vector<4x4x32xf32>
    %cst_11 = arith.constant 0.000000e+00 : f32
    %19 = vector.broadcast %cst_11 : f32 to vector<4x1x32xf32>
    %20 = tpu.concatenate %18, %19 in 1 : vector<4x4x32xf32>, vector<4x1x32xf32> -> vector<4x5x32xf32>
    %cst_12 = arith.constant 0.000000e+00 : f32
    %21 = vector.broadcast %cst_12 : f32 to vector<1x5x32xf32>
    %22 = tpu.concatenate %20, %21 in 0 : vector<4x5x32xf32>, vector<1x5x32xf32> -> vector<5x5x32xf32>
    %23 = vector.extract_strided_slice %22 {offsets = [0, 0, 0], sizes = [4, 4, 32], strides = [1, 1, 1]} : vector<5x5x32xf32> to vector<4x4x32xf32>
    %24 = vector.shape_cast %23 : vector<4x4x32xf32> to vector<16x32xf32>
    %25 = vector.extract_strided_slice %22 {offsets = [0, 1, 0], sizes = [4, 4, 32], strides = [1, 1, 1]} : vector<5x5x32xf32> to vector<4x4x32xf32>
    %26 = vector.shape_cast %25 : vector<4x4x32xf32> to vector<16x32xf32>
    %27 = vector.extract_strided_slice %22 {offsets = [1, 0, 0], sizes = [4, 4, 32], strides = [1, 1, 1]} : vector<5x5x32xf32> to vector<4x4x32xf32>
    %28 = vector.shape_cast %27 : vector<4x4x32xf32> to vector<16x32xf32>
    %29 = vector.extract_strided_slice %22 {offsets = [1, 1, 0], sizes = [4, 4, 32], strides = [1, 1, 1]} : vector<5x5x32xf32> to vector<4x4x32xf32>
    %30 = vector.shape_cast %29 : vector<4x4x32xf32> to vector<16x32xf32>
    %31 = tpu.concatenate %24, %26, %28, %30 in 1 : vector<16x32xf32>, vector<16x32xf32>, vector<16x32xf32>, vector<16x32xf32> -> vector<16x128xf32>
    %c0_13 = arith.constant 0 : index
    %c0_14 = arith.constant 0 : index
    %32 = vector.load %arg4[%c0_13, %c0_14] : memref<128x64xf32, #tpu.memory_space<vmem>>, vector<128x64xf32>
    %cst_15 = arith.constant dense<0.000000e+00> : vector<16x64xf32>
    %33 = tpu.matmul %31, %32, %cst_15 {dimension_numbers = #tpu.dot_dimension_numbers<[1], [0], [0], [1], [0, 0, 1, 1], [], []>} : vector<16x128xf32>, vector<128x64xf32>, vector<16x64xf32> -> vector<16x64xf32>
    %34 = arith.addf %16, %33 : vector<16x64xf32>
    %c0_16 = arith.constant 0 : index
    %c0_17 = arith.constant 0 : index
    %35 = vector.load %arg5[%c0_16, %c0_17] : memref<1x64xf32, #tpu.memory_space<vmem>>, vector<1x64xf32>
    %36 = vector.broadcast %35 : vector<1x64xf32> to vector<16x64xf32>
    %37 = arith.addf %34, %36 : vector<16x64xf32>
    %cst_18 = arith.constant 0.000000e+00 : f32
    %38 = vector.broadcast %cst_18 : f32 to vector<16x64xf32>
    %39 = arith.maximumf %37, %38 : vector<16x64xf32>
    %c0_19 = arith.constant 0 : index
    %c0_20 = arith.constant 0 : index
    %c0_21 = arith.constant 0 : index
    %40 = vector.load %arg6[%c0_19, %c0_20, %c0_21] : memref<1x16x64xf32, #tpu.memory_space<vmem>>, vector<1x16x64xf32>
    %41 = vector.shape_cast %40 : vector<1x16x64xf32> to vector<16x64xf32>
    %42 = vector.shape_cast %39 : vector<16x64xf32> to vector<1x16x64xf32>
    tpu.vector_store %arg6[%c0_19, %c0_20, %c0_21], %42 {strides = array<i32>} : memref<1x16x64xf32, #tpu.memory_space<vmem>>, vector<1x16x64xf32>,
    return
  }
  func.func @transform_0(%arg0: i32) -> (i32, i32, i32, i32) {
    %c0_i32 = arith.constant 0 : i32
    %c0_i32_0 = arith.constant 0 : i32
    %c0_i32_1 = arith.constant 0 : i32
    %c0_i32_2 = arith.constant 0 : i32
    return %arg0, %c0_i32, %c0_i32_0, %c0_i32_1 : i32, i32, i32, i32
  }
  func.func @transform_1(%arg0: i32) -> (i32, i32, i32, i32) {
    %c0_i32 = arith.constant 0 : i32
    %c0_i32_0 = arith.constant 0 : i32
    %c0_i32_1 = arith.constant 0 : i32
    %c0_i32_2 = arith.constant 0 : i32
    return %arg0, %c0_i32, %c0_i32_0, %c0_i32_1 : i32, i32, i32, i32
  }
  func.func @transform_2(%arg0: i32) -> (i32, i32) {
    %c0_i32 = arith.constant 0 : i32
    %c0_i32_0 = arith.constant 0 : i32
    %c0_i32_1 = arith.constant 0 : i32
    return %c0_i32, %c0_i32_0 : i32, i32
  }
  func.func @transform_3(%arg0: i32) -> (i32, i32) {
    %c0_i32 = arith.constant 0 : i32
    %c0_i32_0 = arith.constant 0 : i32
    %c0_i32_1 = arith.constant 0 : i32
    return %c0_i32, %c0_i32_0 : i32, i32
  }
  func.func @transform_4(%arg0: i32) -> (i32, i32) {
    %c0_i32 = arith.constant 0 : i32
    %c0_i32_0 = arith.constant 0 : i32
    %c0_i32_1 = arith.constant 0 : i32
    return %c0_i32, %c0_i32_0 : i32, i32
  }
  func.func @transform_5(%arg0: i32) -> (i32, i32, i32) {
    %c0_i32 = arith.constant 0 : i32
    %c0_i32_0 = arith.constant 0 : i32
    %c0_i32_1 = arith.constant 0 : i32
    return %arg0, %c0_i32, %c0_i32_0 : i32, i32, i32
  }
}

module attributes {stable_mosaic.version = 11 : i64} {
  func.func @_deconv_s2_kernel(%arg0: i32, %arg1: memref<1x8x8x16xf32, #tpu.memory_space<vmem>>, %arg2: memref<1x8x8x16xf32, #tpu.memory_space<vmem>>, %arg3: memref<64x4xf32, #tpu.memory_space<vmem>>, %arg4: memref<64x4xf32, #tpu.memory_space<vmem>>, %arg5: memref<1x4xf32, #tpu.memory_space<vmem>>, %arg6: memref<1x64x4xf32, #tpu.memory_space<vmem>>) attributes {dimension_semantics = [#tpu.dimension_semantics<parallel>], iteration_bounds = array<i64: 2>, scalar_prefetch = 0 : i64, scratch_operands = 0 : i64, tpu.core_type = #tpu.core_type<tc>, window_params = [{transform_indices = @transform_0, window_bounds = array<i64: 1, 8, 8, 16>}, {transform_indices = @transform_1, window_bounds = array<i64: 1, 8, 8, 16>}, {pipeline_mode = #tpu.pipeline_mode<synchronous>, transform_indices = @transform_2, window_bounds = array<i64: 64, 4>}, {pipeline_mode = #tpu.pipeline_mode<synchronous>, transform_indices = @transform_3, window_bounds = array<i64: 64, 4>}, {pipeline_mode = #tpu.pipeline_mode<synchronous>, transform_indices = @transform_4, window_bounds = array<i64: 1, 4>}, {transform_indices = @transform_5, window_bounds = array<i64: 1, 64, 4>}]} {
    %c0 = arith.constant 0 : index
    %c0_0 = arith.constant 0 : index
    %c0_1 = arith.constant 0 : index
    %c0_2 = arith.constant 0 : index
    %0 = vector.load %arg1[%c0, %c0_0, %c0_1, %c0_2] : memref<1x8x8x16xf32, #tpu.memory_space<vmem>>, vector<1x8x8x16xf32>
    %1 = vector.shape_cast %0 : vector<1x8x8x16xf32> to vector<8x8x16xf32>
    %cst = arith.constant 0.000000e+00 : f32
    %2 = vector.broadcast %cst : f32 to vector<8x1x16xf32>
    %3 = tpu.concatenate %1, %2 in 1 : vector<8x8x16xf32>, vector<8x1x16xf32> -> vector<8x9x16xf32>
    %cst_3 = arith.constant 0.000000e+00 : f32
    %4 = vector.broadcast %cst_3 : f32 to vector<1x9x16xf32>
    %5 = tpu.concatenate %3, %4 in 0 : vector<8x9x16xf32>, vector<1x9x16xf32> -> vector<9x9x16xf32>
    %6 = vector.extract_strided_slice %5 {offsets = [0, 0, 0], sizes = [8, 8, 16], strides = [1, 1, 1]} : vector<9x9x16xf32> to vector<8x8x16xf32>
    %7 = vector.shape_cast %6 : vector<8x8x16xf32> to vector<64x16xf32>
    %8 = vector.extract_strided_slice %5 {offsets = [0, 1, 0], sizes = [8, 8, 16], strides = [1, 1, 1]} : vector<9x9x16xf32> to vector<8x8x16xf32>
    %9 = vector.shape_cast %8 : vector<8x8x16xf32> to vector<64x16xf32>
    %10 = vector.extract_strided_slice %5 {offsets = [1, 0, 0], sizes = [8, 8, 16], strides = [1, 1, 1]} : vector<9x9x16xf32> to vector<8x8x16xf32>
    %11 = vector.shape_cast %10 : vector<8x8x16xf32> to vector<64x16xf32>
    %12 = vector.extract_strided_slice %5 {offsets = [1, 1, 0], sizes = [8, 8, 16], strides = [1, 1, 1]} : vector<9x9x16xf32> to vector<8x8x16xf32>
    %13 = vector.shape_cast %12 : vector<8x8x16xf32> to vector<64x16xf32>
    %14 = tpu.concatenate %7, %9, %11, %13 in 1 : vector<64x16xf32>, vector<64x16xf32>, vector<64x16xf32>, vector<64x16xf32> -> vector<64x64xf32>
    %c0_4 = arith.constant 0 : index
    %c0_5 = arith.constant 0 : index
    %15 = vector.load %arg3[%c0_4, %c0_5] : memref<64x4xf32, #tpu.memory_space<vmem>>, vector<64x4xf32>
    %cst_6 = arith.constant dense<0.000000e+00> : vector<64x4xf32>
    %16 = tpu.matmul %14, %15, %cst_6 {dimension_numbers = #tpu.dot_dimension_numbers<[1], [0], [0], [1], [0, 0, 1, 1], [], []>} : vector<64x64xf32>, vector<64x4xf32>, vector<64x4xf32> -> vector<64x4xf32>
    %c0_7 = arith.constant 0 : index
    %c0_8 = arith.constant 0 : index
    %c0_9 = arith.constant 0 : index
    %c0_10 = arith.constant 0 : index
    %17 = vector.load %arg2[%c0_7, %c0_8, %c0_9, %c0_10] : memref<1x8x8x16xf32, #tpu.memory_space<vmem>>, vector<1x8x8x16xf32>
    %18 = vector.shape_cast %17 : vector<1x8x8x16xf32> to vector<8x8x16xf32>
    %cst_11 = arith.constant 0.000000e+00 : f32
    %19 = vector.broadcast %cst_11 : f32 to vector<8x1x16xf32>
    %20 = tpu.concatenate %18, %19 in 1 : vector<8x8x16xf32>, vector<8x1x16xf32> -> vector<8x9x16xf32>
    %cst_12 = arith.constant 0.000000e+00 : f32
    %21 = vector.broadcast %cst_12 : f32 to vector<1x9x16xf32>
    %22 = tpu.concatenate %20, %21 in 0 : vector<8x9x16xf32>, vector<1x9x16xf32> -> vector<9x9x16xf32>
    %23 = vector.extract_strided_slice %22 {offsets = [0, 0, 0], sizes = [8, 8, 16], strides = [1, 1, 1]} : vector<9x9x16xf32> to vector<8x8x16xf32>
    %24 = vector.shape_cast %23 : vector<8x8x16xf32> to vector<64x16xf32>
    %25 = vector.extract_strided_slice %22 {offsets = [0, 1, 0], sizes = [8, 8, 16], strides = [1, 1, 1]} : vector<9x9x16xf32> to vector<8x8x16xf32>
    %26 = vector.shape_cast %25 : vector<8x8x16xf32> to vector<64x16xf32>
    %27 = vector.extract_strided_slice %22 {offsets = [1, 0, 0], sizes = [8, 8, 16], strides = [1, 1, 1]} : vector<9x9x16xf32> to vector<8x8x16xf32>
    %28 = vector.shape_cast %27 : vector<8x8x16xf32> to vector<64x16xf32>
    %29 = vector.extract_strided_slice %22 {offsets = [1, 1, 0], sizes = [8, 8, 16], strides = [1, 1, 1]} : vector<9x9x16xf32> to vector<8x8x16xf32>
    %30 = vector.shape_cast %29 : vector<8x8x16xf32> to vector<64x16xf32>
    %31 = tpu.concatenate %24, %26, %28, %30 in 1 : vector<64x16xf32>, vector<64x16xf32>, vector<64x16xf32>, vector<64x16xf32> -> vector<64x64xf32>
    %c0_13 = arith.constant 0 : index
    %c0_14 = arith.constant 0 : index
    %32 = vector.load %arg4[%c0_13, %c0_14] : memref<64x4xf32, #tpu.memory_space<vmem>>, vector<64x4xf32>
    %cst_15 = arith.constant dense<0.000000e+00> : vector<64x4xf32>
    %33 = tpu.matmul %31, %32, %cst_15 {dimension_numbers = #tpu.dot_dimension_numbers<[1], [0], [0], [1], [0, 0, 1, 1], [], []>} : vector<64x64xf32>, vector<64x4xf32>, vector<64x4xf32> -> vector<64x4xf32>
    %34 = arith.addf %16, %33 : vector<64x4xf32>
    %c0_16 = arith.constant 0 : index
    %c0_17 = arith.constant 0 : index
    %35 = vector.load %arg5[%c0_16, %c0_17] : memref<1x4xf32, #tpu.memory_space<vmem>>, vector<1x4xf32>
    %36 = vector.broadcast %35 : vector<1x4xf32> to vector<64x4xf32>
    %37 = arith.addf %34, %36 : vector<64x4xf32>
    %c0_18 = arith.constant 0 : index
    %c0_19 = arith.constant 0 : index
    %c0_20 = arith.constant 0 : index
    %38 = vector.load %arg6[%c0_18, %c0_19, %c0_20] : memref<1x64x4xf32, #tpu.memory_space<vmem>>, vector<1x64x4xf32>
    %39 = vector.shape_cast %38 : vector<1x64x4xf32> to vector<64x4xf32>
    %40 = vector.shape_cast %37 : vector<64x4xf32> to vector<1x64x4xf32>
    tpu.vector_store %arg6[%c0_18, %c0_19, %c0_20], %40 {strides = array<i32>} : memref<1x64x4xf32, #tpu.memory_space<vmem>>, vector<1x64x4xf32>,
    return
  }
  func.func @transform_0(%arg0: i32) -> (i32, i32, i32, i32) {
    %c0_i32 = arith.constant 0 : i32
    %c0_i32_0 = arith.constant 0 : i32
    %c0_i32_1 = arith.constant 0 : i32
    %c0_i32_2 = arith.constant 0 : i32
    return %arg0, %c0_i32, %c0_i32_0, %c0_i32_1 : i32, i32, i32, i32
  }
  func.func @transform_1(%arg0: i32) -> (i32, i32, i32, i32) {
    %c0_i32 = arith.constant 0 : i32
    %c0_i32_0 = arith.constant 0 : i32
    %c0_i32_1 = arith.constant 0 : i32
    %c0_i32_2 = arith.constant 0 : i32
    return %arg0, %c0_i32, %c0_i32_0, %c0_i32_1 : i32, i32, i32, i32
  }
  func.func @transform_2(%arg0: i32) -> (i32, i32) {
    %c0_i32 = arith.constant 0 : i32
    %c0_i32_0 = arith.constant 0 : i32
    %c0_i32_1 = arith.constant 0 : i32
    return %c0_i32, %c0_i32_0 : i32, i32
  }
  func.func @transform_3(%arg0: i32) -> (i32, i32) {
    %c0_i32 = arith.constant 0 : i32
    %c0_i32_0 = arith.constant 0 : i32
    %c0_i32_1 = arith.constant 0 : i32
    return %c0_i32, %c0_i32_0 : i32, i32
  }
  func.func @transform_4(%arg0: i32) -> (i32, i32) {
    %c0_i32 = arith.constant 0 : i32
    %c0_i32_0 = arith.constant 0 : i32
    %c0_i32_1 = arith.constant 0 : i32
    return %c0_i32, %c0_i32_0 : i32, i32
  }
  func.func @transform_5(%arg0: i32) -> (i32, i32, i32) {
    %c0_i32 = arith.constant 0 : i32
    %c0_i32_0 = arith.constant 0 : i32
    %c0_i32_1 = arith.constant 0 : i32
    return %arg0, %c0_i32, %c0_i32_0 : i32, i32, i32
  }
}

</mosaic_0001>

<bundles_post_ra>
// kernel: unet_forward.7
= control target key start
LH: loop header
LB: loop body
LE: loop exit
PB: predicated region body
PF: predicated region fallthrough
CT: control target
= control target key end

     0   :  { %s1008_s12 = smov 0   ;;  %s1311_s0 = inlined_call_operand.vmem [shape: f32[2,25,64], index: 0, kind: input, shape index: {}]   ;;  %s1312_s1 = inlined_call_operand.vmem [shape: f32[64,128], index: 1, kind: input, shape index: {}]   ;;  %s1313_s2 = inlined_call_operand.vmem [shape: f32[1,32], index: 2, kind: input, shape index: {}]   ;;  %s1314_s3 = inlined_call_operand.vmem [shape: f32[2,4,4,32], index: 3, kind: output, shape index: {}]  }
   0x1 LB: > { %s896_s13 = sadd.s32 4294967295, %s982_s12   ;;  %p900_p0 = scmp.ge.s32.totalorder %s982_s12, 1  ;;  %s982_s12 = sphi %s1008_s12, %s13_s12  }
   0x2   : > { %p137_p1 = scmp.lt.s32.totalorder %s982_s12, 3 }
   0x4   : > { %p138_p2 = pnand %p900_p0, %p137_p1 }
   0x5   : > { %p161_p3 = scmp.lt.s32.totalorder (!%p138_p2), %s896_s13, 1  ;;  %s985_s7 = smov (!%p138_p2), 64  }
   0x6   : > { %141 = sbr.rel (%p138_p2) target bundleno = 448 (0x1c0), region = 32  ;;  %s986_s8 = smov (!%p138_p2), 96  }
   0x7   : > { %s987_s9 = smov (!%p138_p2), 32  }
   0xb   : > { %v182_v0 = vld [vmem:[%s1312_s1 + $0x38] sm:$0xff]  ;;  %v181_v1 = vld [vmem:[%s1312_s1 + $0x30] sm:$0xff]  ;;  %v180_v2 = vld [vmem:[%s1312_s1 + $0x28] sm:$0xff]  ;;  %s1316_s13 = smov (!%p161_p3, %s896_s13), 1  ;;  %vm183_vm0 = vcmask 523264   ;;  %v289_v14 = vlaneseq  ;;  %vm836_vm1 = vcmask 257024  }
   0xc   : > { %926 = vmatprep.subr.mxu0 %v182_v0  ;;  %948 = vmatprep.subr.mxu1 %v182_v0  ;;  %v179_v3 = vld [vmem:[%s1312_s1 + $0x20] sm:$0xff]  ;;  %s912_s22 = sshll.u32 %s1316_s13, 5  ;;  %v178_v4 = vld [vmem:[%s1312_s1 + $0x18] sm:$0xff]  ;;  %v177_v5 = vld [vmem:[%s1312_s1 + $0x10] sm:$0xff]  ;;  %v984_v12 = vmov 1966171168  }
   0xd   : > { %927 = vmatpush3.msra.mxu0 %v182_v0  ;;  %956 = vmatpush3.msra.mxu1 %v182_v0  ;;  %s165_s27 = scalar_lea.vmem %s1311_s0, %s912_s22  ;;  %v176_v6 = vld [vmem:[%s1312_s1 + $0x8] sm:$0xff]  ;;  %v175_v8 = vld [vmem:[%s1312_s1] sm:$0xff]  ;;  %v287_v13 = vunpack.c.l.s4 %v984_v12  ;;  %v290_v16 = vshrl.u32 %v289_v14, 7  ;;  %s913_s14 = sshll.u32 %s1316_s13, 4 }
   0xe   : > { %928 = vmatprep.subr.mxu0 %v181_v1  ;;  %949 = vmatprep.subr.mxu1 %v181_v1  ;;  %v171_v7 = vld [vmem:[%s165_s27] sm:$0xff]  ;;  %v172_v9 = vld [vmem:[%s165_s27 + $0x8] sm:$0xff]  ;;  %v173_v10 = vld [vmem:[%s165_s27 + $0x10] sm:$0xff]  ;;  %s1268_s16 = scalar_lea.vmem %s1314_s3, %s913_s14 }
   0xf   : > { %929 = vmatpush3.msra.mxu0 %v181_v1  ;;  %957 = vmatpush3.msra.mxu1 %v181_v1  ;;  %v174_v11 = vld [vmem:[%s165_s27 + $0x18] sm:$0x1]  ;;  %v288_v15 = vunpack.c.0.s8 %v287_v13 }
  0x10   : > { %930 = vmatprep.subr.mxu0 %v180_v2  ;;  %950 = vmatprep.subr.mxu1 %v180_v2 }
  0x11   : > { %931 = vmatpush3.msra.mxu0 %v180_v2  ;;  %958 = vmatpush3.msra.mxu1 %v180_v2  ;;  %v1050_v17 = vsub.s32 %v288_v15, %v290_v16 }
  0x12   : > { %932 = vmatprep.subr.mxu0 %v179_v3  ;;  %951 = vmatprep.subr.mxu1 %v179_v3 }
  0x13   : > { %933 = vmatpush3.msra.mxu0 %v179_v3  ;;  %959 = vmatpush3.msra.mxu1 %v179_v3 }
  0x14   : > { %934 = vmatprep.subr.mxu0 %v178_v4  ;;  %952 = vmatprep.subr.mxu1 %v178_v4 }
  0x15   : > { %935 = vmatpush3.msra.mxu0 %v178_v4  ;;  %960 = vmatpush3.msra.mxu1 %v178_v4 }
  0x16   : > { %936 = vmatprep.subr.mxu0 %v177_v5  ;;  %953 = vmatprep.subr.mxu1 %v177_v5 }
  0x17   : > { %937 = vmatpush3.msra.mxu0 %v177_v5  ;;  %961 = vmatpush3.msra.mxu1 %v177_v5 }
  0x18   : > { %938 = vmatprep.subr.mxu0 %v176_v6  ;;  %942 = vmatprep.mubr.msk.f32.mxu0 %vm183_vm0, %v171_v7 }
  0x19   : > { %939 = vmatpush3.msra.mxu0 %v176_v6  ;;  %954 = vmatprep.subr.mxu1 %v176_v6 }
  0x1a   : > { %940 = vmatprep.subr.mxu0 %v175_v8  ;;  %962 = vmatpush3.msra.mxu1 %v176_v6 }
  0x1b   : > { %941 = vmatpush3.msra.mxu0 %v175_v8  ;;  %955 = vmatprep.subr.mxu1 %v175_v8 }
  0x1c   : > { %943 = vmatmul.mubr.msk.f32.vlgmr.msra.gmra.mxu0 %vm183_vm0, %v172_v9  ;;  %963 = vmatpush3.msra.mxu1 %v175_v8 }
  0x1d   : > { %945 = vmatprep.mubr.msk.f32.mxu1 %vm183_vm0, %v173_v10 }
  0x1e   : > { %946 = vmatmul.mubr.msk.f32.vlgmr.msra.gmra.mxu1 %vm183_vm0, %v174_v11 }
  0xdc   : > { %v944_v18 = vpop.f32.mrf.mxu0 }
  0xdd   : > { %v341_v19 = vrot.slane %v944_v18, %v1050_v17  ;;  %v334_v21 = vcombine.high %v944_v18, %v944_v18 }
  0xde   : > { %v1053_v20 = vpop.f32.mrf.mxu1  ;;  %v262_v31 = vpop.f32.mrf.mxu0 }
  0xdf   : > { %v349_v22 = vcombine.high %v341_v19, %v341_v19  ;;  %v1056_v23 = vrot.slane %v341_v19, %v1050_v17  ;;  %v348_v25 = vrot.slane %v334_v21, %v1050_v17  ;;  %v285_v32 = vcombine.high %v262_v31, %v262_v31 }
  0xe0   : > { %v272_v24 = vpop.f32.mrf.mxu1  ;;  %v292_v33 = vrot.slane %v262_v31, %v1050_v17  ;;  %v438_v61 = vrot.slane %v1053_v20, %v1050_v17 }
  0xe1   : > { %532 = vrot.lane.b32.xlu1 %v1056_v23, %s985_s7  ;;  %474 = vrot.lane.b32.xlu0 %v1056_v23, %s986_s8  ;;  %v390_v26 = vrot.slane %v272_v24, %v1050_v17  ;;  %v371_v27 = vrot.slane %v349_v22, %v1050_v17  ;;  %v1069_v28 = vrot.slane %v348_v25, %v1050_v17 }
  0xe2   : > { %v1080_v30 = vcombine.high %v1056_v23, %v1056_v23  ;;  %v299_v34 = vrot.slane %v285_v32, %v1050_v17  ;;  %v300_v35 = vcombine.high %v292_v33, %v292_v33  ;;  %v1096_v36 = vrot.slane %v292_v33, %v1050_v17 }
  0xe3   : > { %v1072_v29 = vrot.slane %v390_v26, %v1050_v17  ;;  %v398_v39 = vcombine.high %v390_v26, %v390_v26  ;;  %v380_v41 = vcombine.high %v1069_v28, %v1069_v28  ;;  %v350_v42 = vcombine.high %v348_v25, %v348_v25 }
  0xe4   : > { %v1099_v37 = vrot.slane %v300_v35, %v1050_v17  ;;  %v315_v38 = vrot.slane %v299_v34, %v1050_v17  ;;  %v1107_v40 = vcombine.high %v1096_v36, %v1096_v36  ;;  %v1117_v44 = vcombine.high %v371_v27, %v371_v27 }
  0xe5   : > { %594 = vrot.lane.b32.xlu0 %v1056_v23, %s987_s9  ;;  %476 = vrot.lane.b32.xlu1 %v371_v27, %s986_s8  ;;  %v1115_v43 = vrot.slane %v398_v39, %v1050_v17  ;;  %v1124_v45 = vrot.slane %v350_v42, %v1050_v17  ;;  %v383_v46 = vcombine.high %v272_v24, %v272_v24 }
  0xe6   : > { %v1132_v47 = vcombine.high %v1072_v29, %v1072_v29  ;;  %v332_v50 = vcombine.high %v1099_v37, %v1099_v37  ;;  %v301_v52 = vcombine.high %v299_v34, %v299_v34  ;;  %v1160_v54 = vcombine.high %v315_v38, %v315_v38 }
  0xe7   : > { %v397_v48 = vrot.slane %v383_v46, %v1050_v17  ;;  %v430_v51 = vcombine.high %v1115_v43, %v1115_v43  ;;  %v382_v57 = vcombine.high %v1124_v45, %v1124_v45  ;;  %v445_v62 = vrot.slane %v438_v61, %v1050_v17 }
  0xe8   : > { %v1168_v56 = vrot.slane %v301_v52, %v1050_v17 }
  0xe9   : > { %486 = vrot.lane.b32.xlu0 %v1072_v29, %s986_s8  ;;  %480 = vrot.lane.b32.xlu1 %v1069_v28, %s986_s8  ;;  %v413_v49 = vrot.slane %v397_v48, %v1050_v17  ;;  %v399_v53 = vcombine.high %v397_v48, %v397_v48 }
  0xea   : > { %v333_v59 = vcombine.high %v1168_v56, %v1168_v56 }
  0xeb   : > { %v427_v55 = vrot.slane %v399_v53, %v1050_v17  ;;  %v429_v58 = vcombine.high %v413_v49, %v413_v49 }
  0xed   : > { %534 = vrot.lane.b32.xlu0 %v1080_v30, %s985_s7  ;;  %544 = vrot.lane.b32.xlu1 %v1072_v29, %s985_s7  ;;  %v431_v60 = vcombine.high %v427_v55, %v427_v55 }
  0xf1   : > { %538 = vrot.lane.b32.xlu0 %v1069_v28, %s985_s7  ;;  %596 = vrot.lane.b32.xlu1 %v371_v27, %s987_s9  ;;  %v909_v27 = vld [vmem:[%s1313_s2] ss:$0 sm:$0xff] }
  0xf2   : > { %v666_v33 = vrot.slane %v909_v27, %v1050_v17 }
  0xf5   : > { %606 = vrot.lane.b32.xlu0 %v1072_v29, %s987_s9  ;;  %600 = vrot.lane.b32.xlu1 %v1069_v28, %s987_s9 }
  0xf9   : > { %462 = vrot.lane.b32.xlu0 %v1099_v37, %s986_s8  ;;  %468 = vrot.lane.b32.xlu1 %v315_v38, %s986_s8  ;;  %v667_v38 = vcombine.high %v666_v33, %v666_v33 }
  0xfb   : > { %v1221_v46 = vrot.slane %v667_v38, %v1050_v17 }
  0xfd   : > { %464 = vrot.lane.b32.xlu0 %v1107_v40, %s986_s8  ;;  %484 = vrot.lane.b32.xlu1 %v380_v41, %s986_s8  ;;  %v1228_v53 = vcombine.high %v1221_v46, %v1221_v46 }
 0x101   : > { %478 = vrot.lane.b32.xlu0 %v1117_v44, %s986_s8  ;;  %488 = vrot.lane.b32.xlu1 %v1115_v43, %s986_s8 }
 0x105   : > { %482 = vrot.lane.b32.xlu0 %v1124_v45, %s986_s8  ;;  %536 = vrot.lane.b32.xlu1 %v1117_v44, %s985_s7 }
 0x109   : > { %490 = vrot.lane.b32.xlu0 %v1132_v47, %s986_s8  ;;  %540 = vrot.lane.b32.xlu1 %v1124_v45, %s985_s7 }
 0x10d   : > { %546 = vrot.lane.b32.xlu0 %v1115_v43, %s985_s7  ;;  %548 = vrot.lane.b32.xlu1 %v1132_v47, %s985_s7 }
 0x111   : > { %550 = vrot.lane.b32.xlu0 %v413_v49, %s985_s7  ;;  %604 = vrot.lane.b32.xlu1 %v380_v41, %s987_s9  ;;  %v1224_v49 = vrot.slane %v666_v33, %v1050_v17 }
 0x115   : > { %598 = vrot.lane.b32.xlu0 %v1117_v44, %s987_s9  ;;  %608 = vrot.lane.b32.xlu1 %v1115_v43, %s987_s9 }
 0x119   : > { %602 = vrot.lane.b32.xlu0 %v1124_v45, %s987_s9  ;;  %466 = vrot.lane.b32.xlu1 %v332_v50, %s986_s8 }
 0x11d   : > { %610 = vrot.lane.b32.xlu0 %v1132_v47, %s987_s9  ;;  %492 = vrot.lane.b32.xlu1 %v430_v51, %s986_s8 }
 0x121   : > { %528 = vrot.lane.b32.xlu1 %v1160_v54, %s985_s7  ;;  %470 = vrot.lane.b32.xlu0 %v1160_v54, %s986_s8 }
 0x125   : > { %552 = vrot.lane.b32.xlu1 %v427_v55, %s985_s7  ;;  %526 = vrot.lane.b32.xlu0 %v1168_v56, %s985_s7 }
 0x129   : > { %612 = vrot.lane.b32.xlu1 %v430_v51, %s987_s9  ;;  %542 = vrot.lane.b32.xlu0 %v382_v57, %s985_s7 }
 0x12d   : > { %616 = vrot.lane.b32.xlu1 %v429_v58, %s987_s9  ;;  %554 = vrot.lane.b32.xlu0 %v429_v58, %s985_s7 }
 0x131   : > { %590 = vrot.lane.b32.xlu0 %v1160_v54, %s987_s9  ;;  %472 = vrot.lane.b32.xlu1 %v333_v59, %s986_s8 }
 0x135   : > { %614 = vrot.lane.b32.xlu0 %v427_v55, %s987_s9  ;;  %556 = vrot.lane.b32.xlu1 %v431_v60, %s985_s7  ;;  %v1232_v55 = vcombine.high %v1224_v49, %v1224_v49 }
 0x139   : > { %530 = vrot.lane.b32.xlu0 %v333_v59, %s985_s7  ;;  %592 = vrot.lane.b32.xlu1 %v333_v59, %s987_s9 }
 0x13d   : > { %618 = vrot.lane.b32.xlu0 %v431_v60, %s987_s9  ;;  %620 = vrot.lane.b32.xlu1 %v445_v62, %s987_s9 }
 0x153   : > { %v533_v63 = vpop.permute.xlu1 %532  ;;  %v475_v0 = vpop.permute.xlu0 %474 }
 0x154   : > { %v516_v1 = vadd.f32 %v475_v0, %v333_v59 }
 0x157   : > { %v1193_v2 = vpop.permute.xlu0 %594  ;;  %v477_v3 = vpop.permute.xlu1 %476 }
 0x158   : > { %v517_v42 = vadd.f32 %v477_v3, %v1056_v23 }
 0x15b   : > { %v487_v4 = vpop.permute.xlu0 %486  ;;  %v481_v5 = vpop.permute.xlu1 %480 }
 0x15c   : > { %v1195_v6 = vadd.f32 %v487_v4, %v382_v57 }
 0x15f   : > { %v1197_v7 = vpop.permute.xlu0 %534  ;;  %v545_v8 = vpop.permute.xlu1 %544 }
 0x163   : > { %v539_v9 = vpop.permute.xlu0 %538  ;;  %v597_v10 = vpop.permute.xlu1 %596 }
 0x164   : > { %v580_v11 = vadd.f32 %v539_v9, %v516_v1 }
 0x167   : > { %v607_v12 = vpop.permute.xlu0 %606  ;;  %v1199_v13 = vpop.permute.xlu1 %600 }
 0x16b   : > { %v1201_v14 = vpop.permute.xlu0 %462  ;;  %v469_v15 = vpop.permute.xlu1 %468 }
 0x16c   : > { %v513_v16 = vadd.f32 %v469_v15, %v332_v50 }
 0x16e   : > { %v577_v18 = vadd.f32 %v533_v63, %v513_v16 }
 0x16f   : > { %v1203_v19 = vpop.permute.xlu0 %464  ;;  %v485_v20 = vpop.permute.xlu1 %484 }
 0x170   : > { %v1205_v21 = vadd.f32 %v597_v10, %v577_v18  ;;  %v519_v10 = vadd.f32 %v481_v5, %v1117_v44 }
 0x172   : > { %v583_v27 = vadd.f32 %v545_v8, %v519_v10 }
 0x173   : > { %v479_v22 = vpop.permute.xlu0 %478  ;;  %v1207_v24 = vpop.permute.xlu1 %488 }
 0x174   : > { %v518_v33 = vadd.f32 %v479_v22, %v1080_v30 }
 0x177   : > { %v483_v25 = vpop.permute.xlu0 %482  ;;  %v1209_v26 = vpop.permute.xlu1 %536 }
 0x178   : > { %v520_v9 = vadd.f32 %v483_v25, %v1069_v28 }
 0x17b   : > { %v1214_v31 = vpop.permute.xlu0 %490  ;;  %v541_v32 = vpop.permute.xlu1 %540 }
 0x17c   : > { %v581_v48 = vadd.f32 %v541_v32, %v517_v42 }
 0x17f   : > { %v547_v34 = vpop.permute.xlu0 %546  ;;  %v549_v35 = vpop.permute.xlu1 %548 }
 0x180   : > { %v584_v15 = vadd.f32 %v547_v34, %v520_v9 }
 0x183   : > { %v1217_v39 = vpop.permute.xlu0 %550  ;;  %v605_v41 = vpop.permute.xlu1 %604 }
 0x184   : > { %v645_v52 = vadd.f32 %v605_v41, %v581_v48 }
 0x186   : > { %v695_v58 = vadd.f32 %v1228_v53, %v645_v52 }
 0x187   : > { %v599_v50 = vpop.permute.xlu0 %598  ;;  %v609_v51 = vpop.permute.xlu1 %608 }
 0x188   : > { %v711_v63 = vmax.f32 %v695_v58, 0.0  ;;  %v647_v41 = vadd.f32 %v609_v51, %v583_v27 }
 0x18a   : > { %v697_v44 = vadd.f32 %v1221_v46, %v647_v41  ;;  %v524_v41 = vadd.f32 %v1214_v31, %v1115_v43 }
 0x18b   : > { %v603_v57 = vpop.permute.xlu0 %602  ;;  %v1234_v23 = vpop.permute.xlu1 %466 }
 0x18c   : > { %v644_v59 = vadd.f32 %v603_v57, %v580_v11  ;;  %v521_v11 = vadd.f32 %v485_v20, %v1124_v45 }
 0x18e   : > { %v694_v60 = vadd.f32 %v1232_v55, %v644_v59  ;;  %v585_v38 = vadd.f32 %v549_v35, %v521_v11  ;;  %v713_v35 = vmax.f32 %v697_v44, 0.0 }
 0x18f   : > { %v611_v61 = vpop.permute.xlu0 %610  ;;  %v1238_v62 = vpop.permute.xlu1 %492 }
 0x190   : > { %v710_v0 = vmax.f32 %v694_v60, 0.0  ;;  %v648_v32 = vadd.f32 %v611_v61, %v584_v15  ;;  %v586_v15 = vadd.f32 %v1217_v39, %v1195_v6  ;;  %v512_v39 = vadd.f32 %v1234_v23, %v1107_v40 }
 0x191   : > { %v525_v40 = vadd.f32 %v1238_v62, %v1132_v47 }
 0x192   : > { %v1240_v1 = vcombine.low %v710_v0, %v711_v63  ;;  %v698_v52 = vadd.f32 %v1232_v55, %v648_v32 }
 0x193   : > { %v529_v3 = vpop.permute.xlu1 %528  ;;  %v471_v4 = vpop.permute.xlu0 %470 }
 0x194   : > { %v514_v28 = vadd.f32 %v471_v4, %v1168_v56  ;;  %v714_v25 = vmax.f32 %v698_v52, 0.0  ;;  %v510_v56 = vadd.f32 %v1201_v14, %v1096_v36  ;;  %v511_v14 = vadd.f32 %v1203_v19, %v1099_v37 }
 0x195   : > { %v691_v52 = vadd.f32 %v1228_v53, %v1205_v21 }
 0x196   : > { %v578_v34 = vadd.f32 %v1197_v7, %v514_v28  ;;  %v523_v7 = vadd.f32 %v1207_v24, %v1072_v29 }
 0x197   : > { %v553_v16 = vpop.permute.xlu1 %552  ;;  %v527_v18 = vpop.permute.xlu0 %526 }
 0x198   : > { %v642_v0 = vadd.f32 %v599_v50, %v578_v34  ;;  %v574_v4 = vadd.f32 %v527_v18, %v510_v56  ;;  %v587_v24 = vadd.f32 %v553_v16, %v523_v7  ;;  %v575_v18 = vadd.f32 %v529_v3, %v511_v14 }
 0x19a   : > { %v692_v29 = vadd.f32 %v1224_v49, %v642_v0 }
 0x19b   : > { %v613_v42 = vpop.permute.xlu1 %612  ;;  %v543_v48 = vpop.permute.xlu0 %542 }
 0x19c   : > { %v649_v57 = vadd.f32 %v613_v42, %v585_v38  ;;  %v582_v58 = vadd.f32 %v543_v48, %v518_v33  ;;  %v708_v23 = vmax.f32 %v692_v29, 0.0 }
 0x19e   : > { %v699_v5 = vadd.f32 %v1228_v53, %v649_v57  ;;  %v646_v8 = vadd.f32 %v607_v12, %v582_v58 }
 0x19f   : > { %v617_v45 = vpop.permute.xlu1 %616  ;;  %v555_v20 = vpop.permute.xlu0 %554 }
 0x1a0   : > { %v715_v30 = vmax.f32 %v699_v5, 0.0  ;;  %v696_v22 = vadd.f32 %v1224_v49, %v646_v8  ;;  %v651_v19 = vadd.f32 %v617_v45, %v587_v24  ;;  %v588_v57 = vadd.f32 %v555_v20, %v524_v41 }
 0x1a2   : > { %v785_v51 = vcombine.low %v714_v25, %v715_v30  ;;  %v712_v59 = vmax.f32 %v696_v22, 0.0  ;;  %v701_v31 = vadd.f32 %v1221_v46, %v651_v19  ;;  %v707_v30 = vmax.f32 %v691_v52, 0.0 }
 0x1a3   : > { %v591_v60 = vpop.permute.xlu0 %590  ;;  %v473_v61 = vpop.permute.xlu1 %472 }
 0x1a4   : > { %v784_v63 = vcombine.low %v712_v59, %v713_v35  ;;  %v515_v12 = vadd.f32 %v473_v61, %v1160_v54  ;;  %v799_v9 = vrot.slane %v785_v51, %v1050_v17  ;;  %v638_v50 = vadd.f32 %v591_v60, %v574_v4 }
 0x1a5   : > { %v717_v35 = vmax.f32 %v701_v31, 0.0 }
 0x1a6   : > { %v792_v10 = vrot.slane %v784_v63, %v1050_v17  ;;  %v579_v27 = vadd.f32 %v1209_v26, %v515_v12  ;;  %v688_v16 = vadd.f32 %v1224_v49, %v638_v50 }
 0x1a7   : > { %v615_v11 = vpop.permute.xlu0 %614  ;;  %v557_v36 = vpop.permute.xlu1 %556 }
 0x1a8   : > { %v800_v54 = vcombine.low %v792_v10, %v799_v9  ;;  %v643_v6 = vadd.f32 %v1199_v13, %v579_v27  ;;  %v650_v26 = vadd.f32 %v615_v11, %v586_v15  ;;  %v589_v44 = vadd.f32 %v557_v36, %v525_v40 }
 0x1a9   : > { %v704_v45 = vmax.f32 %v688_v16, 0.0 }
 0x1aa   : > { %v807_v37 = vrot.slane %v800_v54, %v1050_v17  ;;  %v693_v32 = vadd.f32 %v1221_v46, %v643_v6  ;;  %v700_v48 = vadd.f32 %v1224_v49, %v650_v26  ;;  %v775_v49 = vrot.slane %v1240_v1, %v1050_v17 }
 0x1ab   : > { %v531_v33 = vpop.permute.xlu0 %530  ;;  %v593_v38 = vpop.permute.xlu1 %592 }
 0x1ac   : > { %839 = vst.msk [vmem:[%s1268_s16 + $0x8] sm:$0xf] %vm836_vm1, %v807_v37  ;;  %v576_v13 = vadd.f32 %v531_v33, %v512_v39  ;;  %v639_v42 = vadd.f32 %v593_v38, %v575_v18  ;;  %v709_v3 = vmax.f32 %v693_v32, 0.0  ;;  %v716_v20 = vmax.f32 %v700_v48, 0.0 }
 0x1ae   : > { %v640_v58 = vadd.f32 %v1193_v2, %v576_v13  ;;  %v689_v43 = vadd.f32 %v1221_v46, %v639_v42  ;;  %v760_v28 = vcombine.low %v708_v23, %v709_v3  ;;  %v808_v56 = vcombine.low %v716_v20, %v717_v35 }
 0x1af   : > { %v619_v5 = vpop.permute.xlu0 %618  ;;  %v621_v8 = vpop.permute.xlu1 %620 }
 0x1b0   : > { %v690_v47 = vadd.f32 %v1232_v55, %v640_v58  ;;  %v705_v62 = vmax.f32 %v689_v43, 0.0  ;;  %v652_v25 = vadd.f32 %v619_v5, %v588_v57  ;;  %v768_v21 = vrot.slane %v760_v28, %v1050_v17 }
 0x1b1   : > { %v653_v2 = vadd.f32 %v621_v8, %v589_v44  ;;  %v816_v9 = vrot.slane %v808_v56, %v1050_v17 }
 0x1b2   : > { %v706_v22 = vmax.f32 %v690_v47, 0.0  ;;  %v736_v46 = vcombine.low %v704_v45, %v705_v62  ;;  %v702_v34 = vadd.f32 %v1232_v55, %v652_v25  ;;  %v776_v51 = vcombine.low %v768_v21, %v775_v49 }
 0x1b3   : > { %v703_v59 = vadd.f32 %v1228_v53, %v653_v2 }
 0x1b4   : > { %v737_v60 = vcombine.low %v706_v22, %v707_v30  ;;  %v718_v61 = vmax.f32 %v702_v34, 0.0  ;;  %v783_v1 = vrot.slane %v776_v51, %v1050_v17  ;;  %v744_v12 = vrot.slane %v736_v46, %v1050_v17 }
 0x1b5   : > { %v719_v63 = vmax.f32 %v703_v59, 0.0 }
 0x1b6   : > { %v751_v0 = vrot.slane %v737_v60, %v1050_v17  ;;  %838 = vst.msk [vmem:[%s1268_s16 + $0x4] sm:$0xf] %vm836_vm1, %v783_v1 }
 0x1b7   : > { %v809_v4 = vcombine.low %v718_v61, %v719_v63 }
 0x1b8   : > { %v752_v55 = vcombine.low %v744_v12, %v751_v0 }
 0x1b9   : > { %v823_v10 = vrot.slane %v809_v4, %v1050_v17 }
 0x1ba   : > { %v759_v53 = vrot.slane %v752_v55, %v1050_v17 }
 0x1bb   : > { %v824_v7 = vcombine.low %v816_v9, %v823_v10 }
 0x1bc   : > { %837 = vst.msk [vmem:[%s1268_s16] sm:$0xf] %vm836_vm1, %v759_v53 }
 0x1bd   : > { %v831_v15 = vrot.slane %v824_v7, %v1050_v17 }
 0x1bf   : > { %840 = vst.msk [vmem:[%s1268_s16 + $0xc] sm:$0xf] %vm836_vm1, %v831_v15 }
 0x1c0 PF: > { %s13_s12 = sadd.s32 1, %s982_s12  }
 0x1c1   : > { %p10_p4 = scmp.ge.s32.totalorder %s13_s12, 4  }
 0x1c3   :  { %12 = sbr.rel (!%p10_p4) target bundleno = 1 (0x1), region = 62 }

// kernel: unet_forward.6
= control target key start
LH: loop header
LB: loop body
LE: loop exit
PB: predicated region body
PF: predicated region fallthrough
CT: control target
= control target key end

     0   :  { %s2529_s12 = smov 0   ;;  %s3907_s0 = inlined_call_operand.vmem [shape: f32[2,81,4], index: 0, kind: input, shape index: {}]   ;;  %s3908_s1 = inlined_call_operand.vmem [shape: f32[4,64], index: 1, kind: input, shape index: {}]   ;;  %s3909_s2 = inlined_call_operand.vmem [shape: f32[1,16], index: 2, kind: input, shape index: {}]   ;;  %s3910_s3 = inlined_call_operand.vmem [shape: f32[2,8,8,16], index: 3, kind: output, shape index: {}]  }
   0x1 LB: > { %s2407_s13 = sadd.s32 4294967295, %s2501_s12   ;;  %p2411_p0 = scmp.ge.s32.totalorder %s2501_s12, 1  ;;  %s2501_s12 = sphi %s2529_s12, %s13_s12  }
   0x2   : > { %p137_p1 = scmp.lt.s32.totalorder %s2501_s12, 3 }
   0x4   : > { %p138_p2 = pnand %p2411_p0, %p137_p1 }
   0x6   : > { %141 = sbr.rel (%p138_p2) target bundleno = 727 (0x2d7), region = 32 }
   0xb   : > { %v182_v0 = vld [vmem:[%s3908_s1] sm:$0xf]  ;;  %vm217_vm0 = vcmask 1043456   ;;  %p161_p3 = scmp.lt.s32.totalorder %s2407_s13, 1  ;;  %v2503_v1 = vmov 0.0   ;;  %vm2504_vm1 = vmmov 0   ;;  %v356_v14 = vlaneseq }
   0xc   : > { %2443 = vmatprep.subr.mxu0 %v2503_v1  ;;  %2478 = vmatprep.subr.mxu1 %v2503_v1  ;;  %vm183_vm2 = vcmask 31744   ;;  %v2505_v12 = vmov 1966171168   ;;  %s2506_s20 = smov 96   ;;  %s2507_s21 = smov 112   ;;  %vm2343_vm3 = vcmask 130048  }
   0xd   : > { %2444 = vmatpush3.msk.msra.mxu0 %vm217_vm0, %v182_v0  ;;  %2479 = vmatpush3.msk.msra.mxu1 %vm217_vm0, %v182_v0  ;;  %s4288_s13 = smov (!%p161_p3, %s2407_s13), 1  ;;  %v354_v13 = vunpack.c.l.s4 %v2505_v12  ;;  %v357_v16 = vshrl.u32 %v356_v14, 7  ;;  %s2508_s22 = smov 80  }
   0xe   : > { %2445 = vmatprep.mubr.msk.f32.mxu0 %vm2504_vm1, %v2503_v1  ;;  %2463 = vmatprep.mubr.msk.f32.mxu1 %vm2504_vm1, %v2503_v1  ;;  %s2480_s16 = smul.u32 88, %s4288_s13  ;;  %s2430_s25 = sshll.u32 %s4288_s13, 6 }
   0xf   : > { %v355_v15 = vunpack.c.0.s8 %v354_v13  ;;  %s3654_s28 = scalar_lea.vmem %s3910_s3, %s2430_s25 }
  0x10   : > { %s2548_s19 = scalar_lea.vmem %s3907_s0, %s2480_s16 }
  0x11   : > { %v171_v2 = vld [vmem:[%s2548_s19] sm:$0xff]  ;;  %v177_v3 = vld [vmem:[%s2548_s19 + $0x30] sm:$0xff]  ;;  %v172_v4 = vld [vmem:[%s2548_s19 + $0x8] sm:$0xff]  ;;  %v2579_v17 = vsub.s32 %v355_v15, %v357_v16 }
  0x12   : > { %2446 = vmatmul.mubr.msk.f32.vlgmr.msra.gmra.mxu0 %vm183_vm2, %v171_v2  ;;  %2464 = vmatmul.mubr.msk.f32.vlgmr.msra.gmra.mxu1 %vm183_vm2, %v177_v3  ;;  %v178_v5 = vld [vmem:[%s2548_s19 + $0x38] sm:$0xff]  ;;  %v173_v6 = vld [vmem:[%s2548_s19 + $0x10] sm:$0xff]  ;;  %v179_v7 = vld [vmem:[%s2548_s19 + $0x40] sm:$0xff] }
  0x13   : > { %2448 = vmatprep.mubr.msk.f32.mxu0 %vm2504_vm1, %v2503_v1  ;;  %2466 = vmatprep.mubr.msk.f32.mxu1 %vm2504_vm1, %v2503_v1  ;;  %v174_v8 = vld [vmem:[%s2548_s19 + $0x18] sm:$0xff]  ;;  %v175_v9 = vld [vmem:[%s2548_s19 + $0x20] sm:$0xff]  ;;  %v176_v10 = vld [vmem:[%s2548_s19 + $0x28] sm:$0xff] }
  0x14   : > { %v180_v11 = vld [vmem:[%s2548_s19 + $0x48] sm:$0xff] }
  0x16   : > { %2449 = vmatmul.mubr.msk.f32.gmra.mxu0 %vm183_vm2, %v172_v4  ;;  %2467 = vmatmul.mubr.msk.f32.gmra.mxu1 %vm183_vm2, %v178_v5 }
  0x17   : > { %2451 = vmatprep.mubr.msk.f32.mxu0 %vm2504_vm1, %v2503_v1  ;;  %2469 = vmatprep.mubr.msk.f32.mxu1 %vm2504_vm1, %v2503_v1 }
  0x1a   : > { %2452 = vmatmul.mubr.msk.f32.gmra.mxu0 %vm183_vm2, %v173_v6  ;;  %2470 = vmatmul.mubr.msk.f32.gmra.mxu1 %vm183_vm2, %v179_v7 }
  0x1b   : > { %2454 = vmatprep.mubr.msk.f32.mxu0 %vm2504_vm1, %v2503_v1  ;;  %2472 = vmatprep.mubr.msk.f32.mxu1 %vm2504_vm1, %v2503_v1 }
  0x1e   : > { %2455 = vmatmul.mubr.msk.f32.gmra.mxu0 %vm183_vm2, %v174_v8  ;;  %2473 = vmatmul.mubr.msk.f32.gmra.mxu1 %vm183_vm2, %v180_v11  ;;  %v181_v11 = vld [vmem:[%s2548_s19 + $0x50] sm:$0x1] }
  0x1f   : > { %2457 = vmatprep.mubr.msk.f32.mxu0 %vm2504_vm1, %v2503_v1  ;;  %2475 = vmatprep.mubr.msk.f32.mxu1 %vm2504_vm1, %v2503_v1 }
  0x22   : > { %2458 = vmatmul.mubr.msk.f32.gmra.mxu0 %vm183_vm2, %v175_v9  ;;  %2476 = vmatmul.mubr.msk.f32.gmra.mxu1 %vm183_vm2, %v181_v11 }
  0x23   : > { %2460 = vmatprep.mubr.msk.f32.mxu0 %vm2504_vm1, %v2503_v1 }
  0x26   : > { %2461 = vmatmul.mubr.msk.f32.gmra.mxu0 %vm183_vm2, %v176_v10 }
  0xd2   : > { %v287_v18 = vpop.f32.mrf.mxu0  ;;  %v317_v19 = vpop.f32.mrf.mxu1 }
  0xd3   : > { %v352_v20 = vcombine.high %v287_v18, %v287_v18  ;;  %v359_v21 = vrot.slane %v287_v18, %v2579_v17  ;;  %v653_v22 = vrot.slane %v317_v19, %v2579_v17  ;;  %v646_v40 = vcombine.high %v317_v19, %v317_v19 }
  0xd4   : > { %v2447_v23 = vpop.f32.mrf.mxu0  ;;  %v2465_v24 = vpop.f32.mrf.mxu1 }
  0xd5   : > { %v366_v25 = vrot.slane %v352_v20, %v2579_v17  ;;  %v367_v26 = vcombine.high %v359_v21, %v359_v21  ;;  %v2585_v27 = vrot.slane %v653_v22, %v2579_v17  ;;  %v2602_v34 = vrot.slane %v359_v21, %v2579_v17 }
  0xd6   : > { %v2587_v28 = vpop.f32.mrf.mxu0  ;;  %v2589_v29 = vpop.f32.mrf.mxu1  ;;  %v661_v35 = vcombine.high %v653_v22, %v653_v22  ;;  %v660_v45 = vrot.slane %v646_v40, %v2579_v17 }
  0xd7   : > { %3965 = vst [vmem:[#allocation2_spill] sm:$0xff] %v2585_v27  ;;  %1246 = vrot.lane.b32.xlu1 %v2585_v27, %s2506_s20  ;;  %1004 = vrot.lane.b32.xlu0 %v2585_v27, %s2507_s21  ;;  %v2596_v30 = vrot.slane %v367_v26, %v2579_v17  ;;  %v2599_v31 = vrot.slane %v366_v25, %v2579_v17  ;;  %3968 = vst [vmem:[#allocation5_spill] sm:$0xff] %v2602_v34 }
  0xd8   : > { %v2450_v32 = vpop.f32.mrf.mxu0  ;;  %v2468_v33 = vpop.f32.mrf.mxu1  ;;  %v2613_v41 = vrot.slane %v661_v35, %v2579_v17  ;;  %v2617_v42 = vcombine.high %v2602_v34, %v2602_v34  ;;  %v2628_v46 = vcombine.high %v2585_v27, %v2585_v27  ;;  %v2637_v49 = vrot.slane %v660_v45, %v2579_v17 }
  0xd9   : > { %3966 = vst [vmem:[#allocation3_spill] sm:$0xff] %v2596_v30  ;;  %3967 = vst [vmem:[#allocation4_spill] sm:$0xff] %v2599_v31  ;;  %v368_v52 = vcombine.high %v366_v25, %v366_v25  ;;  %v2647_v53 = vcombine.high %v2596_v30, %v2596_v30  ;;  %v408_v54 = vrot.slane %v2587_v28, %v2579_v17 }
  0xda   : > { %v2604_v36 = vpop.f32.mrf.mxu0  ;;  %v2606_v37 = vpop.f32.mrf.mxu1  ;;  %3969 = vst [vmem:[#allocation6_spill] sm:$0xff] %v2613_v41  ;;  %3970 = vst [vmem:[#allocation7_spill] sm:$0xff] %v2617_v42  ;;  %v2657_v55 = vcombine.high %v2599_v31, %v2599_v31  ;;  %v2669_v58 = vcombine.high %v2613_v41, %v2613_v41  ;;  %v702_v59 = vrot.slane %v2589_v29, %v2579_v17 }
  0xdb   : > { %920 = vrot.lane.b32.xlu0 %v2596_v30, %s2507_s21  ;;  %926 = vrot.lane.b32.xlu1 %v2599_v31, %s2507_s21  ;;  %3971 = vst [vmem:[#allocation8_spill] sm:$0xff] %v2628_v46  ;;  %3972 = vst [vmem:[#allocation9_spill] sm:$0xff] %v2637_v49  ;;  %v2660_v56 = vrot.slane %v368_v52, %v2579_v17  ;;  %v424_v57 = vrot.slane %v408_v54, %v2579_v17 }
  0xdc   : > { %v2453_v38 = vpop.f32.mrf.mxu0  ;;  %v2471_v39 = vpop.f32.mrf.mxu1  ;;  %3973 = vst [vmem:[#allocation10_spill] sm:$0xff] %v2647_v53  ;;  %3974 = vst [vmem:[#allocation11_spill] sm:$0xff] %v2657_v55  ;;  %v662_v60 = vcombine.high %v660_v45, %v660_v45  ;;  %v2678_v61 = vcombine.high %v2637_v49, %v2637_v49  ;;  %v2681_v62 = vrot.slane %v702_v59, %v2579_v17 }
  0xdd   : > { %3975 = vst [vmem:[#allocation12_spill] sm:$0xff] %v2660_v56  ;;  %3976 = vst [vmem:[#allocation13_spill] sm:$0xff] %v2669_v58  ;;  %v401_v0 = vcombine.high %v2587_v28, %v2587_v28  ;;  %v695_v1 = vcombine.high %v2589_v29, %v2589_v29  ;;  %v2700_v2 = vcombine.high %v2660_v56, %v2660_v56 }
  0xde   : > { %v2619_v43 = vpop.f32.mrf.mxu0  ;;  %3977 = vst [vmem:[#allocation14_spill] sm:$0xff] %v2678_v61  ;;  %3978 = vst [vmem:[#allocation15_spill] sm:$0xff] %v2681_v62  ;;  %v2688_v63 = vrot.slane %v662_v60, %v2579_v17  ;;  %v2707_v4 = vcombine.high %v424_v57, %v424_v57  ;;  %v2712_v6 = vcombine.high %v2681_v62, %v2681_v62 }
  0xdf   : > { %922 = vrot.lane.b32.xlu0 %v2617_v42, %s2507_s21  ;;  %1006 = vrot.lane.b32.xlu1 %v2613_v41, %s2507_s21  ;;  %3979 = vst [vmem:[#allocation16_spill] sm:$0xff] %v2700_v2  ;;  %v415_v3 = vrot.slane %v401_v0, %v2579_v17  ;;  %v709_v5 = vrot.slane %v695_v1, %v2579_v17 }
  0xe0   : > { %v2456_v44 = vpop.f32.mrf.mxu0  ;;  %3980 = vst [vmem:[#allocation17_spill] sm:$0xff] %v2712_v6  ;;  %v710_v9 = vcombine.high %v702_v59, %v702_v59  ;;  %v2730_v10 = vcombine.high %v2688_v63, %v2688_v63  ;;  %v416_v12 = vcombine.high %v408_v54, %v408_v54  ;;  %v457_v18 = vrot.slane %v2604_v36, %v2579_v17 }
  0xe1   : > { %v2719_v7 = vrot.slane %v415_v3, %v2579_v17  ;;  %v2722_v8 = vrot.slane %v709_v5, %v2579_v17  ;;  %v417_v15 = vcombine.high %v415_v3, %v415_v3  ;;  %v711_v23 = vcombine.high %v709_v5, %v709_v5  ;;  %v2844_v44 = vpop.f32.mrf.mxu1 }
  0xe2   : > { %v2630_v47 = vpop.f32.mrf.mxu0  ;;  %3982 = vst [vmem:[#allocation19_spill] sm:$0xff] %v2730_v10  ;;  %v2739_v13 = vrot.slane %v710_v9, %v2579_v17  ;;  %v2746_v14 = vrot.slane %v416_v12, %v2579_v17  ;;  %v2774_v21 = vrot.slane %v457_v18, %v2579_v17  ;;  %v751_v25 = vrot.slane %v2606_v37, %v2579_v17 }
  0xe3   : > { %1008 = vrot.lane.b32.xlu0 %v2628_v46, %s2507_s21  ;;  %1250 = vrot.lane.b32.xlu1 %v2628_v46, %s2506_s20  ;;  %3981 = vst [vmem:[#allocation18_spill] sm:$0xff] %v2722_v8  ;;  %v2767_v19 = vrot.slane %v417_v15, %v2579_v17  ;;  %v2771_v20 = vcombine.high %v2719_v7, %v2719_v7  ;;  %v2474_v45 = vpop.f32.mrf.mxu1 }
  0xe4   : > { %v2459_v48 = vpop.f32.mrf.mxu0  ;;  %3983 = vst [vmem:[#allocation20_spill] sm:$0xff] %v2739_v13  ;;  %3984 = vst [vmem:[#allocation21_spill] sm:$0xff] %v2746_v14  ;;  %v2758_v16 = vcombine.high %v2746_v14, %v2746_v14  ;;  %v2782_v22 = vcombine.high %v2722_v8, %v2722_v8  ;;  %v2790_v24 = vcombine.high %v2739_v13, %v2739_v13 }
  0xe5   : > { %v2799_v26 = vrot.slane %v711_v23, %v2579_v17  ;;  %v2802_v28 = vrot.slane %v751_v25, %v2579_v17  ;;  %v744_v29 = vcombine.high %v2606_v37, %v2606_v37  ;;  %v450_v32 = vcombine.high %v2604_v36, %v2604_v36 }
  0xe6   : > { %v2639_v50 = vpop.f32.mrf.mxu0  ;;  %3985 = vst [vmem:[#allocation22_spill] sm:$0xff] %v2758_v16  ;;  %3986 = vst [vmem:[#allocation23_spill] sm:$0xff] %v2790_v24  ;;  %v465_v33 = vcombine.high %v457_v18, %v457_v18  ;;  %v2827_v38 = vcombine.high %v2767_v19, %v2767_v19  ;;  %v2862_v54 = vcombine.high %v2774_v21, %v2774_v21 }
  0xe7   : > { %1012 = vrot.lane.b32.xlu0 %v2637_v49, %s2507_s21  ;;  %1254 = vrot.lane.b32.xlu1 %v2637_v49, %s2506_s20  ;;  %3987 = vst [vmem:[#allocation24_spill] sm:$0xff] %v2799_v26  ;;  %3988 = vst [vmem:[#allocation25_spill] sm:$0xff] %v2802_v28  ;;  %v758_v35 = vrot.slane %v744_v29, %v2579_v17  ;;  %v2831_v39 = vcombine.high %v2802_v28, %v2802_v28 }
  0xe8   : > { %v2462_v51 = vpop.f32.mrf.mxu0  ;;  %v464_v37 = vrot.slane %v450_v32, %v2579_v17  ;;  %v2842_v40 = vrot.slane %v465_v33, %v2579_v17  ;;  %3993 = vst [vmem:[#allocation30_spill] sm:$0xff] %v2862_v54  ;;  %v506_v60 = vrot.slane %v2619_v43, %v2579_v17  ;;  %v2884_v3 = vcombine.high %v2799_v26, %v2799_v26 }
  0xe9   : > { %3989 = vst [vmem:[#allocation26_spill] sm:$0xff] %v2831_v39  ;;  %v2839_v36 = vrot.slane %v758_v35, %v2579_v17  ;;  %v759_v51 = vcombine.high %v751_v25, %v751_v25  ;;  %v760_v18 = vcombine.high %v758_v35, %v758_v35 }
  0xea   : > { %v2851_v48 = vrot.slane %v464_v37, %v2579_v17  ;;  %3998 = vst [vmem:[#allocation35_spill] sm:$0xff] %v2884_v3  ;;  %v2891_v9 = vrot.slane %v506_v60, %v2579_v17  ;;  %v466_v15 = vcombine.high %v464_v37, %v464_v37  ;;  %v2911_v29 = vcombine.high %v2842_v40, %v2842_v40 }
  0xeb   : > { %1248 = vrot.lane.b32.xlu0 %v2613_v41, %s2506_s20  ;;  %924 = vrot.lane.b32.xlu1 %v2647_v53, %s2507_s21  ;;  %3990 = vst [vmem:[#allocation27_spill] sm:$0xff] %v2839_v36  ;;  %v2858_v52 = vrot.slane %v759_v51, %v2579_v17  ;;  %v2925_v35 = vrot.slane %v760_v18, %v2579_v17 }
  0xec   : > { %3991 = vst [vmem:[#allocation28_spill] sm:$0xff] %v2851_v48  ;;  %v2888_v5 = vcombine.high %v2851_v48, %v2851_v48  ;;  %3999 = vst [vmem:[#allocation36_spill] sm:$0xff] %v2891_v9  ;;  %v2922_v33 = vrot.slane %v466_v15, %v2579_v17  ;;  %v2941_v15 = vcombine.high %v2839_v36, %v2839_v36 }
  0xed   : > { %3992 = vst [vmem:[#allocation29_spill] sm:$0xff] %v2858_v52  ;;  %v2915_v32 = vcombine.high %v2858_v52, %v2858_v52  ;;  %4005 = vst [vmem:[#allocation42_spill] sm:$0xff] %v2925_v35 }
  0xee   : > { %4010 = vst [vmem:[#allocation47_spill] sm:$0xff] %v2941_v15 }
  0xef   : > { %930 = vrot.lane.b32.xlu1 %v2657_v55, %s2507_s21  ;;  %928 = vrot.lane.b32.xlu0 %v2660_v56, %s2507_s21  ;;  %4004 = vst [vmem:[#allocation41_spill] sm:$0xff] %v2915_v32 }
  0xf3   : > { %1252 = vrot.lane.b32.xlu0 %v2669_v58, %s2506_s20  ;;  %934 = vrot.lane.b32.xlu1 %v424_v57, %s2507_s21 }
  0xf7   : > { %1256 = vrot.lane.b32.xlu0 %v2678_v61, %s2506_s20  ;;  %1010 = vrot.lane.b32.xlu1 %v2669_v58, %s2507_s21 }
  0xfb   : > { %1260 = vrot.lane.b32.xlu0 %v2681_v62, %s2506_s20  ;;  %1014 = vrot.lane.b32.xlu1 %v2688_v63, %s2507_s21 }
  0xff   : > { %932 = vrot.lane.b32.xlu0 %v2700_v2, %s2507_s21  ;;  %1018 = vrot.lane.b32.xlu1 %v2681_v62, %s2507_s21 }
 0x103   : > { %1022 = vrot.lane.b32.xlu1 %v2712_v6, %s2507_s21  ;;  %936 = vrot.lane.b32.xlu0 %v2707_v4, %s2507_s21 }
 0x107   : > { %1026 = vrot.lane.b32.xlu1 %v2722_v8, %s2507_s21  ;;  %940 = vrot.lane.b32.xlu0 %v2719_v7, %s2507_s21 }
 0x10b   : > { %1178 = vrot.lane.b32.xlu1 %v2707_v4, %s2506_s20  ;;  %1016 = vrot.lane.b32.xlu0 %v2730_v10, %s2507_s21 }
 0x10f   : > { %1182 = vrot.lane.b32.xlu1 %v2719_v7, %s2506_s20  ;;  %1020 = vrot.lane.b32.xlu0 %v2739_v13, %s2507_s21 }
 0x113   : > { %1258 = vrot.lane.b32.xlu1 %v2730_v10, %s2506_s20  ;;  %1176 = vrot.lane.b32.xlu0 %v2746_v14, %s2506_s20 }
 0x117   : > { %1262 = vrot.lane.b32.xlu1 %v2739_v13, %s2506_s20  ;;  %1264 = vrot.lane.b32.xlu0 %v2712_v6, %s2506_s20 }
 0x11b   : > { %938 = vrot.lane.b32.xlu1 %v2758_v16, %s2507_s21  ;;  %1268 = vrot.lane.b32.xlu0 %v2722_v8, %s2506_s20 }
 0x11f   : > { %944 = vrot.lane.b32.xlu0 %v2771_v20, %s2507_s21  ;;  %942 = vrot.lane.b32.xlu1 %v2767_v19, %s2507_s21 }
 0x123   : > { %1030 = vrot.lane.b32.xlu1 %v2782_v22, %s2507_s21  ;;  %948 = vrot.lane.b32.xlu0 %v2774_v21, %s2507_s21 }
 0x127   : > { %1186 = vrot.lane.b32.xlu1 %v2771_v20, %s2506_s20  ;;  %1024 = vrot.lane.b32.xlu0 %v2790_v24, %s2507_s21 }
 0x12b   : > { %1190 = vrot.lane.b32.xlu1 %v2774_v21, %s2506_s20  ;;  %1028 = vrot.lane.b32.xlu0 %v2799_v26, %s2507_s21 }
 0x12f   : > { %1266 = vrot.lane.b32.xlu1 %v2790_v24, %s2506_s20  ;;  %1032 = vrot.lane.b32.xlu0 %v2802_v28, %s2507_s21 }
 0x133   : > { %1270 = vrot.lane.b32.xlu1 %v2799_v26, %s2506_s20  ;;  %1180 = vrot.lane.b32.xlu0 %v2758_v16, %s2506_s20 }
 0x137   : > { %1274 = vrot.lane.b32.xlu1 %v2802_v28, %s2506_s20  ;;  %1184 = vrot.lane.b32.xlu0 %v2767_v19, %s2506_s20 }
 0x13b   : > { %946 = vrot.lane.b32.xlu1 %v2827_v38, %s2507_s21  ;;  %1036 = vrot.lane.b32.xlu0 %v2831_v39, %s2507_s21 }
 0x13f   : > { %1040 = vrot.lane.b32.xlu0 %v2839_v36, %s2507_s21  ;;  %950 = vrot.lane.b32.xlu1 %v2842_v40, %s2507_s21 }
 0x143   : > { %1188 = vrot.lane.b32.xlu0 %v2827_v38, %s2506_s20  ;;  %954 = vrot.lane.b32.xlu1 %v2851_v48, %s2507_s21 }
 0x147   : > { %1192 = vrot.lane.b32.xlu0 %v2862_v54, %s2506_s20  ;;  %1034 = vrot.lane.b32.xlu1 %v2858_v52, %s2507_s21 }
 0x149   : > { %v2868_v57 = vpop.permute.xlu1 %1246  ;;  %v2870_v59 = vpop.permute.xlu0 %1004 }
 0x14a   : > { %3994 = vst [vmem:[#allocation31_spill] sm:$0xff] %v2868_v57  ;;  %3995 = vst [vmem:[#allocation32_spill] sm:$0xff] %v2870_v59  ;;  %v499_v59 = vcombine.high %v2619_v43, %v2619_v43  ;;  %v2979_v57 = vcombine.high %v2925_v35, %v2925_v35 }
 0x14b   : > { %1196 = vrot.lane.b32.xlu0 %v2851_v48, %s2506_s20  ;;  %1278 = vrot.lane.b32.xlu1 %v2831_v39, %s2506_s20 }
 0x14c   : > { %4017 = vst [vmem:[#allocation54_spill] sm:$0xff] %v2979_v57  ;;  %v513_v43 = vrot.slane %v499_v59, %v2579_v17  ;;  %v555_v59 = vrot.slane %v2630_v47, %v2579_v17 }
 0x14d   : > { %v2878_v0 = vpop.permute.xlu0 %920  ;;  %v2880_v1 = vpop.permute.xlu1 %926 }
 0x14e   : > { %3996 = vst [vmem:[#allocation33_spill] sm:$0xff] %v2878_v0  ;;  %3997 = vst [vmem:[#allocation34_spill] sm:$0xff] %v2880_v1  ;;  %v2998_v54 = vrot.slane %v513_v43, %v2579_v17 }
 0x14f   : > { %1272 = vrot.lane.b32.xlu0 %v2884_v3, %s2506_s20  ;;  %958 = vrot.lane.b32.xlu1 %v2888_v5, %s2507_s21 }
 0x151   : > { %v2897_v11 = vpop.permute.xlu0 %922  ;;  %v2899_v12 = vpop.permute.xlu1 %1006 }
 0x152   : > { %4000 = vst [vmem:[#allocation37_spill] sm:$0xff] %v2897_v11  ;;  %4001 = vst [vmem:[#allocation38_spill] sm:$0xff] %v2899_v12  ;;  %v2961_v12 = vcombine.high %v2891_v9, %v2891_v9 }
 0x153   : > { %1276 = vrot.lane.b32.xlu0 %v2858_v52, %s2506_s20  ;;  %962 = vrot.lane.b32.xlu1 %v2891_v9, %s2507_s21 }
 0x155   : > { %v2905_v23 = vpop.permute.xlu0 %1008  ;;  %v2907_v25 = vpop.permute.xlu1 %1250 }
 0x156   : > { %4002 = vst [vmem:[#allocation39_spill] sm:$0xff] %v2905_v23  ;;  %4003 = vst [vmem:[#allocation40_spill] sm:$0xff] %v2907_v25 }
 0x157   : > { %952 = vrot.lane.b32.xlu0 %v2911_v29, %s2507_s21  ;;  %1038 = vrot.lane.b32.xlu1 %v2915_v32, %s2507_s21 }
 0x159   : > { %v2927_v37 = vpop.permute.xlu0 %1012  ;;  %v2929_v45 = vpop.permute.xlu1 %1254 }
 0x15a   : > { %4006 = vst [vmem:[#allocation43_spill] sm:$0xff] %v2927_v37  ;;  %4007 = vst [vmem:[#allocation44_spill] sm:$0xff] %v2929_v45  ;;  %v514_v45 = vcombine.high %v506_v60, %v506_v60 }
 0x15b   : > { %956 = vrot.lane.b32.xlu0 %v2922_v33, %s2507_s21  ;;  %1042 = vrot.lane.b32.xlu1 %v2925_v35, %s2507_s21 }
 0x15c   : > { %v2987_v60 = vrot.slane %v514_v45, %v2579_v17  ;;  %v515_v45 = vcombine.high %v513_v43, %v513_v43 }
 0x15d   : > { %v2935_v51 = vpop.permute.xlu0 %1248  ;;  %v2937_v3 = vpop.permute.xlu1 %924 }
 0x15e   : > { %4008 = vst [vmem:[#allocation45_spill] sm:$0xff] %v2935_v51  ;;  %4009 = vst [vmem:[#allocation46_spill] sm:$0xff] %v2937_v3 }
 0x15f   : > { %1044 = vrot.lane.b32.xlu0 %v2941_v15, %s2507_s21  ;;  %1194 = vrot.lane.b32.xlu1 %v2911_v29, %s2506_s20 }
 0x161   : > { %v2947_v18 = vpop.permute.xlu1 %930  ;;  %v2949_v61 = vpop.permute.xlu0 %928 }
 0x162   : > { %4011 = vst [vmem:[#allocation48_spill] sm:$0xff] %v2947_v18  ;;  %4012 = vst [vmem:[#allocation49_spill] sm:$0xff] %v2949_v61  ;;  %v3042_v61 = vcombine.high %v2987_v60, %v2987_v60 }
 0x163   : > { %1200 = vrot.lane.b32.xlu0 %v2888_v5, %s2506_s20  ;;  %1198 = vrot.lane.b32.xlu1 %v2922_v33, %s2506_s20 }
 0x164   : > { %4031 = vst [vmem:[#allocation68_spill] sm:$0xff] %v3042_v61 }
 0x165   : > { %v2955_v37 = vpop.permute.xlu0 %1252  ;;  %v2957_v23 = vpop.permute.xlu1 %934 }
 0x166   : > { %4013 = vst [vmem:[#allocation50_spill] sm:$0xff] %v2955_v37  ;;  %4014 = vst [vmem:[#allocation51_spill] sm:$0xff] %v2957_v23  ;;  %v2975_v37 = vcombine.high %v2922_v33, %v2922_v33  ;;  %v3016_v23 = vcombine.high %v2998_v54, %v2998_v54 }
 0x167   : > { %1204 = vrot.lane.b32.xlu0 %v2891_v9, %s2506_s20  ;;  %966 = vrot.lane.b32.xlu1 %v2961_v12, %s2507_s21 }
 0x168   : > { %4024 = vst [vmem:[#allocation61_spill] sm:$0xff] %v3016_v23 }
 0x169   : > { %v2969_v25 = vpop.permute.xlu0 %1256  ;;  %v2971_v51 = vpop.permute.xlu1 %1010 }
 0x16a   : > { %4015 = vst [vmem:[#allocation52_spill] sm:$0xff] %v2969_v25  ;;  %4016 = vst [vmem:[#allocation53_spill] sm:$0xff] %v2971_v51 }
 0x16b   : > { %960 = vrot.lane.b32.xlu0 %v2975_v37, %s2507_s21  ;;  %1046 = vrot.lane.b32.xlu1 %v2979_v57, %s2507_s21 }
 0x16d   : > { %v2989_v51 = vpop.permute.xlu0 %1260  ;;  %v2991_v25 = vpop.permute.xlu1 %1014 }
 0x16e   : > { %4018 = vst [vmem:[#allocation55_spill] sm:$0xff] %v2989_v51  ;;  %4019 = vst [vmem:[#allocation56_spill] sm:$0xff] %v2991_v25 }
 0x16f   : > { %1202 = vrot.lane.b32.xlu1 %v2975_v37, %s2506_s20  ;;  %964 = vrot.lane.b32.xlu0 %v2987_v60, %s2507_s21 }
 0x171   : > { %v3000_v14 = vpop.permute.xlu0 %932  ;;  %v3002_v55 = vpop.permute.xlu1 %1018 }
 0x172   : > { %4020 = vst [vmem:[#allocation57_spill] sm:$0xff] %v3000_v14  ;;  %4021 = vst [vmem:[#allocation58_spill] sm:$0xff] %v3002_v55  ;;  %v3019_v55 = vrot.slane %v555_v59, %v2579_v17  ;;  %v3026_v14 = vrot.slane %v515_v45, %v2579_v17 }
 0x173   : > { %1206 = vrot.lane.b32.xlu1 %v2987_v60, %s2506_s20  ;;  %968 = vrot.lane.b32.xlu0 %v2998_v54, %s2507_s21 }
 0x174   : > { %4025 = vst [vmem:[#allocation62_spill] sm:$0xff] %v3019_v55  ;;  %4026 = vst [vmem:[#allocation63_spill] sm:$0xff] %v3026_v14  ;;  %v3062_v18 = vcombine.high %v3026_v14, %v3026_v14 }
 0x175   : > { %v3010_v25 = vpop.permute.xlu1 %1022  ;;  %v3012_v51 = vpop.permute.xlu0 %936 }
 0x176   : > { %4022 = vst [vmem:[#allocation59_spill] sm:$0xff] %v3010_v25  ;;  %4023 = vst [vmem:[#allocation60_spill] sm:$0xff] %v3012_v51 }
 0x177   : > { %1210 = vrot.lane.b32.xlu1 %v2998_v54, %s2506_s20  ;;  %972 = vrot.lane.b32.xlu0 %v3016_v23, %s2507_s21  ;;  %4036 = vst [vmem:[#allocation73_spill] sm:$0xff] %v3062_v18 }
 0x179   : > { %v3028_v43 = vpop.permute.xlu1 %1026  ;;  %v3030_v25 = vpop.permute.xlu0 %940 }
 0x17a   : > { %4027 = vst [vmem:[#allocation64_spill] sm:$0xff] %v3028_v43  ;;  %4028 = vst [vmem:[#allocation65_spill] sm:$0xff] %v3030_v25 }
 0x17b   : > { %970 = vrot.lane.b32.xlu1 %v3026_v14, %s2507_s21  ;;  %976 = vrot.lane.b32.xlu0 %v3019_v55, %s2507_s21 }
 0x17d   : > { %v3036_v51 = vpop.permute.xlu1 %1178  ;;  %v3038_v2 = vpop.permute.xlu0 %1016 }
 0x17e   : > { %4029 = vst [vmem:[#allocation66_spill] sm:$0xff] %v3036_v51  ;;  %4030 = vst [vmem:[#allocation67_spill] sm:$0xff] %v3038_v2  ;;  %v563_v2 = vcombine.high %v555_v59, %v555_v59  ;;  %v548_v59 = vcombine.high %v2630_v47, %v2630_v47 }
 0x17f   : > { %1214 = vrot.lane.b32.xlu1 %v3016_v23, %s2506_s20  ;;  %1208 = vrot.lane.b32.xlu0 %v3042_v61, %s2506_s20  ;;  %v3066_v61 = vcombine.high %v3019_v55, %v3019_v55 }
 0x181   : > { %v3048_v45 = vpop.permute.xlu1 %1182  ;;  %v3050_v43 = vpop.permute.xlu0 %1020 }
 0x182   : > { %4032 = vst [vmem:[#allocation69_spill] sm:$0xff] %v3048_v45  ;;  %4033 = vst [vmem:[#allocation70_spill] sm:$0xff] %v3050_v43  ;;  %v3075_v43 = vrot.slane %v563_v2, %v2579_v17  ;;  %v562_v45 = vrot.slane %v548_v59, %v2579_v17 }
 0x183   : > { %1218 = vrot.lane.b32.xlu1 %v3019_v55, %s2506_s20  ;;  %1212 = vrot.lane.b32.xlu0 %v3026_v14, %s2506_s20 }
 0x184   : > { %4037 = vst [vmem:[#allocation74_spill] sm:$0xff] %v3075_v43  ;;  %v564_v47 = vcombine.high %v562_v45, %v562_v45  ;;  %v3103_v59 = vrot.slane %v562_v45, %v2579_v17 }
 0x185   : > { %v3056_v25 = vpop.permute.xlu1 %1258  ;;  %v3058_v31 = vpop.permute.xlu0 %1176 }
 0x186   : > { %4034 = vst [vmem:[#allocation71_spill] sm:$0xff] %v3056_v25  ;;  %4035 = vst [vmem:[#allocation72_spill] sm:$0xff] %v3058_v31  ;;  %v3120_v45 = vcombine.high %v3103_v59, %v3103_v59  ;;  %v597_v31 = vcombine.high %v2639_v50, %v2639_v50 }
 0x187   : > { %974 = vrot.lane.b32.xlu1 %v3062_v18, %s2507_s21  ;;  %980 = vrot.lane.b32.xlu0 %v3066_v61, %s2507_s21 }
 0x189   : > { %v3077_v25 = vpop.permute.xlu1 %1262  ;;  %v3079_v56 = vpop.permute.xlu0 %1264 }
 0x18a   : > { %4038 = vst [vmem:[#allocation75_spill] sm:$0xff] %v3077_v25  ;;  %4039 = vst [vmem:[#allocation76_spill] sm:$0xff] %v3079_v56  ;;  %v3100_v25 = vcombine.high %v3075_v43, %v3075_v43 }
 0x18b   : > { %1216 = vrot.lane.b32.xlu0 %v3062_v18, %s2506_s20  ;;  %978 = vrot.lane.b32.xlu1 %v3075_v43, %s2507_s21 }
 0x18d   : > { %v3086_v3 = vpop.permute.xlu1 %938  ;;  %v3088_v42 = vpop.permute.xlu0 %1268 }
 0x18e   : > { %4040 = vst [vmem:[#allocation77_spill] sm:$0xff] %v3086_v3  ;;  %4041 = vst [vmem:[#allocation78_spill] sm:$0xff] %v3088_v42  ;;  %v604_v42 = vrot.slane %v2639_v50, %v2579_v17  ;;  %v611_v50 = vrot.slane %v597_v31, %v2579_v17 }
 0x18f   : > { %1220 = vrot.lane.b32.xlu0 %v3075_v43, %s2506_s20  ;;  %1222 = vrot.lane.b32.xlu1 %v3066_v61, %s2506_s20 }
 0x190   : > { %v3123_v1 = vrot.slane %v604_v42, %v2579_v17 }
 0x191   : > { %v3094_v2 = vpop.permute.xlu0 %944  ;;  %v3096_v56 = vpop.permute.xlu1 %942 }
 0x192   : > { %4042 = vst [vmem:[#allocation79_spill] sm:$0xff] %v3094_v2  ;;  %4043 = vst [vmem:[#allocation80_spill] sm:$0xff] %v3096_v56  ;;  %v3112_v2 = vrot.slane %v564_v47, %v2579_v17 }
 0x193   : > { %982 = vrot.lane.b32.xlu1 %v3100_v25, %s2507_s21  ;;  %1224 = vrot.lane.b32.xlu0 %v3103_v59, %s2506_s20  ;;  %4046 = vst [vmem:[#allocation83_spill] sm:$0xff] %v3123_v1 }
 0x194   : > { %v3153_v11 = vcombine.high %v3112_v2, %v3112_v2 }
 0x195   : > { %v3114_v56 = vpop.permute.xlu1 %1030  ;;  %v3116_v3 = vpop.permute.xlu0 %948 }
 0x196   : > { %4044 = vst [vmem:[#allocation81_spill] sm:$0xff] %v3114_v56  ;;  %4045 = vst [vmem:[#allocation82_spill] sm:$0xff] %v3116_v3 }
 0x197   : > { %986 = vrot.lane.b32.xlu1 %v3120_v45, %s2507_s21  ;;  %984 = vrot.lane.b32.xlu0 %v3112_v2, %s2507_s21  ;;  %4053 = vst [vmem:[#allocation90_spill] sm:$0xff] %v3153_v11 }
 0x199   : > { %v3129_v53 = vpop.permute.xlu1 %1186  ;;  %v3131_v47 = vpop.permute.xlu0 %1024 }
 0x19a   : > { %4047 = vst [vmem:[#allocation84_spill] sm:$0xff] %v3129_v53  ;;  %4048 = vst [vmem:[#allocation85_spill] sm:$0xff] %v3131_v47  ;;  %v612_v47 = vcombine.high %v604_v42, %v604_v42  ;;  %v3165_v42 = vrot.slane %v611_v50, %v2579_v17 }
 0x19b   : > { %1228 = vrot.lane.b32.xlu0 %v3120_v45, %s2506_s20  ;;  %990 = vrot.lane.b32.xlu1 %v3123_v1, %s2507_s21 }
 0x19d   : > { %v3137_v56 = vpop.permute.xlu1 %1190  ;;  %v3139_v3 = vpop.permute.xlu0 %1028 }
 0x19e   : > { %4049 = vst [vmem:[#allocation86_spill] sm:$0xff] %v3137_v56  ;;  %4050 = vst [vmem:[#allocation87_spill] sm:$0xff] %v3139_v3  ;;  %v3157_v3 = vcombine.high %v3123_v1, %v3123_v1 }
 0x19f   : > { %1232 = vrot.lane.b32.xlu0 %v3123_v1, %s2506_s20  ;;  %1226 = vrot.lane.b32.xlu1 %v3112_v2, %s2506_s20 }
 0x1a0   : > { %4054 = vst [vmem:[#allocation91_spill] sm:$0xff] %v3157_v3 }
 0x1a1   : > { %v3147_v53 = vpop.permute.xlu1 %1266  ;;  %v3149_v51 = vpop.permute.xlu0 %1032 }
 0x1a2   : > { %4051 = vst [vmem:[#allocation88_spill] sm:$0xff] %v3147_v53  ;;  %4052 = vst [vmem:[#allocation89_spill] sm:$0xff] %v3149_v51  ;;  %v3168_v51 = vrot.slane %v612_v47, %v2579_v17 }
 0x1a3   : > { %988 = vrot.lane.b32.xlu0 %v3153_v11, %s2507_s21  ;;  %994 = vrot.lane.b32.xlu1 %v3157_v3, %s2507_s21 }
 0x1a4   : > { %4055 = vst [vmem:[#allocation92_spill] sm:$0xff] %v3168_v51 }
 0x1a5   : > { %v3170_v53 = vpop.permute.xlu1 %1270  ;;  %v3172_v56 = vpop.permute.xlu0 %1180 }
 0x1a6   : > { %4056 = vst [vmem:[#allocation93_spill] sm:$0xff] %v3170_v53  ;;  %4057 = vst [vmem:[#allocation94_spill] sm:$0xff] %v3172_v56  ;;  %v3192_v56 = vcombine.high %v3168_v51, %v3168_v51 }
 0x1a7   : > { %992 = vrot.lane.b32.xlu0 %v3168_v51, %s2507_s21  ;;  %998 = vrot.lane.b32.xlu1 %v3165_v42, %s2507_s21 }
 0x1a8   : > { %4062 = vst [vmem:[#allocation99_spill] sm:$0xff] %v3192_v56 }
 0x1a9   : > { %v3178_v31 = vpop.permute.xlu1 %1274  ;;  %v3180_v30 = vpop.permute.xlu0 %1184 }
 0x1aa   : > { %4058 = vst [vmem:[#allocation95_spill] sm:$0xff] %v3178_v31  ;;  %4059 = vst [vmem:[#allocation96_spill] sm:$0xff] %v3180_v30  ;;  %v613_v31 = vcombine.high %v611_v50, %v611_v50 }
 0x1ab   : > { %1236 = vrot.lane.b32.xlu0 %v3157_v3, %s2506_s20  ;;  %1230 = vrot.lane.b32.xlu1 %v3153_v11, %s2506_s20 }
 0x1ad   : > { %v3186_v47 = vpop.permute.xlu1 %946  ;;  %v3188_v53 = vpop.permute.xlu0 %1036 }
 0x1ae   : > { %4060 = vst [vmem:[#allocation97_spill] sm:$0xff] %v3186_v47  ;;  %4061 = vst [vmem:[#allocation98_spill] sm:$0xff] %v3188_v53  ;;  %v3204_v47 = vcombine.high %v3165_v42, %v3165_v42  ;;  %v3211_v53 = vrot.slane %v613_v31, %v2579_v17  ;;  %v800_v31 = vrot.slane %v2844_v44, %v2579_v17 }
 0x1af   : > { %996 = vrot.lane.b32.xlu0 %v3192_v56, %s2507_s21  ;;  %1234 = vrot.lane.b32.xlu1 %v3168_v51, %s2506_s20 }
 0x1b0   : > { %4065 = vst [vmem:[#allocation102_spill] sm:$0xff] %v3204_v47  ;;  %4066 = vst [vmem:[#allocation103_spill] sm:$0xff] %v3211_v53  ;;  %v808_v39 = vcombine.high %v800_v31, %v800_v31 }
 0x1b1   : > { %v3198_v30 = vpop.permute.xlu0 %1040  ;;  %v3200_v0 = vpop.permute.xlu1 %950 }
 0x1b2   : > { %4063 = vst [vmem:[#allocation100_spill] sm:$0xff] %v3198_v30  ;;  %4064 = vst [vmem:[#allocation101_spill] sm:$0xff] %v3200_v0  ;;  %v3223_v30 = vcombine.high %v3211_v53, %v3211_v53  ;;  %v3250_v52 = vrot.slane %v808_v39, %v2579_v17 }
 0x1b3   : > { %1238 = vrot.lane.b32.xlu1 %v3192_v56, %s2506_s20  ;;  %1000 = vrot.lane.b32.xlu0 %v3204_v47, %s2507_s21 }
 0x1b4   : > { %4069 = vst [vmem:[#allocation106_spill] sm:$0xff] %v3223_v30 }
 0x1b5   : > { %v3213_v34 = vpop.permute.xlu0 %1188  ;;  %v3215_v50 = vpop.permute.xlu1 %954 }
 0x1b6   : > { %4067 = vst [vmem:[#allocation104_spill] sm:$0xff] %v3213_v34  ;;  %4068 = vst [vmem:[#allocation105_spill] sm:$0xff] %v3215_v50 }
 0x1b7   : > { %1242 = vrot.lane.b32.xlu1 %v3204_v47, %s2506_s20  ;;  %1240 = vrot.lane.b32.xlu0 %v3211_v53, %s2506_s20 }
 0x1b9   : > { %v3225_v0 = vpop.permute.xlu0 %1192  ;;  %v3227_v57 = vpop.permute.xlu1 %1034 }
 0x1ba   : > { %4070 = vst [vmem:[#allocation107_spill] sm:$0xff] %v3225_v0  ;;  %4071 = vst [vmem:[#allocation108_spill] sm:$0xff] %v3227_v57  ;;  %v793_v57 = vcombine.high %v2844_v44, %v2844_v44 }
 0x1bb   : > { %1244 = vrot.lane.b32.xlu0 %v3223_v30, %s2506_s20  ;;  %1002 = vrot.lane.b32.xlu1 %v3223_v30, %s2507_s21 }
 0x1bd   : > { %v3235_v50 = vpop.permute.xlu0 %1196  ;;  %v3237_v34 = vpop.permute.xlu1 %1278 }
 0x1be   : > { %4072 = vst [vmem:[#allocation109_spill] sm:$0xff] %v3235_v50  ;;  %4073 = vst [vmem:[#allocation110_spill] sm:$0xff] %v3237_v34  ;;  %v807_v34 = vrot.slane %v793_v57, %v2579_v17  ;;  %v816_v50 = vrot.slane %v800_v31, %v2579_v17  ;;  %v3273_v57 = vcombine.high %v3250_v52, %v3250_v52 }
 0x1bf   : > { %1280 = vrot.lane.b32.xlu0 %v2915_v32, %s2506_s20  ;;  %1282 = vrot.lane.b32.xlu1 %v2839_v36, %s2506_s20 }
 0x1c0   : > { %v809_v39 = vcombine.high %v807_v34, %v807_v34  ;;  %4080 = vst [vmem:[#allocation117_spill] sm:$0xff] %v3273_v57  ;;  %v3280_v31 = vrot.slane %v807_v34, %v2579_v17 }
 0x1c1   : > { %v3245_v53 = vpop.permute.xlu0 %1272  ;;  %v3247_v0 = vpop.permute.xlu1 %958 }
 0x1c2   : > { %4074 = vst [vmem:[#allocation111_spill] sm:$0xff] %v3245_v53  ;;  %4075 = vst [vmem:[#allocation112_spill] sm:$0xff] %v3247_v0  ;;  %v3265_v53 = vcombine.high %v816_v50, %v816_v50  ;;  %v3301_v34 = vcombine.high %v3280_v31, %v3280_v31 }
 0x1c3   : > { %1284 = vrot.lane.b32.xlu0 %v2925_v35, %s2506_s20  ;;  %1286 = vrot.lane.b32.xlu1 %v2941_v15, %s2506_s20 }
 0x1c5   : > { %v3258_v36 = vpop.permute.xlu0 %1276  ;;  %v3260_v44 = vpop.permute.xlu1 %962 }
 0x1c6   : > { %4076 = vst [vmem:[#allocation113_spill] sm:$0xff] %v3258_v36  ;;  %4077 = vst [vmem:[#allocation114_spill] sm:$0xff] %v3260_v44  ;;  %v3287_v44 = vrot.slane %v809_v39, %v2579_v17 }
 0x1c7   : > { %1288 = vrot.lane.b32.xlu0 %v816_v50, %s2506_s20  ;;  %1290 = vrot.lane.b32.xlu1 %v3250_v52, %s2506_s20 }
 0x1c8   : > { %v3305_v39 = vcombine.high %v3287_v44, %v3287_v44 }
 0x1c9   : > { %v3267_v0 = vpop.permute.xlu0 %952  ;;  %v3269_v35 = vpop.permute.xlu1 %1038 }
 0x1ca   : > { %4078 = vst [vmem:[#allocation115_spill] sm:$0xff] %v3267_v0  ;;  %4079 = vst [vmem:[#allocation116_spill] sm:$0xff] %v3269_v35  ;;  %v3293_v35 = vpop.f32.mrf.mxu1 }
 0x1cb   : > { %1292 = vrot.lane.b32.xlu0 %v3265_v53, %s2506_s20  ;;  %1294 = vrot.lane.b32.xlu1 %v3273_v57, %s2506_s20 }
 0x1cd   : > { %v3282_v36 = vpop.permute.xlu0 %956  ;;  %v3284_v50 = vpop.permute.xlu1 %1042 }
 0x1ce   : > { %4081 = vst [vmem:[#allocation118_spill] sm:$0xff] %v3282_v36  ;;  %4082 = vst [vmem:[#allocation119_spill] sm:$0xff] %v3284_v50  ;;  %v2477_v50 = vpop.f32.mrf.mxu1 }
 0x1cf   : > { %1296 = vrot.lane.b32.xlu0 %v3280_v31, %s2506_s20  ;;  %1298 = vrot.lane.b32.xlu1 %v3287_v44, %s2506_s20 }
 0x1d1   : > { %v3295_v0 = vpop.permute.xlu0 %1044  ;;  %v3297_v57 = vpop.permute.xlu1 %1194 }
 0x1d2   : > { %4083 = vst [vmem:[#allocation120_spill] sm:$0xff] %v3295_v0  ;;  %4084 = vst [vmem:[#allocation121_spill] sm:$0xff] %v3297_v57 }
 0x1d3   : > { %1300 = vrot.lane.b32.xlu0 %v3301_v34, %s2506_s20  ;;  %1302 = vrot.lane.b32.xlu1 %v3305_v39, %s2506_s20 }
 0x1d5   : > { %v3311_v36 = vpop.permute.xlu0 %1200  ;;  %v3313_v0 = vpop.permute.xlu1 %1198 }
 0x1d6   : > { %4085 = vst [vmem:[#allocation122_spill] sm:$0xff] %v3311_v36  ;;  %4086 = vst [vmem:[#allocation123_spill] sm:$0xff] %v3313_v0 }
 0x1d7   : > { %1432 = vrot.lane.b32.xlu0 %v2707_v4, %s2508_s22  ;;  %1434 = vrot.lane.b32.xlu1 %v2758_v16, %s2508_s22 }
 0x1d9   : > { %v3319_v57 = vpop.permute.xlu0 %1204  ;;  %v3321_v50 = vpop.permute.xlu1 %966 }
 0x1da   : > { %4087 = vst [vmem:[#allocation124_spill] sm:$0xff] %v3319_v57  ;;  %4088 = vst [vmem:[#allocation125_spill] sm:$0xff] %v3321_v50 }
 0x1db   : > { %1436 = vrot.lane.b32.xlu0 %v2719_v7, %s2508_s22  ;;  %1438 = vrot.lane.b32.xlu1 %v2767_v19, %s2508_s22 }
 0x1dd   : > { %v3327_v36 = vpop.permute.xlu0 %960  ;;  %v3329_v0 = vpop.permute.xlu1 %1046 }
 0x1de   : > { %4089 = vst [vmem:[#allocation126_spill] sm:$0xff] %v3327_v36  ;;  %4090 = vst [vmem:[#allocation127_spill] sm:$0xff] %v3329_v0 }
 0x1df   : > { %1440 = vrot.lane.b32.xlu0 %v2771_v20, %s2508_s22  ;;  %1442 = vrot.lane.b32.xlu1 %v2827_v38, %s2508_s22 }
 0x1e1   : > { %v3335_v16 = vpop.permute.xlu1 %1202  ;;  %v3337_v57 = vpop.permute.xlu0 %964 }
 0x1e2   : > { %4091 = vst [vmem:[#allocation128_spill] sm:$0xff] %v3335_v16  ;;  %4092 = vst [vmem:[#allocation129_spill] sm:$0xff] %v3337_v57 }
 0x1e3   : > { %1444 = vrot.lane.b32.xlu0 %v2774_v21, %s2508_s22  ;;  %1446 = vrot.lane.b32.xlu1 %v2842_v40, %s2508_s22 }
 0x1e5   : > { %v3343_v50 = vpop.permute.xlu1 %1206  ;;  %v3345_v36 = vpop.permute.xlu0 %968 }
 0x1e6   : > { %4093 = vst [vmem:[#allocation130_spill] sm:$0xff] %v3345_v36 }
 0x1e7   : > { %1448 = vrot.lane.b32.xlu0 %v2911_v29, %s2508_s22  ;;  %1450 = vrot.lane.b32.xlu1 %v2851_v48, %s2508_s22 }
 0x1e9   : > { %v3351_v0 = vpop.permute.xlu1 %1210  ;;  %v3353_v16 = vpop.permute.xlu0 %972 }
 0x1ea   : > { %4094 = vst [vmem:[#allocation131_spill] sm:$0xff] %v3353_v16 }
 0x1eb   : > { %1452 = vrot.lane.b32.xlu0 %v2922_v33, %s2508_s22  ;;  %1454 = vrot.lane.b32.xlu1 %v2888_v5, %s2508_s22 }
 0x1ed   : > { %v3359_v40 = vpop.permute.xlu1 %970  ;;  %v3361_v57 = vpop.permute.xlu0 %976 }
 0x1ee   : > { %4095 = vst [vmem:[#allocation132_spill] sm:$0xff] %v3359_v40  ;;  %4096 = vst [vmem:[#allocation133_spill] sm:$0xff] %v3361_v57 }
 0x1ef   : > { %1456 = vrot.lane.b32.xlu0 %v2975_v37, %s2508_s22  ;;  %1458 = vrot.lane.b32.xlu1 %v2891_v9, %s2508_s22 }
 0x1f1   : > { %v3367_v36 = vpop.permute.xlu1 %1214  ;;  %v3369_v48 = vpop.permute.xlu0 %1208 }
 0x1f3   : > { %1460 = vrot.lane.b32.xlu0 %v2987_v60, %s2508_s22  ;;  %1462 = vrot.lane.b32.xlu1 %v2961_v12, %s2508_s22 }
 0x1f5   : > { %v3375_v16 = vpop.permute.xlu1 %1218  ;;  %v3377_v40 = vpop.permute.xlu0 %1212 }
 0x1f6   : > { %4097 = vst [vmem:[#allocation134_spill] sm:$0xff] %v3375_v16 }
 0x1f7   : > { %1464 = vrot.lane.b32.xlu0 %v2998_v54, %s2508_s22  ;;  %1466 = vrot.lane.b32.xlu1 %v3026_v14, %s2508_s22 }
 0x1f9   : > { %v3383_v57 = vpop.permute.xlu1 %974  ;;  %v3385_v9 = vpop.permute.xlu0 %980 }
 0x1fa   : > { %4098 = vst [vmem:[#allocation135_spill] sm:$0xff] %v3383_v57  ;;  %4099 = vst [vmem:[#allocation136_spill] sm:$0xff] %v3385_v9 }
 0x1fb   : > { %1468 = vrot.lane.b32.xlu0 %v3016_v23, %s2508_s22  ;;  %1470 = vrot.lane.b32.xlu1 %v3062_v18, %s2508_s22 }
 0x1fd   : > { %v3391_v12 = vpop.permute.xlu0 %1216  ;;  %v3393_v16 = vpop.permute.xlu1 %978 }
 0x1fe   : > { %4100 = vst [vmem:[#allocation137_spill] sm:$0xff] %v3393_v16 }
 0x1ff   : > { %1472 = vrot.lane.b32.xlu0 %v3019_v55, %s2508_s22  ;;  %1474 = vrot.lane.b32.xlu1 %v3075_v43, %s2508_s22 }
 0x201   : > { %v3399_v14 = vpop.permute.xlu0 %1220  ;;  %v3401_v57 = vpop.permute.xlu1 %1222 }
 0x203   : > { %1476 = vrot.lane.b32.xlu0 %v3066_v61, %s2508_s22  ;;  %1478 = vrot.lane.b32.xlu1 %v3100_v25, %s2508_s22 }
 0x205   : > { %v983_v9 = vpop.permute.xlu1 %982  ;;  %v3407_v18 = vpop.permute.xlu0 %1224 }
 0x206   : > { %4101 = vst [vmem:[#allocation138_spill] sm:$0xff] %v3407_v18 }
 0x207   : > { %1480 = vrot.lane.b32.xlu0 %v3112_v2, %s2508_s22  ;;  %1482 = vrot.lane.b32.xlu1 %v3120_v45, %s2508_s22 }
 0x209   : > { %v987_v43 = vpop.permute.xlu1 %986  ;;  %v985_v16 = vpop.permute.xlu0 %984 }
 0x20b   : > { %1484 = vrot.lane.b32.xlu0 %v3153_v11, %s2508_s22  ;;  %1486 = vrot.lane.b32.xlu1 %v3123_v1, %s2508_s22 }
 0x20d   : > { %v3417_v55 = vpop.permute.xlu0 %1228  ;;  %v3419_v25 = vpop.permute.xlu1 %990 }
 0x20e   : > { %4102 = vst [vmem:[#allocation139_spill] sm:$0xff] %v3419_v25 }
 0x20f   : > { %1488 = vrot.lane.b32.xlu0 %v3168_v51, %s2508_s22  ;;  %1490 = vrot.lane.b32.xlu1 %v3157_v3, %s2508_s22 }
 0x211   : > { %v3425_v23 = vpop.permute.xlu0 %1232  ;;  %v3427_v18 = vpop.permute.xlu1 %1226 }
 0x213   : > { %1492 = vrot.lane.b32.xlu0 %v3192_v56, %s2508_s22  ;;  %1494 = vrot.lane.b32.xlu1 %v3165_v42, %s2508_s22 }
 0x215   : > { %v989_v1 = vpop.permute.xlu0 %988  ;;  %v3433_v11 = vpop.permute.xlu1 %994 }
 0x216   : > { %4103 = vst [vmem:[#allocation140_spill] sm:$0xff] %v3433_v11 }
 0x217   : > { %1496 = vrot.lane.b32.xlu0 %v3204_v47, %s2508_s22  ;;  %1498 = vrot.lane.b32.xlu1 %v3223_v30, %s2508_s22 }
 0x219   : > { %v3439_v3 = vpop.permute.xlu0 %992  ;;  %v3441_v51 = vpop.permute.xlu1 %998 }
 0x21a   : > { %4104 = vst [vmem:[#allocation141_spill] sm:$0xff] %v3439_v3  ;;  %4105 = vst [vmem:[#allocation142_spill] sm:$0xff] %v3441_v51 }
 0x21b   : > { %1500 = vrot.lane.b32.xlu0 %v2585_v27, %s2508_s22  ;;  %1502 = vrot.lane.b32.xlu1 %v2613_v41, %s2508_s22  ;;  %v1143_v41 = vadd.f32 %v983_v9, %v3066_v61 }
 0x21d   : > { %v3447_v42 = vpop.permute.xlu0 %1236  ;;  %v3449_v56 = vpop.permute.xlu1 %1230 }
 0x21f   : > { %1504 = vrot.lane.b32.xlu0 %v2628_v46, %s2508_s22  ;;  %1506 = vrot.lane.b32.xlu1 %v2669_v58, %s2508_s22  ;;  %v1145_v46 = vadd.f32 %v987_v43, %v3112_v2 }
 0x221   : > { %v3455_v30 = vpop.permute.xlu0 %996  ;;  %v3457_v47 = vpop.permute.xlu1 %1234 }
 0x222   : > { %4106 = vst [vmem:[#allocation143_spill] sm:$0xff] %v3455_v30 }
 0x223   : > { %1508 = vrot.lane.b32.xlu0 %v2637_v49, %s2508_s22  ;;  %1510 = vrot.lane.b32.xlu1 %v2688_v63, %s2508_s22  ;;  %v1144_v49 = vadd.f32 %v985_v16, %v3103_v59  ;;  %v4116_v16 = vld [vmem:[#allocation29_spill] sm:$0xff]  ;;  %v4119_v59 = vld [vmem:[#allocation26_spill] sm:$0xff] }
 0x225   : > { %v1239_v27 = vpop.permute.xlu1 %1238  ;;  %v3464_v51 = vpop.permute.xlu0 %1000 }
 0x226   : > { %4107 = vst [vmem:[#allocation144_spill] sm:$0xff] %v3464_v51  ;;  %v3466_v11 = vadd.f32 %v1239_v27, %v1143_v41  ;;  %v1146_v27 = vadd.f32 %v989_v1, %v3120_v45 }
 0x227   : > { %1512 = vrot.lane.b32.xlu0 %v2730_v10, %s2508_s22  ;;  %1514 = vrot.lane.b32.xlu1 %v2681_v62, %s2508_s22 }
 0x229   : > { %v1243_v58 = vpop.permute.xlu1 %1242  ;;  %v1241_v30 = vpop.permute.xlu0 %1240 }
 0x22a   : > { %v3474_v63 = vadd.f32 %v1243_v58, %v1145_v46  ;;  %v3476_v61 = vadd.f32 %v1241_v30, %v1144_v49 }
 0x22b   : > { %1516 = vrot.lane.b32.xlu0 %v2739_v13, %s2508_s22  ;;  %1518 = vrot.lane.b32.xlu1 %v2712_v6, %s2508_s22  ;;  %v4138_v6 = vld [vmem:[#allocation46_spill] sm:$0xff]  ;;  %v4146_v13 = vld [vmem:[#allocation96_spill] sm:$0xff] }
 0x22c   : > { %4108 = vst [vmem:[#allocation145_spill] sm:$0xff] %v3474_v63  ;;  %4109 = vst [vmem:[#allocation146_spill] sm:$0xff] %v3476_v61 }
 0x22d   : > { %v1245_v41 = vpop.permute.xlu0 %1244  ;;  %v3483_v9 = vpop.permute.xlu1 %1002 }
 0x22e   : > { %4110 = vst [vmem:[#allocation147_spill] sm:$0xff] %v3483_v9  ;;  %v3485_v43 = vadd.f32 %v1245_v41, %v1146_v27  ;;  %v4122_v27 = vld [vmem:[#allocation27_spill] sm:$0xff]  ;;  %v4123_v41 = vld [vmem:[#allocation42_spill] sm:$0xff] }
 0x22f   : > { %1520 = vrot.lane.b32.xlu0 %v2790_v24, %s2508_s22  ;;  %1522 = vrot.lane.b32.xlu1 %v2722_v8, %s2508_s22  ;;  %v4134_v8 = vld [vmem:[#allocation72_spill] sm:$0xff]  ;;  %v4136_v24 = vld [vmem:[#allocation34_spill] sm:$0xff] }
 0x230   : > { %4111 = vst [vmem:[#allocation148_spill] sm:$0xff] %v3485_v43 }
 0x231   : > { %v3491_v30 = vpop.permute.xlu0 %1280  ;;  %v3493_v46 = vpop.permute.xlu1 %1282 }
 0x232   : > { %4112 = vst [vmem:[#allocation149_spill] sm:$0xff] %v3491_v30  ;;  %4113 = vst [vmem:[#allocation150_spill] sm:$0xff] %v3493_v46  ;;  %v4132_v46 = vld [vmem:[#allocation37_spill] sm:$0xff]  ;;  %v4135_v30 = vld [vmem:[#allocation10_spill] sm:$0xff] }
 0x233   : > { %1524 = vrot.lane.b32.xlu0 %v2799_v26, %s2508_s22  ;;  %1526 = vrot.lane.b32.xlu1 %v2782_v22, %s2508_s22 }
 0x235   : > { %v3499_v49 = vpop.permute.xlu0 %1284  ;;  %v3501_v58 = vpop.permute.xlu1 %1286 }
 0x236   : > { %4114 = vst [vmem:[#allocation151_spill] sm:$0xff] %v3499_v49  ;;  %4115 = vst [vmem:[#allocation152_spill] sm:$0xff] %v3501_v58  ;;  %v4130_v58 = vld [vmem:[#allocation33_spill] sm:$0xff] }
 0x237   : > { %1528 = vrot.lane.b32.xlu0 %v2802_v28, %s2508_s22  ;;  %1530 = vrot.lane.b32.xlu1 %v4116_v16, %s2508_s22  ;;  %v4129_v28 = vld [vmem:[#allocation5_spill] sm:$0xff] }
 0x238   : > { %v1112_v49 = vadd.f32 %v4130_v58, %v4129_v28  ;;  %v1115_v28 = vadd.f32 %v4136_v24, %v4135_v30  ;;  %v4137_v58 = vld [vmem:[#allocation7_spill] sm:$0xff]  ;;  %v848_v24 = vrot.slane %v3293_v35, %v2579_v17  ;;  %v4140_v30 = vld [vmem:[#allocation69_spill] sm:$0xff] }
 0x239   : > { %v3507_v1 = vpop.permute.xlu0 %1288  ;;  %v3509_v2 = vpop.permute.xlu1 %1290  ;;  %v4145_v35 = vld [vmem:[#allocation49_spill] sm:$0xff] }
 0x23a   : > { %4117 = vst [vmem:[#allocation153_spill] sm:$0xff] %v3507_v1  ;;  %4118 = vst [vmem:[#allocation154_spill] sm:$0xff] %v3509_v2  ;;  %v2427_v2 = vld [vmem:[%s3909_s2] ss:$0 sm:$0xff]  ;;  %v855_v62 = vrot.slane %v848_v24, %v2579_v17 }
 0x23b   : > { %1532 = vrot.lane.b32.xlu0 %v4119_v59, %s2508_s22  ;;  %1534 = vrot.lane.b32.xlu1 %v2915_v32, %s2508_s22  ;;  %v1701_v32 = vrot.slane %v2427_v2, %v2579_v17 }
 0x23d   : > { %v3515_v22 = vpop.permute.xlu0 %1292  ;;  %v3517_v45 = vpop.permute.xlu1 %1294  ;;  %v1709_v1 = vcombine.high %v1701_v32, %v1701_v32 }
 0x23e   : > { %4120 = vst [vmem:[#allocation155_spill] sm:$0xff] %v3515_v22  ;;  %4121 = vst [vmem:[#allocation156_spill] sm:$0xff] %v3517_v45  ;;  %v4126_v45 = vld [vmem:[#allocation54_spill] sm:$0xff] }
 0x23f   : > { %1536 = vrot.lane.b32.xlu0 %v4122_v27, %s2508_s22  ;;  %1538 = vrot.lane.b32.xlu1 %v4123_v41, %s2508_s22  ;;  %v1694_v41 = vcombine.high %v2427_v2, %v2427_v2 }
 0x241   : > { %v3526_v16 = vpop.permute.xlu0 %1296  ;;  %v3528_v59 = vpop.permute.xlu1 %1298  ;;  %v1708_v2 = vrot.slane %v1694_v41, %v2579_v17  ;;  %v4142_v41 = vld [vmem:[#allocation12_spill] sm:$0xff] }
 0x242   : > { %4124 = vst [vmem:[#allocation157_spill] sm:$0xff] %v3526_v16  ;;  %4125 = vst [vmem:[#allocation158_spill] sm:$0xff] %v3528_v59  ;;  %v4131_v16 = vld [vmem:[#allocation3_spill] sm:$0xff] }
 0x243   : > { %1540 = vrot.lane.b32.xlu0 %v2941_v15, %s2508_s22  ;;  %1542 = vrot.lane.b32.xlu1 %v4126_v45, %s2508_s22  ;;  %v1113_v59 = vadd.f32 %v4132_v46, %v4131_v16  ;;  %v4133_v15 = vld [vmem:[#allocation66_spill] sm:$0xff]  ;;  %v1114_v46 = vadd.f32 %v4138_v6, %v4137_v58  ;;  %v3555_v16 = vrot.slane %v1701_v32, %v2579_v17  ;;  %v4144_v58 = vld [vmem:[#allocation4_spill] sm:$0xff] }
 0x244   : > { %v4141_v6 = vld [vmem:[#allocation94_spill] sm:$0xff] }
 0x245   : > { %v3535_v27 = vpop.permute.xlu0 %1300  ;;  %v3537_v22 = vpop.permute.xlu1 %1302  ;;  %v1369_v45 = vadd.f32 %v4133_v15, %v1113_v59  ;;  %v1370_v59 = vadd.f32 %v4141_v6, %v1114_v46  ;;  %v3570_v32 = vcombine.high %v3555_v16, %v3555_v16 }
 0x246   : > { %4127 = vst [vmem:[#allocation54_spill] sm:$0xff] %v3535_v27  ;;  %4128 = vst [vmem:[#allocation159_spill] sm:$0xff] %v3537_v22  ;;  %v1368_v27 = vadd.f32 %v4134_v8, %v1112_v49  ;;  %v4139_v8 = vld [vmem:[#allocation117_spill] sm:$0xff]  ;;  %v1371_v49 = vadd.f32 %v4140_v30, %v1115_v28 }
 0x247   : > { %1544 = vrot.lane.b32.xlu0 %v3250_v52, %s2508_s22  ;;  %1546 = vrot.lane.b32.xlu1 %v3265_v53, %s2508_s22  ;;  %v3558_v52 = vrot.slane %v1709_v1, %v2579_v17 }
 0x249   : > { %v1433_v26 = vpop.permute.xlu0 %1432  ;;  %v1435_v22 = vpop.permute.xlu1 %1434 }
 0x24a   : > { %v1624_v53 = vadd.f32 %v1433_v26, %v1368_v27  ;;  %v1625_v15 = vadd.f32 %v1435_v22, %v1369_v45  ;;  %v3574_v26 = vcombine.high %v3558_v52, %v3558_v52  ;;  %v1710_v27 = vcombine.high %v1708_v2, %v1708_v2 }
 0x24b   : > { %1548 = vrot.lane.b32.xlu0 %v4139_v8, %s2508_s22  ;;  %1550 = vrot.lane.b32.xlu1 %v3280_v31, %s2508_s22  ;;  %v4143_v31 = vld [vmem:[#allocation48_spill] sm:$0xff]  ;;  %v1116_v8 = vadd.f32 %v4145_v35, %v4144_v58  ;;  %v4151_v35 = vld [vmem:[#allocation57_spill] sm:$0xff] }
 0x24c   : > { %v1117_v45 = vadd.f32 %v4143_v31, %v4142_v41  ;;  %v1751_v46 = vadd.f32 %v3555_v16, %v1624_v53  ;;  %v1752_v6 = vadd.f32 %v3558_v52, %v1625_v15  ;;  %v4147_v53 = vld [vmem:[#allocation16_spill] sm:$0xff] }
 0x24d   : > { %v1437_v1 = vpop.permute.xlu0 %1436  ;;  %v1439_v22 = vpop.permute.xlu1 %1438  ;;  %v1372_v10 = vadd.f32 %v4146_v13, %v1116_v8 }
 0x24e   : > { %v1626_v28 = vadd.f32 %v1437_v1, %v1370_v59  ;;  %v1627_v30 = vadd.f32 %v1439_v22, %v1371_v49  ;;  %v3591_v49 = vrot.slane %v1708_v2, %v2579_v17  ;;  %v4148_v59 = vld [vmem:[#allocation51_spill] sm:$0xff]  ;;  %v4149_v1 = vld [vmem:[#allocation84_spill] sm:$0xff]  ;;  %v1815_v2 = vmax.f32 %v1751_v46, 0.0 }
 0x24f   : > { %1552 = vrot.lane.b32.xlu0 %v3287_v44, %s2508_s22  ;;  %1554 = vrot.lane.b32.xlu1 %v3301_v34, %s2508_s22  ;;  %v1119_v15 = vadd.f32 %v4148_v59, %v4147_v53  ;;  %v1373_v24 = vadd.f32 %v4149_v1, %v1117_v45  ;;  %v3597_v44 = vrot.slane %v1710_v27, %v2579_v17  ;;  %v4150_v34 = vld [vmem:[#allocation11_spill] sm:$0xff]  ;;  %v1816_v43 = vmax.f32 %v1752_v6, 0.0  ;;  %v4153_v45 = vld [vmem:[#allocation104_spill] sm:$0xff]  ;;  %v4154_v1 = vld [vmem:[#allocation21_spill] sm:$0xff] }
 0x250   : > { %v1753_v41 = vadd.f32 %v3570_v32, %v1626_v28  ;;  %v1754_v31 = vadd.f32 %v3574_v26, %v1627_v30  ;;  %v1118_v13 = vadd.f32 %v4151_v35, %v4150_v34  ;;  %v4152_v30 = vld [vmem:[#allocation86_spill] sm:$0xff]  ;;  %v3609_v59 = vcombine.high %v3591_v49, %v3591_v49 }
 0x251   : > { %v1441_v22 = vpop.permute.xlu0 %1440  ;;  %v1443_v58 = vpop.permute.xlu1 %1442  ;;  %v1375_v51 = vadd.f32 %v4152_v30, %v1119_v15  ;;  %v1943_v34 = vcombine.low %v1815_v2, %v1816_v43 }
 0x252   : > { %v1817_v8 = vmax.f32 %v1753_v41, 0.0  ;;  %v1818_v28 = vmax.f32 %v1754_v31, 0.0  ;;  %v1628_v9 = vadd.f32 %v1441_v22, %v1372_v10  ;;  %v1629_v3 = vadd.f32 %v1443_v58, %v1373_v24  ;;  %v4155_v24 = vld [vmem:[#allocation60_spill] sm:$0xff] }
 0x253   : > { %1556 = vrot.lane.b32.xlu0 %v3305_v39, %s2508_s22  ;;  %1558 = vrot.lane.b32.xlu1 %v855_v62, %s2508_s22  ;;  %v1374_v27 = vadd.f32 %v4153_v45, %v1118_v13  ;;  %v3613_v10 = vcombine.high %v3597_v44, %v3597_v44  ;;  %v1120_v22 = vadd.f32 %v4155_v24, %v4154_v1  ;;  %v4159_v45 = vld [vmem:[#allocation107_spill] sm:$0xff]  ;;  %v4161_v1 = vld [vmem:[#allocation80_spill] sm:$0xff] }
 0x254   : > { %v1755_v53 = vadd.f32 %v3591_v49, %v1628_v9  ;;  %v1944_v46 = vcombine.low %v1817_v8, %v1818_v28  ;;  %v1756_v6 = vadd.f32 %v3597_v44, %v1629_v3  ;;  %v4156_v9 = vld [vmem:[#allocation77_spill] sm:$0xff]  ;;  %v4157_v8 = vld [vmem:[#allocation22_spill] sm:$0xff] }
 0x255   : > { %v1445_v41 = vpop.permute.xlu0 %1444  ;;  %v1447_v31 = vpop.permute.xlu1 %1446  ;;  %v1121_v58 = vadd.f32 %v4156_v9, %v2707_v4  ;;  %v4158_v28 = vld [vmem:[#allocation65_spill] sm:$0xff]  ;;  %v1376_v63 = vadd.f32 %v4159_v45, %v1120_v22  ;;  %v1123_v4 = vadd.f32 %v4161_v1, %v2719_v7  ;;  %v4163_v22 = vld [vmem:[#allocation123_spill] sm:$0xff]  ;;  %v4167_v1 = vld [vmem:[#allocation82_spill] sm:$0xff] }
 0x256   : > { %v1819_v39 = vmax.f32 %v1755_v53, 0.0  ;;  %v1630_v15 = vadd.f32 %v1445_v41, %v1374_v27  ;;  %v1631_v62 = vadd.f32 %v1447_v31, %v1375_v51  ;;  %v1820_v35 = vmax.f32 %v1756_v6, 0.0  ;;  %v4160_v53 = vld [vmem:[#allocation121_spill] sm:$0xff] }
 0x257   : > { %v1122_v3 = vadd.f32 %v4158_v28, %v4157_v8  ;;  %v1377_v27 = vadd.f32 %v4160_v53, %v1121_v58  ;;  %v1960_v51 = vrot.slane %v1944_v46, %v2579_v17  ;;  %v4162_v9 = vld [vmem:[#allocation109_spill] sm:$0xff]  ;;  %v1379_v28 = vadd.f32 %v4163_v22, %v1123_v4  ;;  %v4164_v46 = vld [vmem:[#allocation79_spill] sm:$0xff] }
 0x258   : > { %v1757_v13 = vadd.f32 %v3609_v59, %v1630_v15  ;;  %v1758_v30 = vadd.f32 %v3613_v10, %v1631_v62  ;;  %v1945_v43 = vcombine.low %v1819_v39, %v1820_v35  ;;  %v1953_v15 = vrot.slane %v1943_v34, %v2579_v17 }
 0x259   : > { %v1449_v41 = vpop.permute.xlu0 %1448  ;;  %v1451_v31 = vpop.permute.xlu1 %1450  ;;  %v1378_v8 = vadd.f32 %v4162_v9, %v1122_v3  ;;  %v1124_v45 = vadd.f32 %v4164_v46, %v2767_v19  ;;  %v1126_v4 = vadd.f32 %v4167_v1, %v2827_v38 }
 0x25a   : > { %v1821_v2 = vmax.f32 %v1757_v13, 0.0  ;;  %v1822_v6 = vmax.f32 %v1758_v30, 0.0  ;;  %v1632_v62 = vadd.f32 %v1449_v41, %v1376_v63  ;;  %v1633_v24 = vadd.f32 %v1451_v31, %v1377_v27  ;;  %v4165_v63 = vld [vmem:[#allocation97_spill] sm:$0xff]  ;;  %v4166_v27 = vld [vmem:[#allocation122_spill] sm:$0xff] }
 0x25b   : > { %v1975_v53 = vcombine.low %v1953_v15, %v1960_v51  ;;  %v1967_v7 = vrot.slane %v1945_v43, %v2579_v17  ;;  %v1125_v13 = vadd.f32 %v4165_v63, %v2771_v20  ;;  %v1380_v41 = vadd.f32 %v4166_v27, %v1124_v45  ;;  %v4169_v43 = vld [vmem:[#allocation128_spill] sm:$0xff] }
 0x25c   : > { %v1946_v58 = vcombine.low %v1821_v2, %v1822_v6  ;;  %v1759_v30 = vadd.f32 %v3555_v16, %v1632_v62  ;;  %v1760_v3 = vadd.f32 %v3558_v52, %v1633_v24 }
 0x25d   : > { %v1453_v61 = vpop.permute.xlu0 %1452  ;;  %v1455_v25 = vpop.permute.xlu1 %1454  ;;  %v1381_v20 = vadd.f32 %v4169_v43, %v1125_v13  ;;  %v1983_v2 = vrot.slane %v1975_v53, %v2579_v17 }
 0x25e   : > { %v1974_v39 = vrot.slane %v1946_v58, %v2579_v17  ;;  %v1634_v35 = vadd.f32 %v1453_v61, %v1378_v8  ;;  %v1635_v34 = vadd.f32 %v1455_v25, %v1379_v28  ;;  %v4168_v25 = vld [vmem:[#allocation101_spill] sm:$0xff]  ;;  %v1823_v38 = vmax.f32 %v1759_v30, 0.0  ;;  %v4170_v28 = vld [vmem:[#allocation124_spill] sm:$0xff] }
 0x25f   : > { %v1127_v61 = vadd.f32 %v4168_v25, %v2774_v21  ;;  %v1824_v21 = vmax.f32 %v1760_v3, 0.0  ;;  %v1382_v58 = vadd.f32 %v4170_v28, %v1126_v4  ;;  %v4171_v30 = vld [vmem:[#allocation105_spill] sm:$0xff]  ;;  %v4174_v25 = vld [vmem:[#allocation112_spill] sm:$0xff] }
 0x260   : > { %v1976_v19 = vcombine.low %v1967_v7, %v1974_v39  ;;  %v1761_v51 = vadd.f32 %v3570_v32, %v1634_v35  ;;  %v1762_v31 = vadd.f32 %v3574_v26, %v1635_v34  ;;  %v1129_v3 = vadd.f32 %v4171_v30, %v2911_v29 }
 0x261   : > { %v1457_v6 = vpop.permute.xlu0 %1456  ;;  %v1459_v15 = vpop.permute.xlu1 %1458  ;;  %v1383_v46 = vadd.f32 %v3343_v50, %v1127_v61  ;;  %v1992_v50 = vcombine.low %v1823_v38, %v1824_v21  ;;  %v1131_v61 = vadd.f32 %v4174_v25, %v2922_v33 }
 0x262   : > { %v1990_v62 = vrot.slane %v1976_v19, %v2579_v17  ;;  %v1825_v24 = vmax.f32 %v1761_v51, 0.0  ;;  %v1826_v9 = vmax.f32 %v1762_v31, 0.0  ;;  %v1636_v8 = vadd.f32 %v1457_v6, %v1380_v41  ;;  %v4172_v41 = vld [vmem:[#allocation30_spill] sm:$0xff]  ;;  %v4173_v19 = vld [vmem:[#allocation115_spill] sm:$0xff] }
 0x263   : > { %v1637_v22 = vadd.f32 %v1459_v15, %v1381_v20  ;;  %v1128_v51 = vadd.f32 %v4173_v19, %v4172_v41  ;;  %v1385_v43 = vadd.f32 %v3351_v0, %v1129_v3  ;;  %v4175_v15 = vld [vmem:[#allocation28_spill] sm:$0xff]  ;;  %v2002_v21 = vrot.slane %v1992_v50, %v2579_v17  ;;  %v4179_v19 = vld [vmem:[#allocation125_spill] sm:$0xff] }
 0x264   : > { %v1991_v45 = vcombine.low %v1983_v2, %v1990_v62  ;;  %v1763_v53 = vadd.f32 %v3591_v49, %v1636_v8  ;;  %v1993_v7 = vcombine.low %v1825_v24, %v1826_v9  ;;  %v4176_v62 = vld [vmem:[#allocation118_spill] sm:$0xff]  ;;  %v1387_v33 = vadd.f32 %v3367_v36, %v1131_v61  ;;  %v4180_v50 = vld [vmem:[#allocation36_spill] sm:$0xff] }
 0x265   : > { %v1764_v39 = vadd.f32 %v3597_v44, %v1637_v22  ;;  %v1461_v35 = vpop.permute.xlu0 %1460  ;;  %v1463_v34 = vpop.permute.xlu1 %1462  ;;  %v1384_v20 = vadd.f32 %v3369_v48, %v1128_v51  ;;  %v1130_v24 = vadd.f32 %v4176_v62, %v4175_v15  ;;  %v4177_v48 = vld [vmem:[#allocation126_spill] sm:$0xff]  ;;  %v1135_v51 = vadd.f32 %v4179_v19, %v2987_v60  ;;  %v4189_v19 = vld [vmem:[#allocation61_spill] sm:$0xff] }
 0x266   : > { %2344 = vst.msk [vmem:[%s3654_s28] sm:$0xff] %vm2343_vm3, %v1991_v45  ;;  %v1827_v63 = vmax.f32 %v1763_v53, 0.0  ;;  %v1638_v13 = vadd.f32 %v1461_v35, %v1382_v58  ;;  %v1639_v27 = vadd.f32 %v1463_v34, %v1383_v46  ;;  %v2009_v2 = vrot.slane %v1993_v7, %v2579_v17 }
 0x267   : > { %v1828_v31 = vmax.f32 %v1764_v39, 0.0  ;;  %v1386_v0 = vadd.f32 %v3377_v40, %v1130_v24  ;;  %v1132_v46 = vadd.f32 %v4177_v48, %v2888_v5  ;;  %v1391_v24 = vadd.f32 %v3401_v57, %v1135_v51 }
 0x268   : > { %v1765_v1 = vadd.f32 %v3609_v59, %v1638_v13  ;;  %v1766_v4 = vadd.f32 %v3613_v10, %v1639_v27  ;;  %v2024_v45 = vcombine.low %v2002_v21, %v2009_v2  ;;  %v4178_v13 = vld [vmem:[#allocation114_spill] sm:$0xff] }
 0x269   : > { %v1465_v6 = vpop.permute.xlu0 %1464  ;;  %v1467_v29 = vpop.permute.xlu1 %1466  ;;  %v1994_v9 = vcombine.low %v1827_v63, %v1828_v31  ;;  %v1133_v27 = vadd.f32 %v4178_v13, %v2975_v37  ;;  %v1388_v30 = vadd.f32 %v3391_v12, %v1132_v46  ;;  %v4181_v31 = vld [vmem:[#allocation129_spill] sm:$0xff]  ;;  %v4187_v13 = vld [vmem:[#allocation63_spill] sm:$0xff] }
 0x26a   : > { %v1829_v8 = vmax.f32 %v1765_v1, 0.0  ;;  %v1830_v38 = vmax.f32 %v1766_v4, 0.0  ;;  %v1640_v22 = vadd.f32 %v1465_v6, %v1384_v20  ;;  %v1641_v28 = vadd.f32 %v1467_v29, %v1385_v43  ;;  %v4182_v4 = vld [vmem:[#allocation134_spill] sm:$0xff] }
 0x26b   : > { %v2016_v39 = vrot.slane %v1994_v9, %v2579_v17  ;;  %v1134_v1 = vadd.f32 %v4181_v31, %v4180_v50  ;;  %v1389_v25 = vadd.f32 %v4182_v4, %v1133_v27  ;;  %v2032_v37 = vrot.slane %v2024_v45, %v2579_v17  ;;  %v4188_v27 = vld [vmem:[#allocation131_spill] sm:$0xff] }
 0x26c   : > { %v1995_v58 = vcombine.low %v1829_v8, %v1830_v38  ;;  %v1767_v36 = vadd.f32 %v3555_v16, %v1640_v22  ;;  %v1768_v40 = vadd.f32 %v3558_v52, %v1641_v28 }
 0x26d   : > { %v1469_v53 = vpop.permute.xlu0 %1468  ;;  %v1471_v7 = vpop.permute.xlu1 %1470  ;;  %v1390_v60 = vadd.f32 %v3399_v14, %v1134_v1  ;;  %v4185_v14 = vld [vmem:[#allocation132_spill] sm:$0xff] }
 0x26e   : > { %v2023_v35 = vrot.slane %v1995_v58, %v2579_v17  ;;  %v1642_v34 = vadd.f32 %v1469_v53, %v1386_v0  ;;  %v1643_v63 = vadd.f32 %v1471_v7, %v1387_v33  ;;  %v1831_v29 = vmax.f32 %v1767_v36, 0.0  ;;  %v4183_v33 = vld [vmem:[#allocation68_spill] sm:$0xff]  ;;  %v4184_v0 = vld [vmem:[#allocation130_spill] sm:$0xff] }
 0x26f   : > { %v1832_v15 = vmax.f32 %v1768_v40, 0.0  ;;  %v1136_v58 = vadd.f32 %v4184_v0, %v4183_v33  ;;  %v1137_v53 = vadd.f32 %v4185_v14, %v2998_v54  ;;  %v1138_v36 = vadd.f32 %v4188_v27, %v4187_v13  ;;  %v4190_v54 = vld [vmem:[#allocation135_spill] sm:$0xff] }
 0x270   : > { %v2025_v3 = vcombine.low %v2016_v39, %v2023_v35  ;;  %v1769_v5 = vadd.f32 %v3570_v32, %v1642_v34  ;;  %v1770_v41 = vadd.f32 %v3574_v26, %v1643_v63  ;;  %v4186_v39 = vld [vmem:[#allocation138_spill] sm:$0xff]  ;;  %v1139_v51 = vadd.f32 %v4190_v54, %v4189_v19 }
 0x271   : > { %v1473_v61 = vpop.permute.xlu0 %1472  ;;  %v1475_v43 = vpop.permute.xlu1 %1474  ;;  %v2041_v57 = vcombine.low %v1831_v29, %v1832_v15  ;;  %v1392_v35 = vadd.f32 %v4186_v39, %v1136_v58  ;;  %v1393_v40 = vadd.f32 %v3427_v18, %v1137_v53 }
 0x272   : > { %v2039_v20 = vrot.slane %v2025_v3, %v2579_v17  ;;  %v1833_v12 = vmax.f32 %v1769_v5, 0.0  ;;  %v1834_v2 = vmax.f32 %v1770_v41, 0.0  ;;  %v1644_v6 = vadd.f32 %v1473_v61, %v1388_v30 }
 0x273   : > { %v1645_v62 = vadd.f32 %v1475_v43, %v1389_v25  ;;  %v2051_v4 = vrot.slane %v2041_v57, %v2579_v17  ;;  %v1395_v61 = vadd.f32 %v3449_v56, %v1139_v51  ;;  %v4194_v56 = vld [vmem:[#allocation137_spill] sm:$0xff] }
 0x274   : > { %v2040_v9 = vcombine.low %v2032_v37, %v2039_v20  ;;  %v1771_v8 = vadd.f32 %v3591_v49, %v1644_v6  ;;  %v2042_v38 = vcombine.low %v1833_v12, %v1834_v2  ;;  %v1394_v37 = vadd.f32 %v3417_v55, %v1138_v36  ;;  %v4191_v20 = vld [vmem:[#allocation73_spill] sm:$0xff] }
 0x275   : > { %v1772_v21 = vadd.f32 %v3597_v44, %v1645_v62  ;;  %v1477_v22 = vpop.permute.xlu0 %1476  ;;  %v1479_v28 = vpop.permute.xlu1 %1478  ;;  %v4192_v12 = vld [vmem:[#allocation133_spill] sm:$0xff] }
 0x276   : > { %2345 = vst.msk [vmem:[%s3654_s28 + $0x8] sm:$0xff] %vm2343_vm3, %v2040_v9  ;;  %v1835_v48 = vmax.f32 %v1771_v8, 0.0  ;;  %v1646_v46 = vadd.f32 %v1477_v22, %v1390_v60  ;;  %v1647_v45 = vadd.f32 %v1479_v28, %v1391_v24  ;;  %v2058_v30 = vrot.slane %v2042_v38, %v2579_v17  ;;  %v4193_v38 = vld [vmem:[#allocation62_spill] sm:$0xff] }
 0x277   : > { %v1836_v7 = vmax.f32 %v1772_v21, 0.0  ;;  %v1140_v2 = vadd.f32 %v4192_v12, %v4191_v20  ;;  %v1141_v21 = vadd.f32 %v4194_v56, %v4193_v38  ;;  %v4204_v56 = vld [vmem:[#allocation92_spill] sm:$0xff] }
 0x278   : > { %v1773_v34 = vadd.f32 %v3609_v59, %v1646_v46  ;;  %v1774_v63 = vadd.f32 %v3613_v10, %v1647_v45  ;;  %v2073_v6 = vcombine.low %v2051_v4, %v2058_v30  ;;  %v4196_v46 = vld [vmem:[#allocation136_spill] sm:$0xff] }
 0x279   : > { %v2043_v3 = vcombine.low %v1835_v48, %v1836_v7  ;;  %v1481_v5 = vpop.permute.xlu0 %1480  ;;  %v1483_v41 = vpop.permute.xlu1 %1482  ;;  %v1396_v28 = vadd.f32 %v3425_v23, %v1140_v2  ;;  %v4195_v48 = vld [vmem:[#allocation74_spill] sm:$0xff]  ;;  %v1397_v14 = vadd.f32 %v3457_v47, %v1141_v21  ;;  %v4205_v21 = vld [vmem:[#allocation140_spill] sm:$0xff] }
 0x27a   : > { %v1837_v50 = vmax.f32 %v1773_v34, 0.0  ;;  %v1838_v31 = vmax.f32 %v1774_v63, 0.0  ;;  %v1648_v1 = vadd.f32 %v1481_v5, %v1392_v35  ;;  %v1649_v25 = vadd.f32 %v1483_v41, %v1393_v40 }
 0x27b   : > { %v2065_v29 = vrot.slane %v2043_v3, %v2579_v17  ;;  %v1142_v45 = vadd.f32 %v4196_v46, %v4195_v48  ;;  %v2081_v53 = vrot.slane %v2073_v6, %v2579_v17  ;;  %v4199_v6 = vld [vmem:[#allocation146_spill] sm:$0xff] }
 0x27c   : > { %v2044_v43 = vcombine.low %v1837_v50, %v1838_v31  ;;  %v1775_v18 = vadd.f32 %v3555_v16, %v1648_v1  ;;  %v1776_v15 = vadd.f32 %v3558_v52, %v1649_v25  ;;  %v4198_v1 = vld [vmem:[#allocation139_spill] sm:$0xff] }
 0x27d   : > { %v1485_v62 = vpop.permute.xlu0 %1484  ;;  %v1487_v60 = vpop.permute.xlu1 %1486  ;;  %v1398_v27 = vadd.f32 %v3447_v42, %v1142_v45  ;;  %v4197_v42 = vld [vmem:[#allocation90_spill] sm:$0xff]  ;;  %v4206_v45 = vld [vmem:[#allocation148_spill] sm:$0xff] }
 0x27e   : > { %v2072_v24 = vrot.slane %v2044_v43, %v2579_v17  ;;  %v1839_v9 = vmax.f32 %v1775_v18, 0.0  ;;  %v1650_v8 = vadd.f32 %v1485_v62, %v1394_v37  ;;  %v1651_v55 = vadd.f32 %v1487_v60, %v1395_v61  ;;  %v4201_v60 = vld [vmem:[#allocation83_spill] sm:$0xff] }
 0x27f   : > { %v1840_v22 = vmax.f32 %v1776_v15, 0.0  ;;  %v1147_v4 = vadd.f32 %v4198_v1, %v4197_v42  ;;  %v4200_v15 = vld [vmem:[#allocation145_spill] sm:$0xff] }
 0x280   : > { %v2074_v33 = vcombine.low %v2065_v29, %v2072_v24  ;;  %v1777_v0 = vadd.f32 %v3570_v32, %v1650_v8  ;;  %v1778_v58 = vadd.f32 %v3574_v26, %v1651_v55  ;;  %v4203_v55 = vld [vmem:[#allocation31_spill] sm:$0xff] }
 0x281   : > { %v2090_v57 = vcombine.low %v1839_v9, %v1840_v22  ;;  %v1489_v7 = vpop.permute.xlu0 %1488  ;;  %v1491_v39 = vpop.permute.xlu1 %1490  ;;  %v1403_v38 = vadd.f32 %v4203_v55, %v1147_v4  ;;  %v1149_v22 = vadd.f32 %v4205_v21, %v4204_v56  ;;  %v4213_v4 = vld [vmem:[#allocation50_spill] sm:$0xff] }
 0x282   : > { %v2088_v35 = vrot.slane %v2074_v33, %v2579_v17  ;;  %v1841_v34 = vmax.f32 %v1777_v0, 0.0  ;;  %v1842_v23 = vmax.f32 %v1778_v58, 0.0  ;;  %v1652_v63 = vadd.f32 %v1489_v7, %v1396_v28  ;;  %v4208_v7 = vld [vmem:[#allocation142_spill] sm:$0xff] }
 0x283   : > { %v1653_v13 = vadd.f32 %v1491_v39, %v1397_v14  ;;  %v2100_v47 = vrot.slane %v2090_v57, %v2579_v17  ;;  %v4207_v57 = vld [vmem:[#allocation99_spill] sm:$0xff] }
 0x284   : > { %v2089_v36 = vcombine.low %v2081_v53, %v2088_v35  ;;  %v2091_v40 = vcombine.low %v1841_v34, %v1842_v23  ;;  %v1779_v30 = vadd.f32 %v3591_v49, %v1652_v63  ;;  %v1151_v39 = vadd.f32 %v4208_v7, %v4207_v57  ;;  %v4209_v35 = vld [vmem:[#allocation91_spill] sm:$0xff] }
 0x285   : > { %v1780_v3 = vadd.f32 %v3597_v44, %v1653_v13  ;;  %v1493_v5 = vpop.permute.xlu0 %1492  ;;  %v1495_v41 = vpop.permute.xlu1 %1494  ;;  %v4210_v34 = vld [vmem:[#allocation143_spill] sm:$0xff] }
 0x286   : > { %2346 = vst.msk [vmem:[%s3654_s28 + $0x10] sm:$0xff] %vm2343_vm3, %v2089_v36  ;;  %v2107_v19 = vrot.slane %v2091_v40, %v2579_v17  ;;  %v1843_v54 = vmax.f32 %v1779_v30, 0.0  ;;  %v1654_v51 = vadd.f32 %v1493_v5, %v1398_v27  ;;  %v1655_v50 = vadd.f32 %v1495_v41, %v3466_v11  ;;  %v4202_v11 = vld [vmem:[#allocation141_spill] sm:$0xff]  ;;  %v4212_v41 = vld [vmem:[#allocation40_spill] sm:$0xff]  ;;  %v4222_v57 = vld [vmem:[#allocation71_spill] sm:$0xff] }
 0x287   : > { %v1844_v31 = vmax.f32 %v1780_v3, 0.0  ;;  %v1148_v24 = vadd.f32 %v4202_v11, %v4201_v60  ;;  %v1150_v23 = vadd.f32 %v4210_v34, %v4209_v35  ;;  %v4211_v40 = vld [vmem:[#allocation45_spill] sm:$0xff]  ;;  %v4223_v35 = vld [vmem:[#allocation2_spill] sm:$0xff] }
 0x288   : > { %v2122_v25 = vcombine.low %v2100_v47, %v2107_v19  ;;  %v1781_v37 = vadd.f32 %v3609_v59, %v1654_v51  ;;  %v1782_v61 = vadd.f32 %v3613_v10, %v1655_v50  ;;  %v1405_v19 = vadd.f32 %v4212_v41, %v1149_v22  ;;  %v4224_v34 = vld [vmem:[#allocation38_spill] sm:$0xff] }
 0x289   : > { %v2092_v43 = vcombine.low %v1843_v54, %v1844_v31  ;;  %v1497_v18 = vpop.permute.xlu0 %1496  ;;  %v1499_v20 = vpop.permute.xlu1 %1498  ;;  %v1404_v30 = vadd.f32 %v4211_v40, %v1148_v24  ;;  %v4225_v40 = vld [vmem:[#allocation55_spill] sm:$0xff] }
 0x28a   : > { %v1845_v12 = vmax.f32 %v1781_v37, 0.0  ;;  %v1846_v2 = vmax.f32 %v1782_v61, 0.0  ;;  %v1656_v29 = vadd.f32 %v1497_v18, %v4199_v6  ;;  %v1657_v62 = vadd.f32 %v1499_v20, %v4200_v15  ;;  %v4214_v61 = vld [vmem:[#allocation44_spill] sm:$0xff]  ;;  %v4215_v18 = vld [vmem:[#allocation103_spill] sm:$0xff] }
 0x28b   : > { %v2114_v28 = vrot.slane %v2092_v43, %v2579_v17  ;;  %v2130_v47 = vrot.slane %v2122_v25, %v2579_v17  ;;  %v1406_v37 = vadd.f32 %v4213_v4, %v1150_v23  ;;  %v1407_v43 = vadd.f32 %v4214_v61, %v1151_v39  ;;  %v4216_v20 = vld [vmem:[#allocation144_spill] sm:$0xff]  ;;  %v4218_v15 = vld [vmem:[#allocation147_spill] sm:$0xff] }
 0x28c   : > { %v2093_v9 = vcombine.low %v1845_v12, %v1846_v2  ;;  %v1783_v8 = vadd.f32 %v3555_v16, %v1656_v29  ;;  %v1784_v33 = vadd.f32 %v3558_v52, %v1657_v62  ;;  %v1152_v12 = vadd.f32 %v4216_v20, %v4215_v18  ;;  %v4217_v29 = vld [vmem:[#allocation102_spill] sm:$0xff]  ;;  %v4229_v18 = vld [vmem:[#allocation13_spill] sm:$0xff]  ;;  %v4230_v20 = vld [vmem:[#allocation43_spill] sm:$0xff] }
 0x28d   : > { %v1501_v0 = vpop.permute.xlu0 %1500  ;;  %v1503_v58 = vpop.permute.xlu1 %1502  ;;  %v1153_v62 = vadd.f32 %v4218_v15, %v4217_v29  ;;  %v1155_v23 = vadd.f32 %v4224_v34, %v4223_v35  ;;  %v4233_v15 = vld [vmem:[#allocation76_spill] sm:$0xff] }
 0x28e   : > { %v2121_v48 = vrot.slane %v2093_v9, %v2579_v17  ;;  %v1847_v46 = vmax.f32 %v1783_v8, 0.0  ;;  %v1658_v14 = vadd.f32 %v1501_v0, %v4206_v45  ;;  %v1659_v53 = vadd.f32 %v1503_v58, %v1403_v38  ;;  %v4219_v0 = vld [vmem:[#allocation52_spill] sm:$0xff] }
 0x28f   : > { %v1848_v63 = vmax.f32 %v1784_v33, 0.0  ;;  %v1408_v58 = vadd.f32 %v4219_v0, %v1152_v12  ;;  %v1409_v7 = vadd.f32 %v4222_v57, %v1153_v62  ;;  %v1158_v12 = vadd.f32 %v4230_v20, %v4229_v18 }
 0x290   : > { %v2123_v13 = vcombine.low %v2114_v28, %v2121_v48  ;;  %v1785_v27 = vadd.f32 %v3570_v32, %v1658_v14  ;;  %v1786_v36 = vadd.f32 %v3574_v26, %v1659_v53  ;;  %v4220_v48 = vld [vmem:[#allocation106_spill] sm:$0xff] }
 0x291   : > { %v2139_v3 = vcombine.low %v1847_v46, %v1848_v63  ;;  %v1505_v5 = vpop.permute.xlu0 %1504  ;;  %v1507_v54 = vpop.permute.xlu1 %1506  ;;  %v4221_v46 = vld [vmem:[#allocation32_spill] sm:$0xff] }
 0x292   : > { %v2137_v51 = vrot.slane %v2123_v13, %v2579_v17  ;;  %v1849_v50 = vmax.f32 %v1785_v27, 0.0  ;;  %v1850_v31 = vmax.f32 %v1786_v36, 0.0  ;;  %v1660_v42 = vadd.f32 %v1505_v5, %v1404_v30 }
 0x293   : > { %v1661_v1 = vadd.f32 %v1507_v54, %v1405_v19  ;;  %v2149_v60 = vrot.slane %v2139_v3, %v2579_v17  ;;  %v1154_v45 = vadd.f32 %v4221_v46, %v4220_v48  ;;  %v4227_v19 = vld [vmem:[#allocation6_spill] sm:$0xff]  ;;  %v4228_v54 = vld [vmem:[#allocation39_spill] sm:$0xff] }
 0x294   : > { %v2138_v25 = vcombine.low %v2130_v47, %v2137_v51  ;;  %v2140_v2 = vcombine.low %v1849_v50, %v1850_v31  ;;  %v1787_v6 = vadd.f32 %v3591_v49, %v1660_v42  ;;  %v4226_v47 = vld [vmem:[#allocation75_spill] sm:$0xff]  ;;  %v1156_v51 = vadd.f32 %v4228_v54, %v4227_v19 }
 0x295   : > { %v1788_v11 = vadd.f32 %v3597_v44, %v1661_v1  ;;  %v1509_v24 = vpop.permute.xlu0 %1508  ;;  %v1511_v9 = vpop.permute.xlu1 %1510  ;;  %v1410_v30 = vadd.f32 %v4225_v40, %v1154_v45  ;;  %v1411_v3 = vadd.f32 %v4226_v47, %v1155_v23  ;;  %v4240_v47 = vld [vmem:[#allocation58_spill] sm:$0xff] }
 0x296   : > { %2347 = vst.msk [vmem:[%s3654_s28 + $0x18] sm:$0xff] %vm2343_vm3, %v2138_v25  ;;  %v2156_v8 = vrot.slane %v2140_v2, %v2579_v17  ;;  %v1851_v55 = vmax.f32 %v1787_v6, 0.0  ;;  %v1662_v38 = vadd.f32 %v1509_v24, %v1406_v37  ;;  %v1663_v56 = vadd.f32 %v1511_v9, %v1407_v43  ;;  %v4231_v25 = vld [vmem:[#allocation8_spill] sm:$0xff]  ;;  %v4232_v2 = vld [vmem:[#allocation53_spill] sm:$0xff] }
 0x297   : > { %v1852_v21 = vmax.f32 %v1788_v11, 0.0  ;;  %v1157_v6 = vadd.f32 %v4232_v2, %v4231_v25  ;;  %v1412_v62 = vadd.f32 %v4233_v15, %v1156_v51  ;;  %v4234_v9 = vld [vmem:[#allocation9_spill] sm:$0xff]  ;;  %v4247_v25 = vld [vmem:[#allocation15_spill] sm:$0xff]  ;;  %v4248_v2 = vld [vmem:[#allocation70_spill] sm:$0xff] }
 0x298   : > { %v2171_v22 = vcombine.low %v2149_v60, %v2156_v8  ;;  %v1789_v28 = vadd.f32 %v3609_v59, %v1662_v38  ;;  %v1790_v33 = vadd.f32 %v3613_v10, %v1663_v56  ;;  %v4235_v8 = vld [vmem:[#allocation56_spill] sm:$0xff] }
 0x299   : > { %v2141_v14 = vcombine.low %v1851_v55, %v1852_v21  ;;  %v1513_v53 = vpop.permute.xlu0 %1512  ;;  %v1515_v39 = vpop.permute.xlu1 %1514  ;;  %v1159_v55 = vadd.f32 %v4235_v8, %v4234_v9  ;;  %v4236_v38 = vld [vmem:[#allocation88_spill] sm:$0xff]  ;;  %v4249_v9 = vld [vmem:[#allocation110_spill] sm:$0xff] }
 0x29a   : > { %v1853_v63 = vmax.f32 %v1789_v28, 0.0  ;;  %v1854_v13 = vmax.f32 %v1790_v33, 0.0  ;;  %v1664_v27 = vadd.f32 %v1513_v53, %v1408_v58  ;;  %v1665_v36 = vadd.f32 %v1515_v39, %v1409_v7  ;;  %v4237_v53 = vld [vmem:[#allocation78_spill] sm:$0xff]  ;;  %v4238_v7 = vld [vmem:[#allocation93_spill] sm:$0xff] }
 0x29b   : > { %v2163_v50 = vrot.slane %v2141_v14, %v2579_v17  ;;  %v1413_v56 = vadd.f32 %v4236_v38, %v1157_v6  ;;  %v2179_v21 = vrot.slane %v2171_v22, %v2579_v17  ;;  %v1414_v57 = vadd.f32 %v4237_v53, %v1158_v12 }
 0x29c   : > { %v2142_v5 = vcombine.low %v1853_v63, %v1854_v13  ;;  %v1791_v41 = vadd.f32 %v3555_v16, %v1664_v27  ;;  %v1792_v31 = vadd.f32 %v3558_v52, %v1665_v36  ;;  %v1415_v39 = vadd.f32 %v4238_v7, %v1159_v55  ;;  %v4250_v55 = vld [vmem:[#allocation113_spill] sm:$0xff]  ;;  %v4254_v7 = vld [vmem:[#allocation64_spill] sm:$0xff] }
 0x29d   : > { %v1517_v42 = vpop.permute.xlu0 %1516  ;;  %v1519_v1 = vpop.permute.xlu1 %1518  ;;  %v1162_v6 = vadd.f32 %v4248_v2, %v4247_v25 }
 0x29e   : > { %v2170_v4 = vrot.slane %v2142_v5, %v2579_v17  ;;  %v1855_v37 = vmax.f32 %v1791_v41, 0.0  ;;  %v1666_v61 = vadd.f32 %v1517_v42, %v1410_v30  ;;  %v1667_v43 = vadd.f32 %v1519_v1, %v1411_v3  ;;  %v4239_v30 = vld [vmem:[#allocation19_spill] sm:$0xff]  ;;  %v4241_v5 = vld [vmem:[#allocation14_spill] sm:$0xff] }
 0x29f   : > { %v1856_v29 = vmax.f32 %v1792_v31, 0.0  ;;  %v1161_v3 = vadd.f32 %v4240_v47, %v4239_v30  ;;  %v4242_v41 = vld [vmem:[#allocation67_spill] sm:$0xff]  ;;  %v4243_v31 = vld [vmem:[#allocation20_spill] sm:$0xff]  ;;  %v1418_v38 = vadd.f32 %v4250_v55, %v1162_v6  ;;  %v4258_v47 = vld [vmem:[#allocation18_spill] sm:$0xff] }
 0x2a0   : > { %v2172_v60 = vcombine.low %v2163_v50, %v2170_v4  ;;  %v1793_v11 = vadd.f32 %v3570_v32, %v1666_v61  ;;  %v1794_v24 = vadd.f32 %v3574_v26, %v1667_v43  ;;  %v1160_v19 = vadd.f32 %v4242_v41, %v4241_v5  ;;  %v4244_v42 = vld [vmem:[#allocation59_spill] sm:$0xff]  ;;  %v4260_v41 = vld [vmem:[#allocation150_spill] sm:$0xff] }
 0x2a1   : > { %v2188_v28 = vcombine.low %v1855_v37, %v1856_v29  ;;  %v1521_v33 = vpop.permute.xlu0 %1520  ;;  %v1523_v0 = vpop.permute.xlu1 %1522  ;;  %v1163_v1 = vadd.f32 %v4244_v42, %v4243_v31  ;;  %v4245_v4 = vld [vmem:[#allocation95_spill] sm:$0xff] }
 0x2a2   : > { %v2186_v58 = vrot.slane %v2172_v60, %v2579_v17  ;;  %v1857_v48 = vmax.f32 %v1793_v11, 0.0  ;;  %v1858_v46 = vmax.f32 %v1794_v24, 0.0  ;;  %v1668_v45 = vadd.f32 %v1521_v33, %v1412_v62  ;;  %v4246_v61 = vld [vmem:[#allocation111_spill] sm:$0xff]  ;;  %v4252_v33 = vld [vmem:[#allocation85_spill] sm:$0xff] }
 0x2a3   : > { %v1669_v14 = vadd.f32 %v1523_v0, %v1413_v56  ;;  %v1417_v37 = vadd.f32 %v4245_v4, %v1161_v3  ;;  %v1416_v43 = vadd.f32 %v4246_v61, %v1160_v19  ;;  %v2198_v60 = vrot.slane %v2188_v28, %v2579_v17  ;;  %v4253_v28 = vld [vmem:[#allocation23_spill] sm:$0xff] }
 0x2a4   : > { %v2187_v35 = vcombine.low %v2179_v21, %v2186_v58  ;;  %v1795_v34 = vadd.f32 %v3591_v49, %v1668_v45  ;;  %v2189_v23 = vcombine.low %v1857_v48, %v1858_v46  ;;  %v1419_v8 = vadd.f32 %v4249_v9, %v1163_v1  ;;  %v4251_v21 = vld [vmem:[#allocation17_spill] sm:$0xff]  ;;  %v4259_v3 = vld [vmem:[#allocation87_spill] sm:$0xff] }
 0x2a5   : > { %v1796_v22 = vadd.f32 %v3597_v44, %v1669_v14  ;;  %v1525_v63 = vpop.permute.xlu0 %1524  ;;  %v1527_v13 = vpop.permute.xlu1 %1526  ;;  %v1164_v0 = vadd.f32 %v4252_v33, %v4251_v21  ;;  %v1166_v5 = vadd.f32 %v4259_v3, %v4258_v47  ;;  %v4266_v21 = vld [vmem:[#allocation108_spill] sm:$0xff] }
 0x2a6   : > { %2348 = vst.msk [vmem:[%s3654_s28 + $0x20] sm:$0xff] %vm2343_vm3, %v2187_v35  ;;  %v1859_v27 = vmax.f32 %v1795_v34, 0.0  ;;  %v1670_v36 = vadd.f32 %v1525_v63, %v1414_v57  ;;  %v1671_v40 = vadd.f32 %v1527_v13, %v1415_v39  ;;  %v2205_v18 = vrot.slane %v2189_v23, %v2579_v17  ;;  %v4255_v23 = vld [vmem:[#allocation149_spill] sm:$0xff] }
 0x2a7   : > { %v1860_v54 = vmax.f32 %v1796_v22, 0.0  ;;  %v1165_v39 = vadd.f32 %v4254_v7, %v4253_v28  ;;  %v1420_v22 = vadd.f32 %v4255_v23, %v1164_v0  ;;  %v4270_v7 = vld [vmem:[#allocation154_spill] sm:$0xff] }
 0x2a8   : > { %v1797_v51 = vadd.f32 %v3609_v59, %v1670_v36  ;;  %v1798_v50 = vadd.f32 %v3613_v10, %v1671_v40  ;;  %v2220_v58 = vcombine.low %v2198_v60, %v2205_v18  ;;  %v4256_v36 = vld [vmem:[#allocation24_spill] sm:$0xff]  ;;  %v4257_v40 = vld [vmem:[#allocation81_spill] sm:$0xff]  ;;  %v4261_v18 = vld [vmem:[#allocation151_spill] sm:$0xff] }
 0x2a9   : > { %v1529_v20 = vpop.permute.xlu0 %1528  ;;  %v1531_v12 = vpop.permute.xlu1 %1530  ;;  %v2190_v29 = vcombine.low %v1859_v27, %v1860_v54  ;;  %v1167_v30 = vadd.f32 %v4257_v40, %v4256_v36  ;;  %v1421_v19 = vadd.f32 %v4260_v41, %v1165_v39 }
 0x2aa   : > { %v1861_v15 = vmax.f32 %v1797_v51, 0.0  ;;  %v1862_v62 = vmax.f32 %v1798_v50, 0.0  ;;  %v1672_v11 = vadd.f32 %v1529_v20, %v1416_v43  ;;  %v1673_v24 = vadd.f32 %v1531_v12, %v1417_v37  ;;  %v4262_v12 = vld [vmem:[#allocation152_spill] sm:$0xff] }
 0x2ab   : > { %v2212_v45 = vrot.slane %v2190_v29, %v2579_v17  ;;  %v2228_v54 = vrot.slane %v2220_v58, %v2579_v17  ;;  %v1422_v20 = vadd.f32 %v4261_v18, %v1166_v5  ;;  %v1423_v25 = vadd.f32 %v4262_v12, %v1167_v30  ;;  %v4273_v5 = vld [vmem:[#allocation155_spill] sm:$0xff] }
 0x2ac   : > { %v2191_v56 = vcombine.low %v1861_v15, %v1862_v62  ;;  %v1799_v35 = vadd.f32 %v3555_v16, %v1672_v11  ;;  %v1800_v34 = vadd.f32 %v3558_v52, %v1673_v24  ;;  %v4263_v11 = vld [vmem:[#allocation35_spill] sm:$0xff]  ;;  %v4264_v24 = vld [vmem:[#allocation89_spill] sm:$0xff] }
 0x2ad   : > { %v1533_v48 = vpop.permute.xlu0 %1532  ;;  %v1535_v46 = vpop.permute.xlu1 %1534  ;;  %v1168_v9 = vadd.f32 %v4264_v24, %v4263_v11  ;;  %v4281_v24 = vld [vmem:[#allocation157_spill] sm:$0xff] }
 0x2ae   : > { %v2219_v14 = vrot.slane %v2191_v56, %v2579_v17  ;;  %v1674_v53 = vadd.f32 %v1533_v48, %v1418_v38  ;;  %v1675_v57 = vadd.f32 %v1535_v46, %v1419_v8  ;;  %v1863_v37 = vmax.f32 %v1799_v35, 0.0  ;;  %v4265_v56 = vld [vmem:[#allocation25_spill] sm:$0xff] }
 0x2af   : > { %v1864_v61 = vmax.f32 %v1800_v34, 0.0  ;;  %v1169_v33 = vadd.f32 %v4266_v21, %v4265_v56  ;;  %v4267_v48 = vld [vmem:[#allocation153_spill] sm:$0xff]  ;;  %v4283_v56 = vld [vmem:[#allocation127_spill] sm:$0xff] }
 0x2b0   : > { %v2221_v63 = vcombine.low %v2212_v45, %v2219_v14  ;;  %v1801_v13 = vadd.f32 %v3570_v32, %v1674_v53  ;;  %v1802_v27 = vadd.f32 %v3574_v26, %v1675_v57  ;;  %v1424_v46 = vadd.f32 %v4267_v48, %v1168_v9  ;;  %v4268_v53 = vld [vmem:[#allocation29_spill] sm:$0xff]  ;;  %v4269_v57 = vld [vmem:[#allocation98_spill] sm:$0xff] }
 0x2b1   : > { %v1537_v51 = vpop.permute.xlu0 %1536  ;;  %v1539_v50 = vpop.permute.xlu1 %1538  ;;  %v2237_v0 = vcombine.low %v1863_v37, %v1864_v61  ;;  %v1170_v28 = vadd.f32 %v4269_v57, %v4268_v53  ;;  %v1425_v39 = vadd.f32 %v4270_v7, %v1169_v33  ;;  %v4284_v33 = vld [vmem:[#allocation158_spill] sm:$0xff] }
 0x2b2   : > { %v2235_v31 = vrot.slane %v2221_v63, %v2579_v17  ;;  %v1865_v42 = vmax.f32 %v1801_v13, 0.0  ;;  %v1866_v1 = vmax.f32 %v1802_v27, 0.0  ;;  %v1676_v4 = vadd.f32 %v1537_v51, %v1420_v22  ;;  %v4271_v63 = vld [vmem:[#allocation26_spill] sm:$0xff]  ;;  %v4272_v13 = vld [vmem:[#allocation116_spill] sm:$0xff] }
 0x2b3   : > { %v1677_v43 = vadd.f32 %v1539_v50, %v1421_v19  ;;  %v1171_v27 = vadd.f32 %v4272_v13, %v4271_v63  ;;  %v2247_v47 = vrot.slane %v2237_v0, %v2579_v17  ;;  %v1426_v41 = vadd.f32 %v4273_v5, %v1170_v28  ;;  %v4274_v19 = vld [vmem:[#allocation156_spill] sm:$0xff]  ;;  %v4285_v7 = vld [vmem:[#allocation54_spill] sm:$0xff] }
 0x2b4   : > { %v2236_v2 = vcombine.low %v2228_v54, %v2235_v31  ;;  %v1803_v6 = vadd.f32 %v3591_v49, %v1676_v4  ;;  %v2238_v29 = vcombine.low %v1865_v42, %v1866_v1  ;;  %v4275_v31 = vld [vmem:[#allocation41_spill] sm:$0xff]  ;;  %v4276_v42 = vld [vmem:[#allocation100_spill] sm:$0xff] }
 0x2b5   : > { %v1804_v15 = vadd.f32 %v3597_v44, %v1677_v43  ;;  %v1541_v62 = vpop.permute.xlu0 %1540  ;;  %v1543_v60 = vpop.permute.xlu1 %1542  ;;  %v1427_v54 = vadd.f32 %v4274_v19, %v1171_v27  ;;  %v1172_v1 = vadd.f32 %v4276_v42, %v4275_v31 }
 0x2b6   : > { %2349 = vst.msk [vmem:[%s3654_s28 + $0x28] sm:$0xff] %vm2343_vm3, %v2236_v2  ;;  %v1867_v8 = vmax.f32 %v1803_v6, 0.0  ;;  %v1678_v55 = vadd.f32 %v1541_v62, %v1422_v20  ;;  %v1679_v38 = vadd.f32 %v1543_v60, %v1423_v25  ;;  %v2254_v35 = vrot.slane %v2238_v29, %v2579_v17  ;;  %v4277_v6 = vld [vmem:[#allocation27_spill] sm:$0xff]  ;;  %v4279_v62 = vld [vmem:[#allocation42_spill] sm:$0xff] }
 0x2b7   : > { %v1868_v58 = vmax.f32 %v1804_v15, 0.0  ;;  %v4278_v29 = vld [vmem:[#allocation119_spill] sm:$0xff]  ;;  %v1428_v9 = vadd.f32 %v4281_v24, %v1172_v1 }
 0x2b8   : > { %v1805_v45 = vadd.f32 %v3609_v59, %v1678_v55  ;;  %v1806_v14 = vadd.f32 %v3613_v10, %v1679_v38  ;;  %v2269_v4 = vcombine.low %v2247_v47, %v2254_v35  ;;  %v1173_v15 = vadd.f32 %v4278_v29, %v4277_v6  ;;  %v4282_v38 = vld [vmem:[#allocation47_spill] sm:$0xff] }
 0x2b9   : > { %v2239_v34 = vcombine.low %v1867_v8, %v1868_v58  ;;  %v1545_v23 = vpop.permute.xlu0 %1544  ;;  %v1547_v22 = vpop.permute.xlu1 %1546  ;;  %v1175_v21 = vadd.f32 %v4283_v56, %v4282_v38 }
 0x2ba   : > { %v1869_v36 = vmax.f32 %v1805_v45, 0.0  ;;  %v1870_v40 = vmax.f32 %v1806_v14, 0.0  ;;  %v1680_v30 = vadd.f32 %v1545_v23, %v1424_v46  ;;  %v1681_v3 = vadd.f32 %v1547_v22, %v1425_v39 }
 0x2bb   : > { %v2261_v37 = vrot.slane %v2239_v34, %v2579_v17  ;;  %v1429_v0 = vadd.f32 %v4284_v33, %v1173_v15  ;;  %v2277_v58 = vrot.slane %v2269_v4, %v2579_v17 }
 0x2bc   : > { %v2240_v51 = vcombine.low %v1869_v36, %v1870_v40  ;;  %v1807_v50 = vadd.f32 %v3555_v16, %v1680_v30  ;;  %v1808_v61 = vadd.f32 %v3558_v52, %v1681_v3  ;;  %v4280_v16 = vld [vmem:[#allocation120_spill] sm:$0xff] }
 0x2bd   : > { %v1549_v43 = vpop.permute.xlu0 %1548  ;;  %v1551_v18 = vpop.permute.xlu1 %1550  ;;  %v1174_v60 = vadd.f32 %v4280_v16, %v4279_v62 }
 0x2be   : > { %v2268_v20 = vrot.slane %v2240_v51, %v2579_v17  ;;  %v1871_v12 = vmax.f32 %v1807_v50, 0.0  ;;  %v1682_v25 = vadd.f32 %v1549_v43, %v1426_v41  ;;  %v1683_v2 = vadd.f32 %v1551_v18, %v1427_v54 }
 0x2bf   : > { %v1872_v11 = vmax.f32 %v1808_v61, 0.0 }
 0x2c0   : > { %v2270_v8 = vcombine.low %v2261_v37, %v2268_v20  ;;  %v1809_v55 = vadd.f32 %v3570_v32, %v1682_v25  ;;  %v1810_v52 = vadd.f32 %v3574_v26, %v1683_v2  ;;  %v1430_v32 = vadd.f32 %v4285_v7, %v1174_v60  ;;  %v4286_v26 = vld [vmem:[#allocation159_spill] sm:$0xff] }
 0x2c1   : > { %v2286_v48 = vcombine.low %v1871_v12, %v1872_v11  ;;  %v1553_v46 = vpop.permute.xlu0 %1552  ;;  %v1555_v45 = vpop.permute.xlu1 %1554  ;;  %v1431_v35 = vadd.f32 %v4286_v26, %v1175_v21 }
 0x2c2   : > { %v2284_v14 = vrot.slane %v2270_v8, %v2579_v17  ;;  %v1873_v53 = vmax.f32 %v1809_v55, 0.0  ;;  %v1874_v57 = vmax.f32 %v1810_v52, 0.0  ;;  %v1684_v28 = vadd.f32 %v1553_v46, %v1428_v9 }
 0x2c3   : > { %v1685_v39 = vadd.f32 %v1555_v45, %v1429_v0  ;;  %v2296_v63 = vrot.slane %v2286_v48, %v2579_v17 }
 0x2c4   : > { %v2285_v34 = vcombine.low %v2277_v58, %v2284_v14  ;;  %v2287_v23 = vcombine.low %v1873_v53, %v1874_v57  ;;  %v1811_v22 = vadd.f32 %v3591_v49, %v1684_v28 }
 0x2c5   : > { %v1812_v13 = vadd.f32 %v3597_v44, %v1685_v39  ;;  %v1557_v27 = vpop.permute.xlu0 %1556  ;;  %v1559_v36 = vpop.permute.xlu1 %1558 }
 0x2c6   : > { %2350 = vst.msk [vmem:[%s3654_s28 + $0x30] sm:$0xff] %vm2343_vm3, %v2285_v34  ;;  %v2303_v40 = vrot.slane %v2287_v23, %v2579_v17  ;;  %v1875_v30 = vmax.f32 %v1811_v22, 0.0  ;;  %v1686_v47 = vadd.f32 %v1557_v27, %v1430_v32  ;;  %v1687_v3 = vadd.f32 %v1559_v36, %v1431_v35 }
 0x2c7   : > { %v1876_v5 = vmax.f32 %v1812_v13, 0.0 }
 0x2c8   : > { %v2318_v41 = vcombine.low %v2296_v63, %v2303_v40  ;;  %v1813_v19 = vadd.f32 %v3609_v59, %v1686_v47  ;;  %v1814_v49 = vadd.f32 %v3613_v10, %v1687_v3 }
 0x2c9   : > { %v2288_v54 = vcombine.low %v1875_v30, %v1876_v5 }
 0x2ca   : > { %v1877_v51 = vmax.f32 %v1813_v19, 0.0  ;;  %v1878_v50 = vmax.f32 %v1814_v49, 0.0  ;;  %v2326_v4 = vrot.slane %v2318_v41, %v2579_v17 }
 0x2cb   : > { %v2310_v31 = vrot.slane %v2288_v54, %v2579_v17 }
 0x2cc   : > { %v2289_v44 = vcombine.low %v1877_v51, %v1878_v50 }
 0x2ce   : > { %v2317_v42 = vrot.slane %v2289_v44, %v2579_v17 }
 0x2d0   : > { %v2319_v1 = vcombine.low %v2310_v31, %v2317_v42 }
 0x2d2   : > { %v2333_v37 = vrot.slane %v2319_v1, %v2579_v17 }
 0x2d4   : > { %v2334_v61 = vcombine.low %v2326_v4, %v2333_v37 }
 0x2d6   : > { %2351 = vst.msk [vmem:[%s3654_s28 + $0x38] sm:$0xff] %vm2343_vm3, %v2334_v61 }
 0x2d7 PF: > { %s13_s12 = sadd.s32 1, %s2501_s12  }
 0x2d8   : > { %p10_p4 = scmp.ge.s32.totalorder %s13_s12, 4  }
 0x2da   :  { %12 = sbr.rel (!%p10_p4) target bundleno = 1 (0x1), region = 62 }

// kernel: unet_forward.9
= control target key start
LH: loop header
LB: loop body
LE: loop exit
PB: predicated region body
PF: predicated region fallthrough
CT: control target
= control target key end

     0   :  { %s524_s12 = smov 0   ;;  %s676_s0 = inlined_call_operand.vmem [shape: f32[2,2,2,64], index: 0, kind: input, shape index: {}]   ;;  %s677_s1 = inlined_call_operand.vmem [shape: f32[256,128], index: 1, kind: input, shape index: {}]   ;;  %s678_s2 = inlined_call_operand.vmem [shape: f32[1,128], index: 2, kind: input, shape index: {}]   ;;  %s679_s3 = inlined_call_operand.vmem [shape: f32[2,4,128], index: 3, kind: output, shape index: {}]  }
   0x1 LB: > { %s427_s13 = sadd.s32 4294967295, %s499_s12   ;;  %p431_p0 = scmp.ge.s32.totalorder %s499_s12, 1  ;;  %s499_s12 = sphi %s524_s12, %s13_s12  }
   0x2   : > { %p137_p1 = scmp.lt.s32.totalorder %s499_s12, 3 }
   0x4   : > { %p138_p2 = pnand %p431_p0, %p137_p1 }
   0x5   : > { %p160_p3 = scmp.lt.s32.totalorder (!%p138_p2), %s427_s13, 1  ;;  %s503_s11 = smov (!%p138_p2), 64  }
   0x6   : > { %141 = sbr.rel (%p138_p2) target bundleno = 352 (0x160), region = 32 }
   0xb   : > { %v179_v0 = vlaneseq  ;;  %v501_v1 = vmov 1983009808   ;;  %vm192_vm0 = vcmask 1040384   ;;  %vm193_vm1 = vcmask 1042434   ;;  %v294_v3 = vld [vmem:[%s677_s1 + $0xf8] sm:$0xff]  ;;  %v293_v5 = vld [vmem:[%s677_s1 + $0xf0] sm:$0xff] }
   0xc   : > { %v177_v2 = vunpack.c.l.s4 %v501_v1  ;;  %v278_v4 = vld [vmem:[%s677_s1 + $0x78] sm:$0xff]  ;;  %s685_s13 = smov (!%p160_p3, %s427_s13), 1  ;;  %442 = vmatprep.subr.mxu0 %v294_v3  ;;  %v277_v7 = vld [vmem:[%s677_s1 + $0x70] sm:$0xff]  ;;  %v292_v9 = vld [vmem:[%s677_s1 + $0xe8] sm:$0xff]  ;;  %vm171_vm2 = vcmask 1041408   ;;  %vm195_vm4 = vcmask 1044484  }
   0xd   : > { %v180_v6 = vshrl.u32 %v179_v0, 7  ;;  %443 = vmatpush3.msra.mxu0 %v278_v4  ;;  %s441_s24 = sshll.u32 %s685_s13, 2  ;;  %vm194_vm3 = vmor %vm192_vm0, %vm193_vm1  ;;  %v276_v10 = vld [vmem:[%s677_s1 + $0x68] sm:$0xff]  ;;  %v291_v12 = vld [vmem:[%s677_s1 + $0xe0] sm:$0xff]  ;;  %vm197_vm6 = vcmask 1046534   ;;  %v502_v19 = vmov 0.0  }
   0xe   : > { %v178_v8 = vunpack.c.0.s8 %v177_v2  ;;  %444 = vmatprep.subr.mxu0 %v293_v5  ;;  %s164_s29 = scalar_lea.vmem %s676_s0, %s441_s24  ;;  %v275_v15 = vld [vmem:[%s677_s1 + $0x60] sm:$0xff]  ;;  %vm566_vm5 = vmor %vm194_vm3, %vm195_vm4  ;;  %v290_v21 = vld [vmem:[%s677_s1 + $0xd8] sm:$0xff]  ;;  %vm260_vm8 = vcmask 523264   ;;  %s168_s14 = scalar_lea.vmem %s679_s3, %s441_s24 }
   0xf   : > { %445 = vmatpush3.msra.mxu0 %v277_v7  ;;  %v169_v13 = vld [vmem:[%s164_s29] sm:$0x3]  ;;  %v170_v14 = vld [vmem:[%s164_s29 + $0x2] sm:$0x3]  ;;  %v274_v24 = vld [vmem:[%s677_s1 + $0x58] sm:$0xff] }
  0x10   : > { %v558_v11 = vsub.s32 %v178_v8, %v180_v6  ;;  %446 = vmatprep.subr.mxu0 %v292_v9  ;;  %v172_v16 = vsel %vm171_vm2, %v169_v13, 0.0  ;;  %v173_v17 = vsel %vm171_vm2, %v170_v14, 0.0  ;;  %v289_v28 = vld [vmem:[%s677_s1 + $0xd0] sm:$0xff]  ;;  %vm587_vm7 = vmor %vm566_vm5, %vm197_vm6  ;;  %v288_v37 = vld [vmem:[%s677_s1 + $0xc8] sm:$0xff] }
  0x11   : > { %447 = vmatpush3.msra.mxu0 %v276_v10  ;;  %v579_v25 = vcombine.low %v173_v17, %v502_v19  ;;  %v220_v29 = vcombine.low %v172_v16, %v173_v17  ;;  %v273_v35 = vld [vmem:[%s677_s1 + $0x50] sm:$0xff]  ;;  %v272_v42 = vld [vmem:[%s677_s1 + $0x48] sm:$0xff]  ;;  %v287_v44 = vld [vmem:[%s677_s1 + $0xc0] sm:$0xff] }
  0x12   : > { %v214_v20 = vrot.slane %v502_v19, %v558_v11  ;;  %v182_v22 = vrot.slane %v172_v16, %v558_v11  ;;  %v190_v23 = vrot.slane %v173_v17, %v558_v11  ;;  %448 = vmatprep.subr.mxu0 %v291_v12  ;;  %v271_v47 = vld [vmem:[%s677_s1 + $0x40] sm:$0xff]  ;;  %v286_v50 = vld [vmem:[%s677_s1 + $0xb8] sm:$0xff]  ;;  %v285_v54 = vld [vmem:[%s677_s1 + $0xb0] sm:$0xff] }
  0x13   : > { %449 = vmatpush3.msra.mxu0 %v275_v15  ;;  %v247_v38 = vrot.slane %v579_v25, %v558_v11  ;;  %v227_v39 = vrot.slane %v220_v29, %v558_v11  ;;  %v270_v51 = vld [vmem:[%s677_s1 + $0x38] sm:$0xff]  ;;  %v269_v55 = vld [vmem:[%s677_s1 + $0x30] sm:$0xff]  ;;  %v284_v57 = vld [vmem:[%s677_s1 + $0xa8] sm:$0xff] }
  0x14   : > { %v215_v26 = vcombine.high %v214_v20, %v214_v20  ;;  %v437_v27 = vrot.slane %v214_v20, 9  ;;  %v183_v30 = vcombine.high %v182_v22, %v182_v22  ;;  %v191_v31 = vcombine.high %v190_v23, %v190_v23  ;;  %450 = vmatprep.subr.mxu0 %v290_v21  ;;  %v268_v58 = vld [vmem:[%s677_s1 + $0x28] sm:$0xff]  ;;  %v283_v59 = vld [vmem:[%s677_s1 + $0xa0] sm:$0xff]  ;;  %v282_v61 = vld [vmem:[%s677_s1 + $0x98] sm:$0xff] }
  0x15   : > { %v435_v33 = vrot.slane %v182_v22, 9  ;;  %v436_v34 = vrot.slane %v190_v23, 9  ;;  %451 = vmatpush3.msra.mxu0 %v274_v24  ;;  %v267_v60 = vld [vmem:[%s677_s1 + $0x20] sm:$0xff]  ;;  %v266_v62 = vld [vmem:[%s677_s1 + $0x18] sm:$0xff]  ;;  %v281_v63 = vld [vmem:[%s677_s1 + $0x90] sm:$0xff] }
  0x16   : > { %v218_v36 = vrot.slane %v215_v26, 7  ;;  %v201_v40 = vrot.slane %v183_v30, 7  ;;  %v205_v41 = vrot.slane %v191_v31, 7  ;;  %452 = vmatprep.subr.mxu0 %v289_v28  ;;  %v265_v0 = vld [vmem:[%s677_s1 + $0x10] sm:$0xff]  ;;  %v280_v1 = vld [vmem:[%s677_s1 + $0x88] sm:$0xff]  ;;  %v279_v3 = vld [vmem:[%s677_s1 + $0x80] sm:$0xff] }
  0x17   : > { %453 = vmatpush3.msra.mxu0 %v273_v35  ;;  %v264_v2 = vld [vmem:[%s677_s1 + $0x8] sm:$0xff]  ;;  %v263_v4 = vld [vmem:[%s677_s1] sm:$0xff] }
  0x18   : > { %v219_v43 = vsel %vm587_vm7, %v437_v27, %v218_v36  ;;  %v202_v45 = vsel %vm587_vm7, %v435_v33, %v201_v40  ;;  %v206_v46 = vsel %vm587_vm7, %v436_v34, %v205_v41  ;;  %454 = vmatprep.subr.mxu0 %v288_v37 }
  0x19   : > { %v229_v48 = vcombine.low %v202_v45, %v206_v46  ;;  %v249_v49 = vcombine.low %v206_v46, %v219_v43  ;;  %455 = vmatpush3.msra.mxu0 %v272_v42 }
  0x1a   : > { %456 = vmatprep.subr.mxu0 %v287_v44 }
  0x1b   : > { %v236_v52 = vrot.slane %v229_v48, %v558_v11  ;;  %v256_v53 = vrot.slane %v249_v49, %v558_v11  ;;  %457 = vmatpush3.msra.mxu0 %v271_v47  ;;  %v438_v11 = vld [vmem:[%s678_s2] ss:$0 sm:$0xff] }
  0x1c   : > { %458 = vmatprep.subr.mxu0 %v286_v50 }
  0x1d   : > { %v488_v56 = vpack.i.bf16 %v236_v52, %v256_v53  ;;  %459 = vmatpush3.msra.mxu0 %v270_v51 }
  0x1e   : > { %460 = vmatprep.subr.mxu0 %v285_v54 }
  0x1f   : > { %489 = vrot.lane.b32.xlu0 %v488_v56, %s503_s11  ;;  %461 = vmatpush3.msra.mxu0 %v269_v55 }
  0x20   : > { %462 = vmatprep.subr.mxu0 %v284_v57 }
  0x21   : > { %463 = vmatpush3.msra.mxu0 %v268_v58 }
  0x22   : > { %464 = vmatprep.subr.mxu0 %v283_v59 }
  0x23   : > { %465 = vmatpush3.msra.mxu0 %v267_v60 }
  0x24   : > { %466 = vmatprep.subr.mxu0 %v282_v61 }
  0x25   : > { %467 = vmatpush3.msra.mxu0 %v266_v62 }
  0x26   : > { %468 = vmatprep.subr.mxu0 %v281_v63 }
  0x27   : > { %469 = vmatpush3.msra.mxu0 %v265_v0 }
  0x28   : > { %470 = vmatprep.subr.mxu0 %v280_v1 }
  0x29   : > { %471 = vmatpush3.msra.mxu0 %v264_v2 }
  0x2a   : > { %472 = vmatprep.subr.mxu0 %v279_v3 }
  0x2b   : > { %473 = vmatpush3.msra.mxu0 %v263_v4 }
  0x91   : > { %v490_v5 = vpop.permute.xlu0 %489 }
  0x92   : > { %v492_v6 = vunpack.i.h.bf16 %v490_v5  ;;  %v491_v7 = vunpack.i.l.bf16 %v490_v5 }
  0x94   : > { %v262_v8 = vsel %vm260_vm8, %v247_v38, %v491_v7  ;;  %v261_v9 = vsel %vm260_vm8, %v227_v39, %v492_v6 }
  0x95   : > { %366 = vmatprep.mubr.f32.mxu0 %v262_v8 }
  0x96   : > { %367 = vmatmul.mubr.f32.vlgmr.msra.gmra.mxu0 %v261_v9 }
 0x156   : > { %v474_v10 = vpop.f32.mrf.mxu0 }
 0x158   : > { %v475_v12 = vpop.f32.mrf.mxu0 }
 0x159   : > { %v476_v13 = vadd.f32 %v475_v12, %v474_v10 }
 0x15b   : > { %v369_v14 = vadd.f32 %v476_v13, %v438_v11 }
 0x15d   : > { %v372_v15 = vmax.f32 %v369_v14, 0.0 }
 0x15f   : > { %373 = vst [vmem:[%s168_s14] sm:$0xf] %v372_v15 }
 0x160 PF: > { %s13_s12 = sadd.s32 1, %s499_s12  }
 0x161   : > { %p10_p4 = scmp.ge.s32.totalorder %s13_s12, 4  }
 0x163   :  { %12 = sbr.rel (!%p10_p4) target bundleno = 1 (0x1), region = 62 }

// kernel: unet_forward.8
= control target key start
LH: loop header
LB: loop body
LE: loop exit
PB: predicated region body
PF: predicated region fallthrough
CT: control target
= control target key end

     0   :  { %s619_s12 = smov 0   ;;  %s760_s0 = inlined_call_operand.vmem [shape: f32[2,9,128], index: 0, kind: input, shape index: {}]   ;;  %s761_s1 = inlined_call_operand.vmem [shape: f32[128,256], index: 1, kind: input, shape index: {}]   ;;  %s762_s2 = inlined_call_operand.vmem [shape: f32[1,64], index: 2, kind: input, shape index: {}]   ;;  %s763_s3 = inlined_call_operand.vmem [shape: f32[2,2,2,64], index: 3, kind: output, shape index: {}]  }
   0x1 LB: > { %s531_s13 = sadd.s32 4294967295, %s594_s12   ;;  %p535_p0 = scmp.ge.s32.totalorder %s594_s12, 1  ;;  %s594_s12 = sphi %s619_s12, %s13_s12  }
   0x2   : > { %p137_p1 = scmp.lt.s32.totalorder %s594_s12, 3 }
   0x4   : > { %p138_p2 = pnand %p535_p0, %p137_p1 }
   0x5   : > { %p161_p3 = scmp.lt.s32.totalorder (!%p138_p2), %s531_s13, 1  ;;  %s598_s5 = smov (!%p138_p2), 64  }
   0x6   : > { %141 = sbr.rel (%p138_p2) target bundleno = 385 (0x181), region = 32 }
   0xb   : > { %v204_v0 = vld [vmem:[%s761_s1 + $0xf8] sm:$0xff]  ;;  %v203_v1 = vld [vmem:[%s761_s1 + $0xf0] sm:$0xff]  ;;  %v202_v2 = vld [vmem:[%s761_s1 + $0xe8] sm:$0xff]  ;;  %s765_s13 = smov (!%p161_p3, %s531_s13), 1  ;;  %v596_v28 = vmov 0.0   ;;  %v291_v37 = vlaneseq  ;;  %vm473_vm0 = vcmask 517120  }
   0xc   : > { %205 = vmatprep.subr.mxu0 %v204_v0  ;;  %v201_v3 = vld [vmem:[%s761_s1 + $0xe0] sm:$0xff]  ;;  %545 = vmatprep.subr.mxu1 %v204_v0  ;;  %v200_v4 = vld [vmem:[%s761_s1 + $0xd8] sm:$0xff]  ;;  %v199_v5 = vld [vmem:[%s761_s1 + $0xd0] sm:$0xff]  ;;  %s543_s18 = sshll.u32 %s765_s13, 4  ;;  %v597_v35 = vmov 1966171168  }
   0xd   : > { %206 = vmatpush1.msra.mxu0 %v203_v1  ;;  %561 = vmatpush1.msra.mxu1 %v203_v1  ;;  %v198_v6 = vld [vmem:[%s761_s1 + $0xc8] sm:$0xff]  ;;  %v197_v7 = vld [vmem:[%s761_s1 + $0xc0] sm:$0xff]  ;;  %v196_v8 = vld [vmem:[%s761_s1 + $0xb8] sm:$0xff]  ;;  %s165_s27 = scalar_lea.vmem %s760_s0, %s543_s18  ;;  %v289_v36 = vunpack.c.l.s4 %v597_v35  ;;  %v292_v39 = vshrl.u32 %v291_v37, 7  ;;  %s544_s8 = sshll.u32 %s765_s13, 2 }
   0xe   : > { %207 = vmatprep.subr.mxu0 %v202_v2  ;;  %546 = vmatprep.subr.mxu1 %v202_v2  ;;  %v195_v9 = vld [vmem:[%s761_s1 + $0xb0] sm:$0xff]  ;;  %v194_v10 = vld [vmem:[%s761_s1 + $0xa8] sm:$0xff]  ;;  %v193_v11 = vld [vmem:[%s761_s1 + $0xa0] sm:$0xff]  ;;  %s170_s11 = scalar_lea.vmem %s763_s3, %s544_s8 }
   0xf   : > { %208 = vmatpush1.msra.mxu0 %v201_v3  ;;  %562 = vmatpush1.msra.mxu1 %v201_v3  ;;  %v192_v12 = vld [vmem:[%s761_s1 + $0x98] sm:$0xff]  ;;  %v191_v13 = vld [vmem:[%s761_s1 + $0x90] sm:$0xff]  ;;  %v190_v14 = vld [vmem:[%s761_s1 + $0x88] sm:$0xff]  ;;  %v290_v38 = vunpack.c.0.s8 %v289_v36 }
  0x10   : > { %209 = vmatprep.subr.mxu0 %v200_v4  ;;  %547 = vmatprep.subr.mxu1 %v200_v4  ;;  %v189_v15 = vld [vmem:[%s761_s1 + $0x80] sm:$0xff]  ;;  %v188_v16 = vld [vmem:[%s761_s1 + $0x78] sm:$0xff]  ;;  %v187_v17 = vld [vmem:[%s761_s1 + $0x70] sm:$0xff] }
  0x11   : > { %210 = vmatpush1.msra.mxu0 %v199_v5  ;;  %563 = vmatpush1.msra.mxu1 %v199_v5  ;;  %v186_v18 = vld [vmem:[%s761_s1 + $0x68] sm:$0xff]  ;;  %v185_v19 = vld [vmem:[%s761_s1 + $0x60] sm:$0xff]  ;;  %v184_v20 = vld [vmem:[%s761_s1 + $0x58] sm:$0xff]  ;;  %v733_v41 = vsub.s32 %v290_v38, %v292_v39 }
  0x12   : > { %211 = vmatprep.subr.mxu0 %v198_v6  ;;  %548 = vmatprep.subr.mxu1 %v198_v6  ;;  %v183_v21 = vld [vmem:[%s761_s1 + $0x50] sm:$0xff]  ;;  %v182_v22 = vld [vmem:[%s761_s1 + $0x48] sm:$0xff]  ;;  %v181_v23 = vld [vmem:[%s761_s1 + $0x40] sm:$0xff] }
  0x13   : > { %212 = vmatpush1.msra.mxu0 %v197_v7  ;;  %564 = vmatpush1.msra.mxu1 %v197_v7  ;;  %v180_v24 = vld [vmem:[%s761_s1 + $0x38] sm:$0xff]  ;;  %v179_v25 = vld [vmem:[%s761_s1 + $0x30] sm:$0xff]  ;;  %v178_v26 = vld [vmem:[%s761_s1 + $0x28] sm:$0xff] }
  0x14   : > { %213 = vmatprep.subr.mxu0 %v196_v8  ;;  %549 = vmatprep.subr.mxu1 %v196_v8  ;;  %v177_v27 = vld [vmem:[%s761_s1 + $0x20] sm:$0xff]  ;;  %v176_v29 = vld [vmem:[%s761_s1 + $0x18] sm:$0xff]  ;;  %v175_v30 = vld [vmem:[%s761_s1 + $0x10] sm:$0xff] }
  0x15   : > { %214 = vmatpush1.msra.mxu0 %v195_v9  ;;  %565 = vmatpush1.msra.mxu1 %v195_v9  ;;  %v174_v31 = vld [vmem:[%s761_s1 + $0x8] sm:$0xff]  ;;  %v173_v32 = vld [vmem:[%s761_s1] sm:$0xff] }
  0x16   : > { %215 = vmatprep.subr.mxu0 %v194_v10  ;;  %550 = vmatprep.subr.mxu1 %v194_v10  ;;  %v171_v33 = vld [vmem:[%s165_s27] sm:$0xff]  ;;  %v172_v34 = vld [vmem:[%s165_s27 + $0x8] sm:$0x1] }
  0x17   : > { %216 = vmatpush1.msra.mxu0 %v193_v11  ;;  %566 = vmatpush1.msra.mxu1 %v193_v11  ;;  %v540_v61 = vld [vmem:[%s762_s2] ss:$0 sm:$0xff] }
  0x18   : > { %217 = vmatprep.subr.mxu0 %v192_v12  ;;  %551 = vmatprep.subr.mxu1 %v192_v12  ;;  %v411_v0 = vrot.slane %v540_v61, %v733_v41 }
  0x19   : > { %218 = vmatpush1.msra.mxu0 %v191_v13  ;;  %567 = vmatpush1.msra.mxu1 %v191_v13 }
  0x1a   : > { %219 = vmatprep.subr.mxu0 %v190_v14  ;;  %552 = vmatprep.subr.mxu1 %v190_v14  ;;  %v412_v4 = vcombine.high %v411_v0, %v411_v0  ;;  %v419_v11 = vrot.slane %v411_v0, %v733_v41 }
  0x1b   : > { %220 = vmatpush1.msra.mxu0 %v189_v15  ;;  %568 = vmatpush1.msra.mxu1 %v189_v15 }
  0x1c   : > { %221 = vmatprep.subr.mxu0 %v188_v16  ;;  %553 = vmatprep.subr.mxu1 %v188_v16  ;;  %v426_v16 = vrot.slane %v412_v4, %v733_v41 }
  0x1d   : > { %222 = vmatpush1.msra.mxu0 %v187_v17  ;;  %569 = vmatpush1.msra.mxu1 %v187_v17 }
  0x1e   : > { %223 = vmatprep.subr.mxu0 %v186_v18  ;;  %554 = vmatprep.subr.mxu1 %v186_v18 }
  0x1f   : > { %224 = vmatpush1.msra.mxu0 %v185_v19  ;;  %570 = vmatpush1.msra.mxu1 %v185_v19 }
  0x20   : > { %225 = vmatprep.subr.mxu0 %v184_v20  ;;  %555 = vmatprep.subr.mxu1 %v184_v20 }
  0x21   : > { %226 = vmatpush1.msra.mxu0 %v183_v21  ;;  %571 = vmatpush1.msra.mxu1 %v183_v21 }
  0x22   : > { %227 = vmatprep.subr.mxu0 %v182_v22  ;;  %556 = vmatprep.subr.mxu1 %v182_v22 }
  0x23   : > { %228 = vmatpush1.msra.mxu0 %v181_v23  ;;  %572 = vmatpush1.msra.mxu1 %v181_v23 }
  0x24   : > { %229 = vmatprep.subr.mxu0 %v180_v24  ;;  %269 = vmatprep.mubr.f32.mxu0 %v596_v28 }
  0x25   : > { %230 = vmatpush1.msra.mxu0 %v179_v25  ;;  %557 = vmatprep.subr.mxu1 %v180_v24 }
  0x26   : > { %231 = vmatprep.subr.mxu0 %v178_v26  ;;  %573 = vmatpush1.msra.mxu1 %v179_v25 }
  0x27   : > { %232 = vmatpush1.msra.mxu0 %v177_v27  ;;  %558 = vmatprep.subr.mxu1 %v178_v26 }
  0x28   : > { %233 = vmatprep.subr.mxu0 %v176_v29  ;;  %574 = vmatpush1.msra.mxu1 %v177_v27 }
  0x29   : > { %234 = vmatpush1.msra.mxu0 %v175_v30  ;;  %559 = vmatprep.subr.mxu1 %v176_v29 }
  0x2a   : > { %235 = vmatprep.subr.mxu0 %v174_v31  ;;  %575 = vmatpush1.msra.mxu1 %v175_v30 }
  0x2b   : > { %236 = vmatpush1.msra.mxu0 %v173_v32  ;;  %560 = vmatprep.subr.mxu1 %v174_v31 }
  0x2c   : > { %270 = vmatmul.mubr.f32.vlgmr.msra.gmra.mxu0 %v171_v33  ;;  %576 = vmatpush1.msra.mxu1 %v173_v32 }
  0x2d   : > { %275 = vmatprep.mubr.f32.mxu1 %v596_v28 }
  0x2e   : > { %276 = vmatmul.mubr.f32.vlgmr.msra.gmra.mxu1 %v172_v34 }
  0xec   : > { %v271_v40 = vpop.f32.mrf.mxu0 }
  0xee   : > { %v273_v42 = vpop.f32.mrf.mxu0  ;;  %v277_v43 = vpop.f32.mrf.mxu1 }
  0xef   : > { %v286_v44 = vcombine.low %v271_v40, %v273_v42  ;;  %v287_v45 = vcombine.high %v271_v40, %v273_v42 }
  0xf0   : > { %v279_v46 = vpop.f32.mrf.mxu1 }
  0xf1   : > { %v294_v47 = vrot.slane %v286_v44, %v733_v41  ;;  %v301_v48 = vrot.slane %v287_v45, %v733_v41  ;;  %v336_v49 = vcombine.low %v277_v43, %v279_v46 }
  0xf3   : > { %v302_v50 = vcombine.high %v294_v47, %v294_v47  ;;  %v303_v51 = vcombine.high %v301_v48, %v301_v48  ;;  %v317_v52 = vrot.slane %v301_v48, %v733_v41  ;;  %v310_v53 = vrot.slane %v294_v47, %v733_v41 }
  0xf4   : > { %v343_v54 = vrot.slane %v336_v49, %v733_v41 }
  0xf5   : > { %359 = vrot.lane.b32.xlu1 %v317_v52, %s598_s5  ;;  %v324_v55 = vrot.slane %v302_v50, %v733_v41  ;;  %v331_v56 = vrot.slane %v303_v51, %v733_v41  ;;  %v332_v57 = vcombine.high %v310_v53, %v310_v53  ;;  %v333_v5 = vcombine.high %v317_v52, %v317_v52 }
  0xf6   : > { %v350_v58 = vrot.slane %v343_v54, %v733_v41  ;;  %v372_v13 = vrot.slane %v317_v52, 1 }
  0xf7   : > { %355 = vrot.lane.b32.xlu0 %v324_v55, %s598_s5  ;;  %v335_v59 = vcombine.high %v331_v56, %v331_v56  ;;  %v334_v60 = vcombine.high %v324_v55, %v324_v55  ;;  %v373_v18 = vrot.slane %v333_v5, 1 }
  0xf9   : > { %361 = vrot.lane.b32.xlu1 %v331_v56, %s598_s5  ;;  %v371_v2 = vrot.slane %v334_v60, 1  ;;  %v374_v15 = vrot.slane %v335_v59, 1 }
  0xfb   : > { %357 = vrot.lane.b32.xlu0 %v332_v57, %s598_s5 }
  0xfd   : > { %385 = vrot.lane.b32.xlu1 %v350_v58, %s598_s5 }
  0xff   : > { %383 = vrot.lane.b32.xlu0 %v335_v59, %s598_s5 }
 0x167   : > { %v360_v62 = vpop.permute.xlu1 %359 }
 0x168   : > { %v387_v6 = vrot.slane %v360_v62, 1  ;;  %v369_v9 = vadd.f32 %v360_v62, %v334_v60 }
 0x169   : > { %v356_v63 = vpop.permute.xlu0 %355 }
 0x16a   : > { %v367_v1 = vadd.f32 %v356_v63, %v310_v53  ;;  %v381_v24 = vadd.f32 %v373_v18, %v369_v9 }
 0x16b   : > { %v362_v3 = vpop.permute.xlu1 %361 }
 0x16c   : > { %v379_v7 = vadd.f32 %v371_v2, %v367_v1  ;;  %v370_v8 = vadd.f32 %v362_v3, %v317_v52  ;;  %v388_v19 = vrot.slane %v362_v3, 1 }
 0x16d   : > { %v358_v10 = vpop.permute.xlu0 %357 }
 0x16e   : > { %v395_v12 = vadd.f32 %v387_v6, %v379_v7  ;;  %v368_v14 = vadd.f32 %v358_v10, %v324_v55  ;;  %v382_v21 = vadd.f32 %v374_v15, %v370_v8 }
 0x16f   : > { %v386_v17 = vpop.permute.xlu1 %385 }
 0x170   : > { %v380_v20 = vadd.f32 %v372_v13, %v368_v14  ;;  %v390_v22 = vrot.slane %v386_v17, 1  ;;  %v429_v28 = vadd.f32 %v419_v11, %v395_v12 }
 0x171   : > { %v384_v23 = vpop.permute.xlu0 %383 }
 0x172   : > { %v396_v25 = vadd.f32 %v388_v19, %v380_v20  ;;  %v398_v26 = vadd.f32 %v390_v22, %v382_v21  ;;  %v389_v27 = vrot.slane %v384_v23, 1  ;;  %v433_v34 = vmax.f32 %v429_v28, 0.0 }
 0x174   : > { %v430_v29 = vadd.f32 %v426_v16, %v396_v25  ;;  %v432_v30 = vadd.f32 %v426_v16, %v398_v26  ;;  %v397_v31 = vadd.f32 %v389_v27, %v381_v24 }
 0x176   : > { %v434_v32 = vmax.f32 %v430_v29, 0.0  ;;  %v431_v33 = vadd.f32 %v419_v11, %v397_v31  ;;  %v436_v35 = vmax.f32 %v432_v30, 0.0 }
 0x178   : > { %v435_v36 = vmax.f32 %v431_v33, 0.0  ;;  %v441_v37 = vcombine.low %v433_v34, %v434_v32 }
 0x17a   : > { %v448_v38 = vrot.slane %v441_v37, %v733_v41  ;;  %v456_v39 = vcombine.low %v435_v36, %v436_v35 }
 0x17c   : > { %v455_v40 = vrot.slane %v448_v38, %v733_v41  ;;  %v463_v42 = vrot.slane %v456_v39, %v733_v41 }
 0x17e   : > { %v470_v43 = vrot.slane %v463_v42, %v733_v41  ;;  %474 = vst.msk [vmem:[%s170_s11] sm:$0x3] %vm473_vm0, %v455_v40 }
 0x180   : > { %475 = vst.msk [vmem:[%s170_s11 + $0x2] sm:$0x3] %vm473_vm0, %v470_v43 }
 0x181 PF: > { %s13_s12 = sadd.s32 1, %s594_s12  }
 0x182   : > { %p10_p4 = scmp.ge.s32.totalorder %s13_s12, 4  }
 0x184   :  { %12 = sbr.rel (!%p10_p4) target bundleno = 1 (0x1), region = 62 }

// kernel: unet_forward.10
= control target key start
LH: loop header
LB: loop body
LE: loop exit
PB: predicated region body
PF: predicated region fallthrough
CT: control target
= control target key end

     0   :  { %s868_s18 = smov 0   ;;  %s1131_s0 = inlined_call_operand.vmem [shape: f32[2,4,4,32], index: 0, kind: input, shape index: {}]   ;;  %s1132_s1 = inlined_call_operand.vmem [shape: f32[2,4,4,32], index: 1, kind: input, shape index: {}]   ;;  %s1133_s2 = inlined_call_operand.vmem [shape: f32[128,64], index: 2, kind: input, shape index: {}]   ;;  %s1134_s3 = inlined_call_operand.vmem [shape: f32[128,64], index: 3, kind: input, shape index: {}]   ;;  %s1135_s4 = inlined_call_operand.vmem [shape: f32[1,64], index: 4, kind: input, shape index: {}]   ;;  %s1136_s5 = inlined_call_operand.vmem [shape: f32[2,16,64], index: 5, kind: output, shape index: {}]  }
   0x1 LB: > { %s652_s19 = sadd.s32 4294967295, %s832_s18   ;;  %p656_p0 = scmp.ge.s32.totalorder %s832_s18, 1  ;;  %s832_s18 = sphi %s868_s18, %s15_s18  }
   0x2   : > { %p197_p1 = scmp.lt.s32.totalorder %s832_s18, 3 }
   0x4   : > { %p198_p2 = pnand %p656_p0, %p197_p1 }
   0x5   : > { %p230_p3 = scmp.lt.s32.totalorder (!%p198_p2), %s652_s19, 1  ;;  %s835_s6 = smov (!%p198_p2), 64  }
   0x6   : > { %201 = sbr.rel (%p198_p2) target bundleno = 362 (0x16a), region = 40  ;;  %s836_s21 = smov (!%p198_p2), 32  }
   0xb   : > { %v421_v0 = vld [vmem:[%s1134_s3 + $0x78] sm:$0xff]  ;;  %s1140_s19 = smov (!%p230_p3, %s652_s19), 1  ;;  %v420_v2 = vld [vmem:[%s1134_s3 + $0x70] sm:$0xff]  ;;  %v419_v4 = vld [vmem:[%s1134_s3 + $0x68] sm:$0xff]  ;;  %vm249_vm0 = vcmask 1043456   ;;  %vm262_vm1 = vcmask 1042432  }
   0xc   : > { %v339_v1 = vld [vmem:[%s1133_s2 + $0x78] sm:$0xff]  ;;  %714 = vmatprep.subr.mxu0 %v421_v0  ;;  %v338_v3 = vld [vmem:[%s1133_s2 + $0x70] sm:$0xff]  ;;  %v337_v5 = vld [vmem:[%s1133_s2 + $0x68] sm:$0xff]  ;;  %s894_s7 = sshll.u32 %s1140_s19, 4  ;;  %vm263_vm2 = vcmask 1046532   ;;  %v834_v14 = vmov 0.0  }
   0xd   : > { %749 = vmatprep.subr.mxu1 %v339_v1  ;;  %715 = vmatpush3.msra.mxu0 %v421_v0  ;;  %s900_s10 = scalar_lea.vmem %s1131_s0, %s894_s7  ;;  %s906_s13 = scalar_lea.vmem %s1132_s1, %s894_s7  ;;  %v418_v6 = vld [vmem:[%s1134_s3 + $0x60] sm:$0xff]  ;;  %v926_v15 = vcombine.high %v834_v14, %v834_v14  ;;  %v417_v16 = vld [vmem:[%s1134_s3 + $0x58] sm:$0xff]  ;;  %vm953_vm3 = vmor %vm262_vm1, %vm263_vm2  ;;  %v959_v28 = vrot.slane %v834_v14, 9  ;;  %vm315_vm4 = vcmask 261120   ;;  %vm318_vm5 = vcmask 523264  }
   0xe   : > { %750 = vmatpush3.msra.mxu1 %v339_v1  ;;  %716 = vmatprep.subr.mxu0 %v420_v2  ;;  %v336_v7 = vld [vmem:[%s1133_s2 + $0x60] sm:$0xff]  ;;  %v247_v9 = vld [vmem:[%s900_s10 + $0x8] sm:$0xf]  ;;  %v335_v17 = vld [vmem:[%s1133_s2 + $0x58] sm:$0xff]  ;;  %vm321_vm6 = vcmask 785408   ;;  %s244_s28 = scalar_lea.vmem %s1136_s5, %s894_s7 }
   0xf   : > { %751 = vmatprep.subr.mxu1 %v338_v3  ;;  %717 = vmatpush3.msra.mxu0 %v420_v2  ;;  %v246_v8 = vld [vmem:[%s900_s10 + $0x4] sm:$0xf]  ;;  %v921_v12 = vsel %vm249_vm0, %v247_v9, 0.0  ;;  %v342_v13 = vld [vmem:[%s906_s13 + $0x8] sm:$0xf]  ;;  %v416_v29 = vld [vmem:[%s1134_s3 + $0x50] sm:$0xff] }
  0x10   : > { %752 = vmatpush3.msra.mxu1 %v338_v3  ;;  %v341_v10 = vld [vmem:[%s906_s13 + $0x4] sm:$0xf]  ;;  %718 = vmatprep.subr.mxu0 %v419_v4  ;;  %v918_v11 = vsel %vm249_vm0, %v246_v8, 0.0  ;;  %v940_v20 = vsel %vm249_vm0, %v342_v13, 0.0  ;;  %v245_v21 = vld [vmem:[%s900_s10] sm:$0xf]  ;;  %v260_v32 = vcombine.high %v921_v12, %v921_v12 }
  0x11   : > { %753 = vmatprep.subr.mxu1 %v337_v5  ;;  %719 = vmatpush3.msra.mxu0 %v419_v4  ;;  %v299_v18 = vcombine.low %v918_v11, %v921_v12  ;;  %v937_v19 = vsel %vm249_vm0, %v341_v10, 0.0  ;;  %v259_v22 = vcombine.high %v918_v11, %v918_v11  ;;  %v340_v23 = vld [vmem:[%s906_s13] sm:$0xf]  ;;  %v949_v25 = vsel %vm249_vm0, %v245_v21, 0.0  ;;  %v334_v30 = vld [vmem:[%s1133_s2 + $0x50] sm:$0xff]  ;;  %v415_v39 = vld [vmem:[%s1134_s3 + $0x48] sm:$0xff] }
  0x12   : > { %754 = vmatpush3.msra.mxu1 %v337_v5  ;;  %720 = vmatprep.subr.mxu0 %v418_v6  ;;  %v384_v24 = vcombine.low %v937_v19, %v940_v20  ;;  %v664_v27 = vrot.slane %v918_v11, 9  ;;  %v258_v31 = vcombine.high %v949_v25, %v949_v25  ;;  %v663_v33 = vrot.slane %v949_v25, 9  ;;  %v248_v44 = vld [vmem:[%s900_s10 + $0xc] sm:$0xf]  ;;  %v414_v55 = vld [vmem:[%s1134_s3 + $0x40] sm:$0xff]  ;;  %v413_v1 = vld [vmem:[%s1134_s3 + $0x38] sm:$0xff] }
  0x13   : > { %755 = vmatprep.subr.mxu1 %v336_v7  ;;  %721 = vmatpush3.msra.mxu0 %v418_v6  ;;  %v271_v34 = vrot.slane %v259_v22, 5  ;;  %v973_v36 = vsel %vm249_vm0, %v340_v23, 0.0  ;;  %v353_v37 = vcombine.high %v937_v19, %v937_v19  ;;  %v285_v38 = vrot.slane %v926_v15, 5  ;;  %v343_v45 = vld [vmem:[%s906_s13 + $0xc] sm:$0xf]  ;;  %v332_v56 = vld [vmem:[%s1133_s2 + $0x40] sm:$0xff] }
  0x14   : > { %756 = vmatpush3.msra.mxu1 %v336_v7  ;;  %722 = vmatprep.subr.mxu0 %v417_v16  ;;  %v796_v35 = vpack.i.bf16 %v384_v24, %v299_v18  ;;  %v267_v40 = vrot.slane %v258_v31, 5  ;;  %v352_v42 = vcombine.high %v973_v36, %v973_v36  ;;  %v354_v43 = vcombine.high %v940_v20, %v940_v20  ;;  %v333_v46 = vld [vmem:[%s1133_s2 + $0x48] sm:$0xff]  ;;  %v331_v2 = vld [vmem:[%s1133_s2 + $0x38] sm:$0xff]  ;;  %s837_s10 = smov 96  }
  0x15   : > { %757 = vmatprep.subr.mxu1 %v335_v17  ;;  %723 = vmatpush3.msra.mxu0 %v417_v16  ;;  %v983_v41 = vsel %vm953_vm3, %v664_v27, %v271_v34  ;;  %v665_v47 = vrot.slane %v921_v12, 9  ;;  %v668_v48 = vrot.slane %v973_v36, 9  ;;  %v669_v49 = vrot.slane %v937_v19, 9  ;;  %v412_v16 = vld [vmem:[%s1134_s3 + $0x30] sm:$0xff]  ;;  %v411_v27 = vld [vmem:[%s1134_s3 + $0x28] sm:$0xff] }
  0x16   : > { %758 = vmatpush3.msra.mxu1 %v335_v17  ;;  %724 = vmatprep.subr.mxu0 %v416_v29  ;;  %v362_v50 = vrot.slane %v353_v37, 5  ;;  %v268_v51 = vsel %vm953_vm3, %v663_v33, %v267_v40  ;;  %v275_v52 = vrot.slane %v260_v32, 5  ;;  %v358_v53 = vrot.slane %v352_v42, 5  ;;  %v330_v17 = vld [vmem:[%s1133_s2 + $0x30] sm:$0xff]  ;;  %v327_v42 = vld [vmem:[%s1133_s2 + $0x18] sm:$0xff] }
  0x17   : > { %759 = vmatprep.subr.mxu1 %v334_v30  ;;  %797 = vrot.lane.b32.xlu1 %v796_v35, %s835_s6  ;;  %v670_v54 = vrot.slane %v940_v20, 9  ;;  %v291_v57 = vcombine.low %v268_v51, %v983_v41  ;;  %v1013_v59 = vsel %vm249_vm0, %v248_v44, 0.0  ;;  %v1016_v60 = vsel %vm249_vm0, %v343_v45, 0.0  ;;  %v408_v44 = vld [vmem:[%s1134_s3 + $0x10] sm:$0xff] }
  0x18   : > { %725 = vmatpush3.msra.mxu0 %v416_v29  ;;  %760 = vmatpush3.msra.mxu1 %v334_v30  ;;  %v1010_v58 = vsel %vm953_vm3, %v669_v49, %v362_v50  ;;  %v359_v61 = vsel %vm953_vm3, %v668_v48, %v358_v53  ;;  %v366_v62 = vrot.slane %v354_v43, 5  ;;  %v300_v63 = vcombine.low %v1013_v59, %v834_v14  ;;  %v326_v45 = vld [vmem:[%s1133_s2 + $0x10] sm:$0xff]  ;;  %v406_v48 = vld [vmem:[%s1134_s3] sm:$0xff] }
  0x19   : > { %726 = vmatprep.subr.mxu0 %v415_v39  ;;  %761 = vmatprep.subr.mxu1 %v333_v46  ;;  %v385_v0 = vcombine.low %v1016_v60, %v834_v14  ;;  %v376_v3 = vcombine.low %v359_v61, %v1010_v58  ;;  %v261_v4 = vcombine.high %v1013_v59, %v1013_v59  ;;  %v666_v5 = vrot.slane %v1013_v59, 9  ;;  %v324_v49 = vld [vmem:[%s1133_s2] sm:$0xff] }
  0x1a   : > { %727 = vmatpush3.msra.mxu0 %v415_v39  ;;  %762 = vmatpush3.msra.mxu1 %v333_v46  ;;  %v276_v6 = vsel %vm953_vm3, %v665_v47, %v275_v52  ;;  %v355_v8 = vcombine.high %v1016_v60, %v1016_v60  ;;  %v671_v9 = vrot.slane %v1016_v60, 9  ;;  %v286_v15 = vsel %vm953_vm3, %v959_v28, %v285_v38  ;;  %v329_v28 = vld [vmem:[%s1133_s2 + $0x28] sm:$0xff]  ;;  %v410_v38 = vld [vmem:[%s1134_s3 + $0x20] sm:$0xff] }
  0x1b   : > { %728 = vmatprep.subr.mxu0 %v414_v55  ;;  %763 = vmatprep.subr.mxu1 %v332_v56  ;;  %v801_v7 = vpack.i.bf16 %v385_v0, %v300_v63  ;;  %v307_v10 = vcombine.low %v983_v41, %v276_v6  ;;  %v806_v13 = vpack.i.bf16 %v376_v3, %v291_v57  ;;  %v279_v14 = vrot.slane %v261_v4, 5  ;;  %v328_v39 = vld [vmem:[%s1133_s2 + $0x20] sm:$0xff]  ;;  %v409_v41 = vld [vmem:[%s1134_s3 + $0x18] sm:$0xff]  ;;  %v407_v46 = vld [vmem:[%s1134_s3 + $0x8] sm:$0xff] }
  0x1c   : > { %729 = vmatpush3.msra.mxu0 %v414_v55  ;;  %764 = vmatpush3.msra.mxu1 %v332_v56  ;;  %v367_v18 = vsel %vm953_vm3, %v670_v54, %v366_v62  ;;  %v370_v21 = vrot.slane %v355_v8, 5  ;;  %v372_v22 = vcombine.low %v973_v36, %v937_v19  ;;  %v287_v23 = vcombine.low %v949_v25, %v918_v11  ;;  %v325_v47 = vld [vmem:[%s1133_s2 + $0x8] sm:$0xff] }
  0x1d   : > { %730 = vmatprep.subr.mxu0 %v413_v1  ;;  %765 = vmatprep.subr.mxu1 %v331_v2  ;;  %v280_v24 = vsel %vm953_vm3, %v666_v5, %v279_v14  ;;  %v373_v29 = vcombine.low %v940_v20, %v1016_v60  ;;  %v288_v30 = vcombine.low %v921_v12, %v1013_v59  ;;  %v672_v14 = vld [vmem:[%s1135_s4] ss:$0 sm:$0xff] }
  0x1e   : > { %802 = vrot.lane.b32.xlu1 %v801_v7, %s835_s6  ;;  %731 = vmatpush3.msra.mxu0 %v413_v1  ;;  %v292_v31 = vcombine.low %v276_v6, %v280_v24  ;;  %v371_v32 = vsel %vm953_vm3, %v671_v9, %v370_v21  ;;  %v308_v33 = vcombine.low %v280_v24, %v286_v15 }
  0x1f   : > { %807 = vrot.lane.b32.xlu0 %v806_v13, %s836_s21  ;;  %766 = vmatpush3.msra.mxu1 %v331_v2  ;;  %v392_v34 = vcombine.low %v1010_v58, %v367_v18  ;;  %v377_v35 = vcombine.low %v367_v18, %v371_v32  ;;  %v393_v37 = vcombine.low %v371_v32, %v286_v15 }
  0x20   : > { %732 = vmatprep.subr.mxu0 %v412_v16  ;;  %767 = vmatprep.subr.mxu1 %v330_v17 }
  0x21   : > { %733 = vmatpush3.msra.mxu0 %v412_v16  ;;  %768 = vmatpush3.msra.mxu1 %v330_v17  ;;  %v811_v26 = vpack.i.bf16 %v377_v35, %v292_v31  ;;  %v821_v40 = vpack.i.bf16 %v393_v37, %v308_v33  ;;  %v816_v43 = vpack.i.bf16 %v392_v34, %v307_v10 }
  0x22   : > { %734 = vmatprep.subr.mxu0 %v411_v27  ;;  %769 = vmatprep.subr.mxu1 %v329_v28 }
  0x23   : > { %735 = vmatpush3.msra.mxu0 %v411_v27  ;;  %770 = vmatpush3.msra.mxu1 %v329_v28 }
  0x24   : > { %736 = vmatprep.subr.mxu0 %v410_v38  ;;  %771 = vmatprep.subr.mxu1 %v328_v39 }
  0x25   : > { %812 = vrot.lane.b32.xlu0 %v811_v26, %s836_s21  ;;  %822 = vrot.lane.b32.xlu1 %v821_v40, %s837_s10 }
  0x26   : > { %737 = vmatpush3.msra.mxu0 %v410_v38  ;;  %772 = vmatpush3.msra.mxu1 %v328_v39 }
  0x27   : > { %738 = vmatprep.subr.mxu0 %v409_v41  ;;  %773 = vmatprep.subr.mxu1 %v327_v42 }
  0x28   : > { %739 = vmatpush3.msra.mxu0 %v409_v41  ;;  %774 = vmatpush3.msra.mxu1 %v327_v42 }
  0x29   : > { %817 = vrot.lane.b32.xlu0 %v816_v43, %s837_s10  ;;  %740 = vmatprep.subr.mxu0 %v408_v44 }
  0x2a   : > { %775 = vmatprep.subr.mxu1 %v326_v45  ;;  %741 = vmatpush3.msra.mxu0 %v408_v44 }
  0x2b   : > { %776 = vmatpush3.msra.mxu1 %v326_v45  ;;  %742 = vmatprep.subr.mxu0 %v407_v46 }
  0x2c   : > { %777 = vmatprep.subr.mxu1 %v325_v47  ;;  %743 = vmatpush3.msra.mxu0 %v407_v46 }
  0x2d   : > { %778 = vmatpush3.msra.mxu1 %v325_v47  ;;  %744 = vmatprep.subr.mxu0 %v406_v48 }
  0x2e   : > { %779 = vmatprep.subr.mxu1 %v324_v49  ;;  %745 = vmatpush3.msra.mxu0 %v406_v48 }
  0x2f   : > { %780 = vmatpush3.msra.mxu1 %v324_v49 }
  0x89   : > { %v798_v50 = vpop.permute.xlu1 %797 }
  0x8a   : > { %v800_v63 = vunpack.i.h.bf16 %v798_v50  ;;  %v799_v0 = vunpack.i.l.bf16 %v798_v50 }
  0x90   : > { %v803_v52 = vpop.permute.xlu1 %802 }
  0x91   : > { %v808_v51 = vpop.permute.xlu0 %807  ;;  %v805_v56 = vunpack.i.h.bf16 %v803_v52  ;;  %v804_v57 = vunpack.i.l.bf16 %v803_v52 }
  0x92   : > { %v810_v53 = vunpack.i.h.bf16 %v808_v51  ;;  %v809_v54 = vunpack.i.l.bf16 %v808_v51 }
  0x94   : > { %v400_v1 = vsel %vm315_vm4, %v372_v22, %v810_v53  ;;  %v316_v2 = vsel %vm315_vm4, %v287_v23, %v809_v54 }
  0x95   : > { %v402_v11 = vsel %vm318_vm5, %v400_v1, %v800_v63  ;;  %v319_v25 = vsel %vm318_vm5, %v316_v2, %v799_v0 }
  0x97   : > { %v813_v55 = vpop.permute.xlu0 %812  ;;  %v823_v62 = vpop.permute.xlu1 %822 }
  0x98   : > { %v815_v58 = vunpack.i.h.bf16 %v813_v55  ;;  %v814_v61 = vunpack.i.l.bf16 %v813_v55  ;;  %v825_v5 = vunpack.i.h.bf16 %v823_v62  ;;  %v824_v6 = vunpack.i.l.bf16 %v823_v62 }
  0x9a   : > { %v401_v3 = vsel %vm315_vm4, %v373_v29, %v815_v58  ;;  %v317_v4 = vsel %vm315_vm4, %v288_v30, %v814_v61 }
  0x9b   : > { %v818_v7 = vpop.permute.xlu0 %817  ;;  %v403_v19 = vsel %vm318_vm5, %v401_v3, %v805_v56  ;;  %v320_v36 = vsel %vm318_vm5, %v317_v4, %v804_v57 }
  0x9c   : > { %v820_v8 = vunpack.i.h.bf16 %v818_v7  ;;  %v819_v9 = vunpack.i.l.bf16 %v818_v7  ;;  %v405_v12 = vsel %vm321_vm6, %v403_v19, %v825_v5  ;;  %v323_v59 = vsel %vm321_vm6, %v320_v36, %v824_v6 }
  0x9e   : > { %v404_v20 = vsel %vm321_vm6, %v402_v11, %v820_v8  ;;  %v322_v60 = vsel %vm321_vm6, %v319_v25, %v819_v9 }
  0x9f   : > { %746 = vmatprep.mubr.f32.mxu0 %v404_v20  ;;  %781 = vmatprep.mubr.f32.mxu1 %v322_v60 }
  0xa0   : > { %747 = vmatmul.mubr.f32.vlgmr.msra.gmra.mxu0 %v405_v12  ;;  %782 = vmatmul.mubr.f32.vlgmr.msra.gmra.mxu1 %v323_v59 }
 0x160   : > { %v748_v10 = vpop.f32.mrf.mxu0  ;;  %v783_v13 = vpop.f32.mrf.mxu1 }
 0x161   : > { %v569_v15 = vadd.f32 %v783_v13, %v748_v10 }
 0x162   : > { %v488_v16 = vpop.f32.mrf.mxu0  ;;  %v563_v17 = vpop.f32.mrf.mxu1 }
 0x163   : > { %v580_v18 = vadd.f32 %v672_v14, %v569_v15  ;;  %v564_v21 = vadd.f32 %v563_v17, %v488_v16 }
 0x165   : > { %v582_v22 = vmax.f32 %v580_v18, 0.0  ;;  %v579_v23 = vadd.f32 %v672_v14, %v564_v21 }
 0x167   : > { %584 = vst.msk [vmem:[%s244_s28 + $0x8] sm:$0xff] %vm318_vm5, %v582_v22  ;;  %v581_v24 = vmax.f32 %v579_v23, 0.0 }
 0x169   : > { %583 = vst.msk [vmem:[%s244_s28] sm:$0xff] %vm318_vm5, %v581_v24 }
 0x16a PF: > { %s15_s18 = sadd.s32 1, %s832_s18  }
 0x16b   : > { %p12_p4 = scmp.ge.s32.totalorder %s15_s18, 4  }
 0x16d   :  { %14 = sbr.rel (!%p12_p4) target bundleno = 1 (0x1), region = 73 }

// kernel: unet_forward.11
= control target key start
LH: loop header
LB: loop body
LE: loop exit
PB: predicated region body
PF: predicated region fallthrough
CT: control target
= control target key end

     0   :  { %s1043_s18 = smov 0   ;;  %s1382_s0 = inlined_call_operand.vmem [shape: f32[2,8,8,16], index: 0, kind: input, shape index: {}]   ;;  %s1383_s1 = inlined_call_operand.vmem [shape: f32[2,8,8,16], index: 1, kind: input, shape index: {}]   ;;  %s1384_s2 = inlined_call_operand.vmem [shape: f32[64,4], index: 2, kind: input, shape index: {}]   ;;  %s1385_s3 = inlined_call_operand.vmem [shape: f32[64,4], index: 3, kind: input, shape index: {}]   ;;  %s1386_s4 = inlined_call_operand.vmem [shape: f32[1,4], index: 4, kind: input, shape index: {}]   ;;  %s1387_s5 = inlined_call_operand.vmem [shape: f32[2,64,4], index: 5, kind: output, shape index: {}]  }
   0x1 LB: > { %s868_s19 = sadd.s32 4294967295, %s1007_s18   ;;  %p872_p0 = scmp.ge.s32.totalorder %s1007_s18, 1  ;;  %s1007_s18 = sphi %s1043_s18, %s15_s18  }
   0x2   : > { %p197_p1 = scmp.lt.s32.totalorder %s1007_s18, 3 }
   0x4   : > { %p198_p2 = pnand %p872_p0, %p197_p1 }
   0x5   : > { %p230_p3 = scmp.lt.s32.totalorder (!%p198_p2), %s868_s19, 1  ;;  %s1011_s20 = smov (!%p198_p2), 16  }
   0x6   : > { %201 = sbr.rel (%p198_p2) target bundleno = 425 (0x1a9), region = 40  ;;  %s1012_s12 = smov (!%p198_p2), 48  }
   0xb   : > { %v517_v0 = vld [vmem:[%s1385_s3 + $0x38] sm:$0xff]  ;;  %v516_v1 = vld [vmem:[%s1385_s3 + $0x30] sm:$0xff]  ;;  %s1389_s19 = smov (!%p230_p3, %s868_s19), 1  ;;  %v515_v3 = vld [vmem:[%s1385_s3 + $0x28] sm:$0xff]  ;;  %v1009_v6 = vmov 0.0   ;;  %vm262_vm0 = vcmask 1046528  }
   0xc   : > { %933 = vmatprep.subr.mxu0 %v517_v0  ;;  %v387_v2 = vld [vmem:[%s1384_s2 + $0x38] sm:$0xff]  ;;  %v386_v4 = vld [vmem:[%s1384_s2 + $0x30] sm:$0xff]  ;;  %s1066_s30 = sshll.u32 %s1389_s19, 6  ;;  %v514_v5 = vld [vmem:[%s1385_s3 + $0x20] sm:$0xff]  ;;  %v1078_v7 = vrot.slane %v1009_v6, 1  ;;  %s1010_s19 = smov 32  }
   0xd   : > { %934 = vmatpush3.msra.mxu0 %v517_v0  ;;  %961 = vmatprep.subr.mxu1 %v387_v2  ;;  %s1075_s10 = scalar_lea.vmem %s1382_s0, %s1066_s30  ;;  %v385_v8 = vld [vmem:[%s1384_s2 + $0x28] sm:$0xff]  ;;  %s1093_s15 = scalar_lea.vmem %s1383_s1, %s1066_s30  ;;  %v513_v11 = vld [vmem:[%s1385_s3 + $0x18] sm:$0xff]  ;;  %v384_v20 = vld [vmem:[%s1384_s2 + $0x20] sm:$0xff]  ;;  %vm353_vm1 = vcmask 130048   ;;  %vm362_vm2 = vcmask 261120   ;;  %vm371_vm3 = vcmask 392192  }
   0xe   : > { %935 = vmatprep.subr.mxu0 %v516_v1  ;;  %962 = vmatpush3.msra.mxu1 %v387_v2  ;;  %v1084_v9 = vld [vmem:[%s1075_s10 + $0x8] sm:$0xff]  ;;  %v1087_v10 = vld [vmem:[%s1075_s10] sm:$0xff]  ;;  %v512_v21 = vld [vmem:[%s1385_s3 + $0x10] sm:$0xff]  ;;  %vm518_vm4 = vcmask 523264   ;;  %vm792_vm5 = vcmask 31744  }
   0xf   : > { %936 = vmatpush3.msra.mxu0 %v516_v1  ;;  %963 = vmatprep.subr.mxu1 %v386_v4  ;;  %v263_v12 = vrot.slane %v1087_v10, 1  ;;  %v1102_v13 = vld [vmem:[%s1093_s15] sm:$0xff]  ;;  %v266_v14 = vrot.slane %v1084_v9, 1  ;;  %v1106_v15 = vld [vmem:[%s1093_s15 + $0x8] sm:$0xff]  ;;  %v383_v23 = vld [vmem:[%s1384_s2 + $0x18] sm:$0xff] }
  0x10   : > { %937 = vmatprep.subr.mxu0 %v515_v3  ;;  %964 = vmatpush3.msra.mxu1 %v386_v4  ;;  %v404_v16 = vrot.slane %v1102_v13, 1  ;;  %v406_v18 = vrot.slane %v1106_v15, 1  ;;  %v511_v24 = vld [vmem:[%s1385_s3 + $0x8] sm:$0xff]  ;;  %v382_v25 = vld [vmem:[%s1384_s2 + $0x10] sm:$0xff]  ;;  %v510_v26 = vld [vmem:[%s1385_s3] sm:$0xff] }
  0x11   : > { %938 = vmatpush3.msra.mxu0 %v515_v3  ;;  %965 = vmatprep.subr.mxu1 %v385_v8  ;;  %v265_v17 = vsel %vm262_vm0, %v263_v12, %v1078_v7  ;;  %v267_v22 = vsel %vm262_vm0, %v266_v14, %v1078_v7  ;;  %v1142_v28 = vld [vmem:[%s1093_s15 + $0x10] sm:$0xff]  ;;  %v381_v29 = vld [vmem:[%s1384_s2 + $0x8] sm:$0xff]  ;;  %v380_v31 = vld [vmem:[%s1384_s2] sm:$0xff] }
  0x12   : > { %305 = vrot.lane.b32.xlu1 %v1084_v9, %s1010_s19  ;;  %939 = vmatprep.subr.mxu0 %v514_v5  ;;  %v405_v19 = vsel %vm262_vm0, %v404_v16, %v1078_v7  ;;  %v407_v27 = vsel %vm262_vm0, %v406_v18, %v1078_v7  ;;  %v1150_v30 = vld [vmem:[%s1075_s10 + $0x10] sm:$0xff]  ;;  %v408_v32 = vrot.slane %v1142_v28, 1  ;;  %v1168_v36 = vld [vmem:[%s1075_s10 + $0x18] sm:$0xff]  ;;  %v1188_v42 = vld [vmem:[%s1093_s15 + $0x20] sm:$0xff] }
  0x13   : > { %940 = vmatpush3.msra.mxu0 %v514_v5  ;;  %966 = vmatpush3.msra.mxu1 %v385_v8  ;;  %v268_v33 = vrot.slane %v1150_v30, 1  ;;  %v270_v37 = vrot.slane %v1168_v36, 1  ;;  %v1174_v38 = vld [vmem:[%s1093_s15 + $0x18] sm:$0xff]  ;;  %v1193_v43 = vld [vmem:[%s1075_s10 + $0x20] sm:$0xff]  ;;  %v412_v44 = vrot.slane %v1188_v42, 1  ;;  %v1208_v48 = vld [vmem:[%s1075_s10 + $0x28] sm:$0xff] }
  0x14   : > { %941 = vmatprep.subr.mxu0 %v513_v11  ;;  %281 = vrot.lane.b32.xlu0 %v265_v17, %s1011_s20  ;;  %v409_v34 = vsel %vm262_vm0, %v408_v32, %v1078_v7  ;;  %v410_v40 = vrot.slane %v1174_v38, 1  ;;  %v272_v45 = vrot.slane %v1193_v43, 1  ;;  %v274_v49 = vrot.slane %v1208_v48, 1  ;;  %v1214_v50 = vld [vmem:[%s1093_s15 + $0x28] sm:$0xff]  ;;  %v1228_v54 = vld [vmem:[%s1093_s15 + $0x30] sm:$0xff]  ;;  %v1248_v60 = vld [vmem:[%s1075_s10 + $0x38] sm:$0xff] }
  0x15   : > { %942 = vmatpush3.msra.mxu0 %v513_v11  ;;  %967 = vmatprep.subr.mxu1 %v384_v20  ;;  %v269_v35 = vsel %vm262_vm0, %v268_v33, %v1078_v7  ;;  %v271_v39 = vsel %vm262_vm0, %v270_v37, %v1078_v7  ;;  %v413_v46 = vsel %vm262_vm0, %v412_v44, %v1078_v7  ;;  %v414_v52 = vrot.slane %v1214_v50, 1  ;;  %v1233_v55 = vld [vmem:[%s1075_s10 + $0x30] sm:$0xff]  ;;  %v1254_v62 = vld [vmem:[%s1093_s15 + $0x38] sm:$0xff] }
  0x16   : > { %444 = vrot.lane.b32.xlu1 %v1106_v15, %s1010_s19  ;;  %943 = vmatprep.subr.mxu0 %v512_v21  ;;  %v411_v41 = vsel %vm262_vm0, %v410_v40, %v1078_v7  ;;  %v273_v47 = vsel %vm262_vm0, %v272_v45, %v1078_v7  ;;  %v275_v51 = vsel %vm262_vm0, %v274_v49, %v1078_v7  ;;  %v416_v56 = vrot.slane %v1228_v54, 1 }
  0x17   : > { %968 = vmatpush3.msra.mxu1 %v384_v20  ;;  %944 = vmatpush3.msra.mxu0 %v512_v21  ;;  %v415_v53 = vsel %vm262_vm0, %v414_v52, %v1078_v7  ;;  %v276_v57 = vrot.slane %v1233_v55, 1  ;;  %v278_v61 = vrot.slane %v1248_v60, 1  ;;  %v418_v0 = vrot.slane %v1254_v62, 1 }
  0x18   : > { %420 = vrot.lane.b32.xlu0 %v405_v19, %s1011_s20  ;;  %969 = vmatprep.subr.mxu1 %v383_v23  ;;  %v417_v58 = vsel %vm262_vm0, %v416_v56, %v1078_v7 }
  0x19   : > { %945 = vmatprep.subr.mxu0 %v511_v24  ;;  %970 = vmatpush3.msra.mxu1 %v383_v23  ;;  %v277_v59 = vsel %vm262_vm0, %v276_v57, %v1078_v7  ;;  %v279_v63 = vsel %vm262_vm0, %v278_v61, %v1078_v7  ;;  %v419_v1 = vsel %vm262_vm0, %v418_v0, %v1078_v7 }
  0x1a   : > { %283 = vrot.lane.b32.xlu1 %v267_v22, %s1011_s20  ;;  %946 = vmatpush3.msra.mxu0 %v511_v24 }
  0x1b   : > { %971 = vmatprep.subr.mxu1 %v382_v25  ;;  %947 = vmatprep.subr.mxu0 %v510_v26 }
  0x1c   : > { %422 = vrot.lane.b32.xlu0 %v407_v27, %s1011_s20  ;;  %972 = vmatpush3.msra.mxu1 %v382_v25 }
  0x1d   : > { %948 = vmatpush3.msra.mxu0 %v510_v26  ;;  %973 = vmatprep.subr.mxu1 %v381_v29 }
  0x1e   : > { %329 = vrot.lane.b32.xlu1 %v267_v22, %s1012_s12  ;;  %974 = vmatpush3.msra.mxu1 %v381_v29 }
  0x1f   : > { %975 = vmatprep.subr.mxu1 %v380_v31 }
  0x20   : > { %307 = vrot.lane.b32.xlu0 %v1150_v30, %s1010_s19  ;;  %976 = vmatpush3.msra.mxu1 %v380_v31 }
  0x22   : > { %465 = vrot.lane.b32.xlu1 %v407_v27, %s1012_s12 }
  0x24   : > { %446 = vrot.lane.b32.xlu0 %v1142_v28, %s1010_s19 }
  0x26   : > { %467 = vrot.lane.b32.xlu1 %v409_v34, %s1012_s12 }
  0x28   : > { %331 = vrot.lane.b32.xlu0 %v269_v35, %s1012_s12 }
  0x2a   : > { %424 = vrot.lane.b32.xlu1 %v409_v34, %s1011_s20 }
  0x2c   : > { %285 = vrot.lane.b32.xlu0 %v269_v35, %s1011_s20 }
  0x2e   : > { %309 = vrot.lane.b32.xlu1 %v1168_v36, %s1010_s19 }
  0x30   : > { %287 = vrot.lane.b32.xlu0 %v271_v39, %s1011_s20 }
  0x32   : > { %448 = vrot.lane.b32.xlu1 %v1174_v38, %s1010_s19 }
  0x34   : > { %426 = vrot.lane.b32.xlu0 %v411_v41, %s1011_s20 }
  0x36   : > { %333 = vrot.lane.b32.xlu1 %v271_v39, %s1012_s12 }
  0x38   : > { %311 = vrot.lane.b32.xlu0 %v1193_v43, %s1010_s19 }
  0x3a   : > { %469 = vrot.lane.b32.xlu1 %v411_v41, %s1012_s12 }
  0x3c   : > { %450 = vrot.lane.b32.xlu0 %v1188_v42, %s1010_s19 }
  0x3e   : > { %471 = vrot.lane.b32.xlu1 %v413_v46, %s1012_s12 }
  0x40   : > { %335 = vrot.lane.b32.xlu0 %v273_v47, %s1012_s12 }
  0x42   : > { %428 = vrot.lane.b32.xlu1 %v413_v46, %s1011_s20 }
  0x44   : > { %289 = vrot.lane.b32.xlu0 %v273_v47, %s1011_s20 }
  0x46   : > { %313 = vrot.lane.b32.xlu1 %v1208_v48, %s1010_s19 }
  0x48   : > { %291 = vrot.lane.b32.xlu0 %v275_v51, %s1011_s20 }
  0x4a   : > { %452 = vrot.lane.b32.xlu1 %v1214_v50, %s1010_s19 }
  0x4c   : > { %430 = vrot.lane.b32.xlu0 %v415_v53, %s1011_s20 }
  0x4e   : > { %337 = vrot.lane.b32.xlu1 %v275_v51, %s1012_s12 }
  0x50   : > { %315 = vrot.lane.b32.xlu0 %v1233_v55, %s1010_s19 }
  0x52   : > { %473 = vrot.lane.b32.xlu1 %v415_v53, %s1012_s12 }
  0x54   : > { %454 = vrot.lane.b32.xlu0 %v1228_v54, %s1010_s19 }
  0x56   : > { %475 = vrot.lane.b32.xlu1 %v417_v58, %s1012_s12 }
  0x58   : > { %339 = vrot.lane.b32.xlu0 %v277_v59, %s1012_s12 }
  0x5a   : > { %432 = vrot.lane.b32.xlu1 %v417_v58, %s1011_s20 }
  0x5c   : > { %293 = vrot.lane.b32.xlu0 %v277_v59, %s1011_s20 }
  0x5e   : > { %317 = vrot.lane.b32.xlu1 %v1248_v60, %s1010_s19 }
  0x60   : > { %295 = vrot.lane.b32.xlu0 %v279_v63, %s1011_s20 }
  0x62   : > { %456 = vrot.lane.b32.xlu1 %v1254_v62, %s1010_s19 }
  0x64   : > { %434 = vrot.lane.b32.xlu0 %v419_v1, %s1011_s20 }
  0x66   : > { %341 = vrot.lane.b32.xlu1 %v279_v63, %s1012_s12 }
  0x68   : > { %319 = vrot.lane.b32.xlu0 %v1009_v6, %s1010_s19  ;;  %s1361_s19 = scalar_lea.vmem %s1387_s5, %s1066_s30 }
  0x6a   : > { %343 = vrot.lane.b32.xlu1 %v1078_v7, %s1012_s12 }
  0x6c   : > { %477 = vrot.lane.b32.xlu0 %v419_v1, %s1012_s12 }
  0x84   : > { %v306_v2 = vpop.permute.xlu1 %305 }
  0x86   : > { %v282_v3 = vpop.permute.xlu0 %281 }
  0x87   : > { %v354_v11 = vsel %vm353_vm1, %v1087_v10, %v282_v3 }
  0x88   : > { %v445_v4 = vpop.permute.xlu1 %444  ;;  %v363_v6 = vsel %vm362_vm2, %v354_v11, %v306_v2 }
  0x8a   : > { %v421_v5 = vpop.permute.xlu0 %420 }
  0x8b   : > { %v486_v7 = vsel %vm353_vm1, %v1102_v13, %v421_v5 }
  0x8c   : > { %v284_v8 = vpop.permute.xlu1 %283  ;;  %v494_v19 = vsel %vm362_vm2, %v486_v7, %v445_v4 }
  0x8d   : > { %v355_v24 = vsel %vm353_vm1, %v1084_v9, %v284_v8 }
  0x8e   : > { %v423_v12 = vpop.permute.xlu0 %422 }
  0x8f   : > { %v487_v20 = vsel %vm353_vm1, %v1106_v15, %v423_v12 }
  0x90   : > { %v330_v14 = vpop.permute.xlu1 %329 }
  0x91   : > { %v372_v16 = vsel %vm371_vm3, %v363_v6, %v330_v14 }
  0x92   : > { %977 = vmatprep.mubr.msk.f32.mxu1 %vm518_vm4, %v372_v16  ;;  %v308_v17 = vpop.permute.xlu0 %307 }
  0x93   : > { %v364_v25 = vsel %vm362_vm2, %v355_v24, %v308_v17 }
  0x94   : > { %v466_v18 = vpop.permute.xlu1 %465 }
  0x95   : > { %v502_v10 = vsel %vm371_vm3, %v494_v19, %v466_v18 }
  0x96   : > { %949 = vmatprep.mubr.msk.f32.mxu0 %vm518_vm4, %v502_v10  ;;  %v447_v21 = vpop.permute.xlu0 %446 }
  0x97   : > { %v495_v22 = vsel %vm362_vm2, %v487_v20, %v447_v21 }
  0x98   : > { %v468_v23 = vpop.permute.xlu1 %467 }
  0x99   : > { %v503_v13 = vsel %vm371_vm3, %v495_v22, %v468_v23 }
  0x9a   : > { %950 = vmatmul.mubr.msk.f32.vlgmr.msra.gmra.mxu0 %vm518_vm4, %v503_v13  ;;  %v332_v26 = vpop.permute.xlu0 %331 }
  0x9b   : > { %v373_v27 = vsel %vm371_vm3, %v364_v25, %v332_v26 }
  0x9c   : > { %v425_v29 = vpop.permute.xlu1 %424  ;;  %978 = vmatmul.mubr.msk.f32.vlgmr.msra.gmra.mxu1 %vm518_vm4, %v373_v27 }
  0x9d   : > { %v488_v40 = vsel %vm353_vm1, %v1142_v28, %v425_v29 }
  0x9e   : > { %v286_v15 = vpop.permute.xlu0 %285 }
  0x9f   : > { %v356_v34 = vsel %vm353_vm1, %v1150_v30, %v286_v15 }
  0xa0   : > { %v310_v31 = vpop.permute.xlu1 %309 }
  0xa1   : > { %v365_v9 = vsel %vm362_vm2, %v356_v34, %v310_v31 }
  0xa2   : > { %v288_v32 = vpop.permute.xlu0 %287 }
  0xa3   : > { %v357_v28 = vsel %vm353_vm1, %v1168_v36, %v288_v32 }
  0xa4   : > { %v449_v33 = vpop.permute.xlu1 %448 }
  0xa5   : > { %v496_v44 = vsel %vm362_vm2, %v488_v40, %v449_v33 }
  0xa6   : > { %v427_v35 = vpop.permute.xlu0 %426 }
  0xa7   : > { %v489_v30 = vsel %vm353_vm1, %v1174_v38, %v427_v35 }
  0xa8   : > { %v334_v37 = vpop.permute.xlu1 %333 }
  0xa9   : > { %v374_v39 = vsel %vm371_vm3, %v365_v9, %v334_v37 }
  0xaa   : > { %980 = vmatprep.mubr.msk.f32.mxu1 %vm518_vm4, %v374_v39  ;;  %v312_v41 = vpop.permute.xlu0 %311 }
  0xab   : > { %v366_v53 = vsel %vm362_vm2, %v357_v28, %v312_v41 }
  0xac   : > { %v470_v45 = vpop.permute.xlu1 %469 }
  0xad   : > { %v504_v46 = vsel %vm371_vm3, %v496_v44, %v470_v45 }
  0xae   : > { %952 = vmatprep.mubr.msk.f32.mxu0 %vm518_vm4, %v504_v46  ;;  %v451_v47 = vpop.permute.xlu0 %450 }
  0xaf   : > { %v497_v49 = vsel %vm362_vm2, %v489_v30, %v451_v47 }
  0xb0   : > { %v472_v51 = vpop.permute.xlu1 %471 }
  0xb1   : > { %v505_v52 = vsel %vm371_vm3, %v497_v49, %v472_v51 }
  0xb2   : > { %953 = vmatmul.mubr.msk.f32.gmra.mxu0 %vm518_vm4, %v505_v52  ;;  %v336_v56 = vpop.permute.xlu0 %335 }
  0xb3   : > { %v375_v57 = vsel %vm371_vm3, %v366_v53, %v336_v56 }
  0xb4   : > { %v429_v58 = vpop.permute.xlu1 %428  ;;  %981 = vmatmul.mubr.msk.f32.gmra.mxu1 %vm518_vm4, %v375_v57 }
  0xb5   : > { %v490_v4 = vsel %vm353_vm1, %v1188_v42, %v429_v58 }
  0xb6   : > { %v290_v38 = vpop.permute.xlu0 %289 }
  0xb7   : > { %v358_v0 = vsel %vm353_vm1, %v1193_v43, %v290_v38 }
  0xb8   : > { %v314_v59 = vpop.permute.xlu1 %313 }
  0xb9   : > { %v367_v36 = vsel %vm362_vm2, %v358_v0, %v314_v59 }
  0xba   : > { %v292_v61 = vpop.permute.xlu0 %291 }
  0xbb   : > { %v359_v42 = vsel %vm353_vm1, %v1208_v48, %v292_v61 }
  0xbc   : > { %v453_v63 = vpop.permute.xlu1 %452 }
  0xbd   : > { %v498_v8 = vsel %vm362_vm2, %v490_v4, %v453_v63 }
  0xbe   : > { %v431_v1 = vpop.permute.xlu0 %430 }
  0xbf   : > { %v491_v43 = vsel %vm353_vm1, %v1214_v50, %v431_v1 }
  0xc0   : > { %v338_v2 = vpop.permute.xlu1 %337 }
  0xc1   : > { %v376_v3 = vsel %vm371_vm3, %v367_v36, %v338_v2 }
  0xc2   : > { %983 = vmatprep.mubr.msk.f32.mxu1 %vm518_vm4, %v376_v3  ;;  %v316_v5 = vpop.permute.xlu0 %315 }
  0xc3   : > { %v368_v17 = vsel %vm362_vm2, %v359_v42, %v316_v5 }
  0xc4   : > { %v474_v11 = vpop.permute.xlu1 %473 }
  0xc5   : > { %v506_v12 = vsel %vm371_vm3, %v498_v8, %v474_v11 }
  0xc6   : > { %955 = vmatprep.mubr.msk.f32.mxu0 %vm518_vm4, %v506_v12  ;;  %v455_v14 = vpop.permute.xlu0 %454 }
  0xc7   : > { %v499_v6 = vsel %vm362_vm2, %v491_v43, %v455_v14 }
  0xc8   : > { %v476_v7 = vpop.permute.xlu1 %475 }
  0xc9   : > { %v507_v16 = vsel %vm371_vm3, %v499_v6, %v476_v7 }
  0xca   : > { %956 = vmatmul.mubr.msk.f32.gmra.mxu0 %vm518_vm4, %v507_v16  ;;  %v340_v18 = vpop.permute.xlu0 %339 }
  0xcb   : > { %v377_v19 = vsel %vm371_vm3, %v368_v17, %v340_v18 }
  0xcc   : > { %v433_v10 = vpop.permute.xlu1 %432  ;;  %984 = vmatmul.mubr.msk.f32.gmra.mxu1 %vm518_vm4, %v377_v19 }
  0xcd   : > { %v492_v32 = vsel %vm353_vm1, %v1228_v54, %v433_v10  ;;  %v895_v54 = vld [vmem:[%s1386_s4] ss:$0 sm:$0xff] }
  0xce   : > { %v294_v50 = vpop.permute.xlu0 %293 }
  0xcf   : > { %v360_v23 = vsel %vm353_vm1, %v1233_v55, %v294_v50 }
  0xd0   : > { %v318_v20 = vpop.permute.xlu1 %317 }
  0xd1   : > { %v369_v48 = vsel %vm362_vm2, %v360_v23, %v318_v20 }
  0xd2   : > { %v296_v21 = vpop.permute.xlu0 %295 }
  0xd3   : > { %v361_v26 = vsel %vm353_vm1, %v1248_v60, %v296_v21 }
  0xd4   : > { %v457_v22 = vpop.permute.xlu1 %456 }
  0xd5   : > { %v500_v34 = vsel %vm362_vm2, %v492_v32, %v457_v22 }
  0xd6   : > { %v435_v13 = vpop.permute.xlu0 %434 }
  0xd7   : > { %v493_v31 = vsel %vm353_vm1, %v1254_v62, %v435_v13 }
  0xd8   : > { %v342_v24 = vpop.permute.xlu1 %341 }
  0xd9   : > { %v378_v25 = vsel %vm371_vm3, %v369_v48, %v342_v24 }
  0xda   : > { %986 = vmatprep.mubr.msk.f32.mxu1 %vm518_vm4, %v378_v25  ;;  %v320_v27 = vpop.permute.xlu0 %319 }
  0xdb   : > { %v370_v29 = vsel %vm362_vm2, %v361_v26, %v320_v27  ;;  %v501_v33 = vsel %vm362_vm2, %v493_v31, %v320_v27 }
  0xdc   : > { %v344_v15 = vpop.permute.xlu1 %343 }
  0xdd   : > { %v379_v55 = vsel %vm371_vm3, %v370_v29, %v344_v15  ;;  %v509_v9 = vsel %vm371_vm3, %v501_v33, %v344_v15 }
  0xde   : > { %987 = vmatmul.mubr.msk.f32.gmra.mxu1 %vm518_vm4, %v379_v55  ;;  %v478_v60 = vpop.permute.xlu0 %477 }
  0xdf   : > { %v508_v35 = vsel %vm371_vm3, %v500_v34, %v478_v60 }
  0xe0   : > { %958 = vmatprep.mubr.msk.f32.mxu0 %vm518_vm4, %v508_v35 }
  0xe1   : > { %959 = vmatmul.mubr.msk.f32.gmra.mxu0 %vm518_vm4, %v509_v9 }
 0x15a   : > { %v951_v62 = vpop.f32.mrf.mxu0 }
 0x15c   : > { %v979_v37 = vpop.f32.mrf.mxu1  ;;  %v609_v40 = vpop.f32.mrf.mxu0 }
 0x15d   : > { %v744_v39 = vadd.f32 %v979_v37, %v951_v62 }
 0x15e   : > { %v738_v41 = vpop.f32.mrf.mxu1 }
 0x15f   : > { %v785_v44 = vadd.f32 %v895_v54, %v744_v39  ;;  %v739_v45 = vadd.f32 %v738_v41, %v609_v40 }
 0x161   : > { %794 = vst.msk [vmem:[%s1361_s19 + $0x8] sm:$0xff] %vm792_vm5, %v785_v44  ;;  %v784_v46 = vadd.f32 %v895_v54, %v739_v45 }
 0x163   : > { %793 = vst.msk [vmem:[%s1361_s19] sm:$0xff] %vm792_vm5, %v784_v46 }
 0x172   : > { %v954_v30 = vpop.f32.mrf.mxu0 }
 0x174   : > { %v982_v47 = vpop.f32.mrf.mxu1  ;;  %v619_v51 = vpop.f32.mrf.mxu0 }
 0x175   : > { %v754_v49 = vadd.f32 %v982_v47, %v954_v30 }
 0x176   : > { %v748_v52 = vpop.f32.mrf.mxu1 }
 0x177   : > { %v787_v28 = vadd.f32 %v895_v54, %v754_v49  ;;  %v749_v53 = vadd.f32 %v748_v52, %v619_v51 }
 0x179   : > { %796 = vst.msk [vmem:[%s1361_s19 + $0x18] sm:$0xff] %vm792_vm5, %v787_v28  ;;  %v786_v56 = vadd.f32 %v895_v54, %v749_v53 }
 0x17b   : > { %795 = vst.msk [vmem:[%s1361_s19 + $0x10] sm:$0xff] %vm792_vm5, %v786_v56 }
 0x18a   : > { %v957_v57 = vpop.f32.mrf.mxu0 }
 0x18c   : > { %v985_v58 = vpop.f32.mrf.mxu1  ;;  %v629_v59 = vpop.f32.mrf.mxu0 }
 0x18d   : > { %v764_v38 = vadd.f32 %v985_v58, %v957_v57 }
 0x18e   : > { %v758_v61 = vpop.f32.mrf.mxu1 }
 0x18f   : > { %v789_v63 = vadd.f32 %v895_v54, %v764_v38  ;;  %v759_v0 = vadd.f32 %v758_v61, %v629_v59 }
 0x191   : > { %798 = vst.msk [vmem:[%s1361_s19 + $0x28] sm:$0xff] %vm792_vm5, %v789_v63  ;;  %v788_v1 = vadd.f32 %v895_v54, %v759_v0 }
 0x193   : > { %797 = vst.msk [vmem:[%s1361_s19 + $0x20] sm:$0xff] %vm792_vm5, %v788_v1 }
 0x19e   : > { %v988_v36 = vpop.f32.mrf.mxu1 }
 0x1a0   : > { %v768_v4 = vpop.f32.mrf.mxu1 }
 0x1a1   : > { %v960_v2 = vpop.f32.mrf.mxu0 }
 0x1a2   : > { %v774_v3 = vadd.f32 %v988_v36, %v960_v2 }
 0x1a3   : > { %v639_v5 = vpop.f32.mrf.mxu0 }
 0x1a4   : > { %v791_v8 = vadd.f32 %v895_v54, %v774_v3  ;;  %v769_v11 = vadd.f32 %v768_v4, %v639_v5 }
 0x1a6   : > { %800 = vst.msk [vmem:[%s1361_s19 + $0x38] sm:$0xff] %vm792_vm5, %v791_v8  ;;  %v790_v12 = vadd.f32 %v895_v54, %v769_v11 }
 0x1a8   : > { %799 = vst.msk [vmem:[%s1361_s19 + $0x30] sm:$0xff] %vm792_vm5, %v790_v12 }
 0x1a9 PF: > { %s15_s18 = sadd.s32 1, %s1007_s18  }
 0x1aa   : > { %p12_p4 = scmp.ge.s32.totalorder %s15_s18, 4  }
 0x1ac   :  { %14 = sbr.rel (!%p12_p4) target bundleno = 1 (0x1), region = 73 }

</bundles_post_ra>
